<compile_context>
chip_gen: v7x
topology: tpu7x:2x2x1
jax: 0.10.0
libtpu: 0.0.40
codegen_flags: <defaults>
</compile_context>

<pallas_src>
import jax
import jax.numpy as jnp
from jax.experimental import pallas as pl
from jax.experimental.pallas import tpu as pltpu


def _round_up(x, m):
    return ((x + m - 1) // m) * m


# ----------------------------------------------------------------------------
# Tiled GEMM kernel with fused per-column (BatchNorm) affine epilogue
# ----------------------------------------------------------------------------
def _gemm_bn_kernel(a_ref, b_ref, s_ref, t_ref, o_ref):
    k = pl.program_id(2)

    @pl.when(k == 0)
    def _():
        o_ref[...] = jnp.zeros_like(o_ref)

    # bf16 x bf16 -> f32 accumulation, directly into the resident output block.
    o_ref[...] += jnp.dot(a_ref[...], b_ref[...],
                          preferred_element_type=jnp.float32)

    @pl.when(k == pl.num_programs(2) - 1)
    def _():
        # Fused BatchNorm (per output channel == per GEMM column) affine.
        o_ref[...] = o_ref[...] * s_ref[...] + t_ref[...]


def _gemm_tiles(M, K, N):
    """Adaptive tile sizes (multiples of (8,128)); Kp divisible by tk."""
    tm = 256 if M >= 256 else 128
    tn = 256 if N >= 256 else 128
    kp0 = _round_up(K, 128)
    tk = kp0 if kp0 <= 512 else 512
    return tm, tn, tk, _round_up(M, tm), _round_up(N, tn), _round_up(K, tk)


def matmul_bn_pallas(a, b, scale, shift, tiles):
    """(M,K)@(K,N) with bf16 operands / f32 accumulation, then per-column
    `* scale + shift`.  `tiles` comes from _gemm_tiles."""
    M, Ka = a.shape
    Kb, N = b.shape
    tm, tn, tk, Mp, Np, Kp = tiles
    a_p = jnp.pad(a, ((0, Mp - M), (0, Kp - Ka)))      # no-op when pre-padded
    b_p = jnp.pad(b, ((0, Kp - Kb), (0, Np - N)))
    s_p = jnp.pad(scale, ((0, 0), (0, Np - N)))
    t_p = jnp.pad(shift, ((0, 0), (0, Np - N)))

    flops = 2 * M * N * Kb
    bytes_acc = (Mp * Kp + Kp * Np) * 2 + Mp * Np * 4 + 2 * Np * 4

    out = pl.pallas_call(
        _gemm_bn_kernel,
        out_shape=jax.ShapeDtypeStruct((Mp, Np), jnp.float32),
        grid_spec=pltpu.PrefetchScalarGridSpec(
            num_scalar_prefetch=0,
            grid=(Mp // tm, Np // tn, Kp // tk),
            in_specs=[pl.BlockSpec((tm, tk), lambda i, j, k: (i, k)),
                      pl.BlockSpec((tk, tn), lambda i, j, k: (k, j)),
                      pl.BlockSpec((1, tn), lambda i, j, k: (0, j)),
                      pl.BlockSpec((1, tn), lambda i, j, k: (0, j))],
            out_specs=pl.BlockSpec((tm, tn), lambda i, j, k: (i, j))),
        compiler_params=pltpu.CompilerParams(
            dimension_semantics=("parallel", "parallel", "arbitrary")),
        cost_estimate=pl.CostEstimate(flops=flops, transcendentals=0,
                                      bytes_accessed=bytes_acc),
    )(a_p, b_p, s_p, t_p)
    return out[:M, :N]


def conv2d_bn_nhwc(x_nhwc, conv_p, bn_p, eps=1e-5):
    """'same'-padded Conv2d (bias=False) + BatchNorm2d (running stats), with the
    BN affine fused into the GEMM epilogue.  x_nhwc: (N,H,W,Cin) bf16.
    Returns (N,H,W,Cout) f32."""
    n, h, w, cin = x_nhwc.shape
    w_mat = conv_p["w_mat"]                     # (Cin*kh*kw, Cout), bf16
    k_dim, cout = w_mat.shape
    ks = int(round((k_dim // cin) ** 0.5))      # kernel size (static)
    pad = (ks - 1) // 2

    tiles = _gemm_tiles(n * h * w, k_dim, cout)
    kp = tiles[5]

    # im2col directly in NHWC: pad once, concat shifted slices along the last
    # (lane) axis; fold the K padding into the same concat (no second pad copy).
    xp = jnp.pad(x_nhwc, ((0, 0), (pad, pad), (pad, pad), (0, 0)))
    cols = [xp[:, di:di + h, dj:dj + w, :]
            for di in range(ks) for dj in range(ks)]
    if kp > k_dim:
        cols.append(jnp.zeros((n, h, w, kp - k_dim), dtype=x_nhwc.dtype))
    patches = jnp.concatenate(cols, axis=-1).reshape(n * h * w, kp)

    scale = (bn_p["weight"] * jax.lax.rsqrt(bn_p["var"] + eps)).reshape(1, cout)
    shift = bn_p["bias"].reshape(1, cout) - bn_p["mean"].reshape(1, cout) * scale

    y = matmul_bn_pallas(patches, w_mat, scale, shift, tiles)
    return y.reshape(n, h, w, cout)


# ----------------------------------------------------------------------------
# Fused InstanceNorm + ADAIN modulation + ReLU (NHWC layout, batch-parallel)
# ----------------------------------------------------------------------------
def _inorm_mod_relu_kernel(x_ref, g_ref, b_ref, o_ref):
    x = x_ref[...]                                        # (1, HW, C) f32
    mean = jnp.mean(x, axis=1, keepdims=True)             # per-(n, c) stats
    var = jnp.mean(jnp.square(x - mean), axis=1, keepdims=True)
    y = (x - mean) * jax.lax.rsqrt(var + 1e-5)
    y = y * (1.0 + g_ref[...]) + b_ref[...]
    o_ref[...] = jnp.maximum(y, 0.0).astype(o_ref.dtype)


def instance_norm_adain_relu(x_nhwc, gamma, beta, out_dtype=jnp.float32):
    """InstanceNorm2d(affine=False) -> x*(1+gamma)+beta -> ReLU, kept in NHWC so
    no transpose is needed before the next conv's im2col."""
    n, h, w, c = x_nhwc.shape
    hw = h * w
    x3 = x_nhwc.reshape(n, hw, c)
    g3 = gamma.reshape(n, 1, c)
    b3 = beta.reshape(n, 1, c)
    out = pl.pallas_call(
        _inorm_mod_relu_kernel,
        out_shape=jax.ShapeDtypeStruct((n, hw, c), out_dtype),
        grid=(n,),
        in_specs=[pl.BlockSpec((1, hw, c), lambda i: (i, 0, 0)),
                  pl.BlockSpec((1, 1, c), lambda i: (i, 0, 0)),
                  pl.BlockSpec((1, 1, c), lambda i: (i, 0, 0))],
        out_specs=pl.BlockSpec((1, hw, c), lambda i: (i, 0, 0)),
        compiler_params=pltpu.CompilerParams(
            dimension_semantics=("parallel",)),
    )(x3, g3, b3)
    return out.reshape(n, h, w, c)


# ----------------------------------------------------------------------------
# Fused ADAIN token MLP: Linear(F->128) + ReLU, then gamma / beta heads
# ----------------------------------------------------------------------------
def _adain_mlp_kernel(t_ref, wsh_ref, bsh_ref, wg_ref, bg_ref, wb_ref, bb_ref,
                      g_ref, b_ref):
    hid = jnp.dot(t_ref[...], wsh_ref[...], preferred_element_type=jnp.float32)
    hid = jnp.maximum(hid + bsh_ref[...], 0.0)
    g_ref[...] = (jnp.dot(hid, wg_ref[...], preferred_element_type=jnp.float32)
                  + bg_ref[...])
    b_ref[...] = (jnp.dot(hid, wb_ref[...], preferred_element_type=jnp.float32)
                  + bb_ref[...])


def _full_spec(shape):
    nd = len(shape)
    return pl.BlockSpec(shape, lambda i, _n=nd: (0,) * _n)


def adain_mlp(token, p, out_c):
    """One tiny single-block Pallas kernel for the whole ADAIN MLP (instead of
    padded 128-row GEMM launches).  Returns gamma, beta with shape (N, out_c)."""
    n = token.shape[0]
    wsh = p["wsh"]                       # (Fp, 128) f32, lane/row padded at init
    fp = wsh.shape[0]
    cp = p["wg"].shape[1]                # norm_nc padded up to a lane multiple
    nr = _round_up(n, 8)

    tok = token.reshape(n, -1).astype(jnp.float32)
    tok = jnp.pad(tok, ((0, nr - n), (0, fp - tok.shape[1])))

    arrays = (tok, wsh, p["bsh"], p["wg"], p["bg"], p["wb"], p["bb"])
    gamma, beta = pl.pallas_call(
        _adain_mlp_kernel,
        out_shape=(jax.ShapeDtypeStruct((nr, cp), jnp.float32),
                   jax.ShapeDtypeStruct((nr, cp), jnp.float32)),
        grid=(1,),
        in_specs=[_full_spec(a.shape) for a in arrays],
        out_specs=[_full_spec((nr, cp)), _full_spec((nr, cp))],
    )(*arrays)
    return gamma[:n, :out_c], beta[:n, :out_c]


# ----------------------------------------------------------------------------
# AdainBlock forward
# ----------------------------------------------------------------------------
def adain_block_forward(x, token, p):
    """x: (N, Cin, H, W) NCHW f32; token: (N, token_len) f32.
    Returns (N, Cout, H, W) f32 (PyTorch layout at the module boundary)."""
    # Single NCHW -> NHWC conversion; everything stays NHWC inside the block.
    y = jnp.transpose(x, (0, 2, 3, 1)).astype(jnp.bfloat16)

    y = conv2d_bn_nhwc(y, p["conv1"], p["bn1"])              # conv1 + norm1
    c = y.shape[-1]
    g1, b1 = adain_mlp(token, p["adain1"], c)                # adain1 MLP
    y = instance_norm_adain_relu(y, g1, b1,                  # adain1 + relu1
                                 out_dtype=jnp.bfloat16)     # feeds conv2 im2col

    y = conv2d_bn_nhwc(y, p["conv2"], p["bn2"])              # conv2 + norm2
    g2, b2 = adain_mlp(token, p["adain2"], c)                # adain2 MLP
    y = instance_norm_adain_relu(y, g2, b2)                  # adain2 + relu2

    return jnp.transpose(y, (0, 3, 1, 2))                    # back to NCHW


# ----------------------------------------------------------------------------
# Deterministic synthetic parameter initialization (pre-packed for the kernels)
# ----------------------------------------------------------------------------
class ParamGen:
    def __init__(self, seed=0):
        self.key = jax.random.PRNGKey(seed)

    def take(self, shape, scale=1.0):
        self.key, sub = jax.random.split(self.key)
        return jax.random.normal(sub, shape, dtype=jnp.float32) * scale


def init_conv(pg, cout, cin, k):
    fan_in = cin * k * k
    w = pg.take((cout, cin, k, k), 1.0 / (fan_in ** 0.5))
    # (Cout, Cin, kh, kw) -> (kh*kw*Cin, Cout): matches the im2col (di, dj, cin)
    # column order; pre-packed + pre-cast to bf16 once at init.
    w_mat = jnp.transpose(w, (2, 3, 1, 0)).reshape(k * k * cin, cout)
    return {"w_mat": w_mat.astype(jnp.bfloat16)}


def init_bn(pg, c):
    return {"weight": 1.0 + pg.take((c,), 0.1),
            "bias": pg.take((c,), 0.01),
            "mean": pg.take((c,), 0.01),
            "var": 1.0 + jnp.abs(pg.take((c,), 0.1))}


def init_adain(pg, norm_nc, feature_nc):
    nhidden = 128
    fp = _round_up(feature_nc, 128)
    cp = _round_up(norm_nc, 128)
    wsh = pg.take((feature_nc, nhidden), 1.0 / (feature_nc ** 0.5))
    wg = pg.take((nhidden, norm_nc), 1.0 / (nhidden ** 0.5))
    wb = pg.take((nhidden, norm_nc), 1.0 / (nhidden ** 0.5))
    return {"wsh": jnp.pad(wsh, ((0, fp - feature_nc), (0, 0))),
            "bsh": pg.take((1, nhidden), 0.01),
            "wg": jnp.pad(wg, ((0, 0), (0, cp - norm_nc))),
            "bg": jnp.pad(pg.take((1, norm_nc), 0.01), ((0, 0), (0, cp - norm_nc))),
            "wb": jnp.pad(wb, ((0, 0), (0, cp - norm_nc))),
            "bb": jnp.pad(pg.take((1, norm_nc), 0.01), ((0, 0), (0, cp - norm_nc)))}


def init_adain_block(pg, cin, cout, token_len, k):
    return {"conv1": init_conv(pg, cout, cin, k),
            "bn1": init_bn(pg, cout),
            "adain1": init_adain(pg, cout, token_len),
            "conv2": init_conv(pg, cout, cout, k),
            "bn2": init_bn(pg, cout),
            "adain2": init_adain(pg, cout, token_len)}


# ----------------------------------------------------------------------------
# main
# ----------------------------------------------------------------------------
@jax.jit
def forward(x, token, params):
    return adain_block_forward(x, token, params)


if __name__ == "__main__":
    N, CIN, COUT, H, W = 2, 4, 32, 16, 16
    TOKEN_LEN, KSIZE = 512, 3

    pg = ParamGen(seed=0)
    params = init_adain_block(pg, CIN, COUT, TOKEN_LEN, KSIZE)

    key = jax.random.PRNGKey(0)
    kx, kt = jax.random.split(key)
    x = jax.random.normal(kx, (N, CIN, H, W), dtype=jnp.float32)
    token = jax.random.normal(kt, (N, TOKEN_LEN), dtype=jnp.float32)

    out = forward(x, token, params)
    out = jax.block_until_ready(out)
    assert out.shape == (N, COUT, H, W), out.shape
    assert bool(jnp.all(jnp.isfinite(out)))
    print("KERNEL_OK")
</pallas_src>

<mosaic_0001>
module attributes {stable_mosaic.version = 11 : i64} {
  func.func @_gemm_bn_kernel(%arg0: i32, %arg1: i32, %arg2: i32, %arg3: memref<256x128xbf16, #tpu.memory_space<vmem>>, %arg4: memref<128x128xbf16, #tpu.memory_space<vmem>>, %arg5: memref<1x128xf32, #tpu.memory_space<vmem>>, %arg6: memref<1x128xf32, #tpu.memory_space<vmem>>, %arg7: memref<256x128xf32, #tpu.memory_space<vmem>>) attributes {dimension_semantics = [#tpu.dimension_semantics<parallel>, #tpu.dimension_semantics<parallel>, #tpu.dimension_semantics<arbitrary>], iteration_bounds = array<i64: 2, 1, 1>, scalar_prefetch = 0 : i64, scratch_operands = 0 : i64, tpu.core_type = #tpu.core_type<tc>, window_params = [{transform_indices = @transform_0, window_bounds = array<i64: 256, 128>}, {transform_indices = @transform_1, window_bounds = array<i64: 128, 128>}, {transform_indices = @transform_2, window_bounds = array<i64: 1, 128>}, {transform_indices = @transform_3, window_bounds = array<i64: 1, 128>}, {transform_indices = @transform_4, window_bounds = array<i64: 256, 128>}]} {
    %c0_i32 = arith.constant 0 : i32
    %0 = arith.cmpi eq, %arg2, %c0_i32 : i32
    %1 = arith.extui %0 : i1 to i32
    %c0_i32_0 = arith.constant 0 : i32
    %2 = arith.cmpi ne, %1, %c0_i32_0 : i32
    scf.if %2 {
      %cst_10 = arith.constant 0.000000e+00 : f32
      %12 = vector.broadcast %cst_10 : f32 to vector<256x128xf32>
      %c0_11 = arith.constant 0 : index
      %c0_12 = arith.constant 0 : index
      %13 = vector.load %arg7[%c0_11, %c0_12] : memref<256x128xf32, #tpu.memory_space<vmem>>, vector<256x128xf32>
      tpu.vector_store %arg7[%c0_11, %c0_12], %12 {strides = array<i32>} : memref<256x128xf32, #tpu.memory_space<vmem>>, vector<256x128xf32>,
    } else {
    }
    %c0 = arith.constant 0 : index
    %c0_1 = arith.constant 0 : index
    %3 = vector.load %arg7[%c0, %c0_1] : memref<256x128xf32, #tpu.memory_space<vmem>>, vector<256x128xf32>
    %c0_2 = arith.constant 0 : index
    %c0_3 = arith.constant 0 : index
    %4 = vector.load %arg3[%c0_2, %c0_3] : memref<256x128xbf16, #tpu.memory_space<vmem>>, vector<256x128xbf16>
    %c0_4 = arith.constant 0 : index
    %c0_5 = arith.constant 0 : index
    %5 = vector.load %arg4[%c0_4, %c0_5] : memref<128x128xbf16, #tpu.memory_space<vmem>>, vector<128x128xbf16>
    %cst = arith.constant dense<0.000000e+00> : vector<256x128xf32>
    %6 = tpu.matmul %4, %5, %cst {dimension_numbers = #tpu.dot_dimension_numbers<[1], [0], [0], [1], [0, 0, 1, 1], [], []>} : vector<256x128xbf16>, vector<128x128xbf16>, vector<256x128xf32> -> vector<256x128xf32>
    %7 = arith.addf %3, %6 : vector<256x128xf32>
    %c0_6 = arith.constant 0 : index
    %c0_7 = arith.constant 0 : index
    %8 = vector.load %arg7[%c0_6, %c0_7] : memref<256x128xf32, #tpu.memory_space<vmem>>, vector<256x128xf32>
    tpu.vector_store %arg7[%c0_6, %c0_7], %7 {strides = array<i32>} : memref<256x128xf32, #tpu.memory_space<vmem>>, vector<256x128xf32>,
    %c0_i32_8 = arith.constant 0 : i32
    %9 = arith.cmpi eq, %arg2, %c0_i32_8 : i32
    %10 = arith.extui %9 : i1 to i32
    %c0_i32_9 = arith.constant 0 : i32
    %11 = arith.cmpi ne, %10, %c0_i32_9 : i32
    scf.if %11 {
      %c0_10 = arith.constant 0 : index
      %c0_11 = arith.constant 0 : index
      %12 = vector.load %arg7[%c0_10, %c0_11] : memref<256x128xf32, #tpu.memory_space<vmem>>, vector<256x128xf32>
      %c0_12 = arith.constant 0 : index
      %c0_13 = arith.constant 0 : index
      %13 = vector.load %arg5[%c0_12, %c0_13] : memref<1x128xf32, #tpu.memory_space<vmem>>, vector<1x128xf32>
      %14 = vector.broadcast %13 : vector<1x128xf32> to vector<256x128xf32>
      %15 = arith.mulf %12, %14 : vector<256x128xf32>
      %c0_14 = arith.constant 0 : index
      %c0_15 = arith.constant 0 : index
      %16 = vector.load %arg6[%c0_14, %c0_15] : memref<1x128xf32, #tpu.memory_space<vmem>>, vector<1x128xf32>
      %17 = vector.broadcast %16 : vector<1x128xf32> to vector<256x128xf32>
      %18 = arith.addf %15, %17 : vector<256x128xf32>
      %c0_16 = arith.constant 0 : index
      %c0_17 = arith.constant 0 : index
      %19 = vector.load %arg7[%c0_16, %c0_17] : memref<256x128xf32, #tpu.memory_space<vmem>>, vector<256x128xf32>
      tpu.vector_store %arg7[%c0_16, %c0_17], %18 {strides = array<i32>} : memref<256x128xf32, #tpu.memory_space<vmem>>, vector<256x128xf32>,
    } else {
    }
    return
  }
  func.func @transform_0(%arg0: i32, %arg1: i32, %arg2: i32) -> (i32, i32) {
    %c0_i32 = arith.constant 0 : i32
    return %arg0, %arg2 : i32, i32
  }
  func.func @transform_1(%arg0: i32, %arg1: i32, %arg2: i32) -> (i32, i32) {
    %c0_i32 = arith.constant 0 : i32
    return %arg2, %arg1 : i32, i32
  }
  func.func @transform_2(%arg0: i32, %arg1: i32, %arg2: i32) -> (i32, i32) {
    %c0_i32 = arith.constant 0 : i32
    %c0_i32_0 = arith.constant 0 : i32
    return %c0_i32, %arg1 : i32, i32
  }
  func.func @transform_3(%arg0: i32, %arg1: i32, %arg2: i32) -> (i32, i32) {
    %c0_i32 = arith.constant 0 : i32
    %c0_i32_0 = arith.constant 0 : i32
    return %c0_i32, %arg1 : i32, i32
  }
  func.func @transform_4(%arg0: i32, %arg1: i32, %arg2: i32) -> (i32, i32) {
    %c0_i32 = arith.constant 0 : i32
    return %arg0, %arg1 : i32, i32
  }
}

module attributes {stable_mosaic.version = 11 : i64} {
  func.func @_adain_mlp_kernel(%arg0: i32, %arg1: memref<8x512xf32, #tpu.memory_space<vmem>>, %arg2: memref<512x128xf32, #tpu.memory_space<vmem>>, %arg3: memref<1x128xf32, #tpu.memory_space<vmem>>, %arg4: memref<128x128xf32, #tpu.memory_space<vmem>>, %arg5: memref<1x128xf32, #tpu.memory_space<vmem>>, %arg6: memref<128x128xf32, #tpu.memory_space<vmem>>, %arg7: memref<1x128xf32, #tpu.memory_space<vmem>>, %arg8: memref<8x128xf32, #tpu.memory_space<vmem>>, %arg9: memref<8x128xf32, #tpu.memory_space<vmem>>) attributes {dimension_semantics = [#tpu.dimension_semantics<arbitrary>], iteration_bounds = array<i64: 1>, scalar_prefetch = 0 : i64, scratch_operands = 0 : i64, tpu.core_type = #tpu.core_type<tc>, window_params = [{pipeline_mode = #tpu.pipeline_mode<synchronous>, transform_indices = @transform_0, window_bounds = array<i64: 8, 512>}, {pipeline_mode = #tpu.pipeline_mode<synchronous>, transform_indices = @transform_1, window_bounds = array<i64: 512, 128>}, {pipeline_mode = #tpu.pipeline_mode<synchronous>, transform_indices = @transform_2, window_bounds = array<i64: 1, 128>}, {pipeline_mode = #tpu.pipeline_mode<synchronous>, transform_indices = @transform_3, window_bounds = array<i64: 128, 128>}, {pipeline_mode = #tpu.pipeline_mode<synchronous>, transform_indices = @transform_4, window_bounds = array<i64: 1, 128>}, {pipeline_mode = #tpu.pipeline_mode<synchronous>, transform_indices = @transform_5, window_bounds = array<i64: 128, 128>}, {pipeline_mode = #tpu.pipeline_mode<synchronous>, transform_indices = @transform_6, window_bounds = array<i64: 1, 128>}, {pipeline_mode = #tpu.pipeline_mode<synchronous>, transform_indices = @transform_7, window_bounds = array<i64: 8, 128>}, {pipeline_mode = #tpu.pipeline_mode<synchronous>, transform_indices = @transform_8, window_bounds = array<i64: 8, 128>}]} {
    %c0 = arith.constant 0 : index
    %c0_0 = arith.constant 0 : index
    %0 = vector.load %arg1[%c0, %c0_0] : memref<8x512xf32, #tpu.memory_space<vmem>>, vector<8x512xf32>
    %c0_1 = arith.constant 0 : index
    %c0_2 = arith.constant 0 : index
    %1 = vector.load %arg2[%c0_1, %c0_2] : memref<512x128xf32, #tpu.memory_space<vmem>>, vector<512x128xf32>
    %cst = arith.constant dense<0.000000e+00> : vector<8x128xf32>
    %2 = tpu.matmul %0, %1, %cst {dimension_numbers = #tpu.dot_dimension_numbers<[1], [0], [0], [1], [0, 0, 1, 1], [], []>} : vector<8x512xf32>, vector<512x128xf32>, vector<8x128xf32> -> vector<8x128xf32>
    %c0_3 = arith.constant 0 : index
    %c0_4 = arith.constant 0 : index
    %3 = vector.load %arg3[%c0_3, %c0_4] : memref<1x128xf32, #tpu.memory_space<vmem>>, vector<1x128xf32>
    %4 = vector.broadcast %3 : vector<1x128xf32> to vector<8x128xf32>
    %5 = arith.addf %2, %4 : vector<8x128xf32>
    %cst_5 = arith.constant 0.000000e+00 : f32
    %6 = vector.broadcast %cst_5 : f32 to vector<8x128xf32>
    %7 = arith.maximumf %5, %6 : vector<8x128xf32>
    %c0_6 = arith.constant 0 : index
    %c0_7 = arith.constant 0 : index
    %8 = vector.load %arg4[%c0_6, %c0_7] : memref<128x128xf32, #tpu.memory_space<vmem>>, vector<128x128xf32>
    %cst_8 = arith.constant dense<0.000000e+00> : vector<8x128xf32>
    %9 = tpu.matmul %7, %8, %cst_8 {dimension_numbers = #tpu.dot_dimension_numbers<[1], [0], [0], [1], [0, 0, 1, 1], [], []>} : vector<8x128xf32>, vector<128x128xf32>, vector<8x128xf32> -> vector<8x128xf32>
    %c0_9 = arith.constant 0 : index
    %c0_10 = arith.constant 0 : index
    %10 = vector.load %arg5[%c0_9, %c0_10] : memref<1x128xf32, #tpu.memory_space<vmem>>, vector<1x128xf32>
    %11 = vector.broadcast %10 : vector<1x128xf32> to vector<8x128xf32>
    %12 = arith.addf %9, %11 : vector<8x128xf32>
    %c0_11 = arith.constant 0 : index
    %c0_12 = arith.constant 0 : index
    %13 = vector.load %arg8[%c0_11, %c0_12] : memref<8x128xf32, #tpu.memory_space<vmem>>, vector<8x128xf32>
    tpu.vector_store %arg8[%c0_11, %c0_12], %12 {strides = array<i32>} : memref<8x128xf32, #tpu.memory_space<vmem>>, vector<8x128xf32>,
    %c0_13 = arith.constant 0 : index
    %c0_14 = arith.constant 0 : index
    %14 = vector.load %arg6[%c0_13, %c0_14] : memref<128x128xf32, #tpu.memory_space<vmem>>, vector<128x128xf32>
    %cst_15 = arith.constant dense<0.000000e+00> : vector<8x128xf32>
    %15 = tpu.matmul %7, %14, %cst_15 {dimension_numbers = #tpu.dot_dimension_numbers<[1], [0], [0], [1], [0, 0, 1, 1], [], []>} : vector<8x128xf32>, vector<128x128xf32>, vector<8x128xf32> -> vector<8x128xf32>
    %c0_16 = arith.constant 0 : index
    %c0_17 = arith.constant 0 : index
    %16 = vector.load %arg7[%c0_16, %c0_17] : memref<1x128xf32, #tpu.memory_space<vmem>>, vector<1x128xf32>
    %17 = vector.broadcast %16 : vector<1x128xf32> to vector<8x128xf32>
    %18 = arith.addf %15, %17 : vector<8x128xf32>
    %c0_18 = arith.constant 0 : index
    %c0_19 = arith.constant 0 : index
    %19 = vector.load %arg9[%c0_18, %c0_19] : memref<8x128xf32, #tpu.memory_space<vmem>>, vector<8x128xf32>
    tpu.vector_store %arg9[%c0_18, %c0_19], %18 {strides = array<i32>} : memref<8x128xf32, #tpu.memory_space<vmem>>, vector<8x128xf32>,
    return
  }
  func.func @transform_0(%arg0: i32) -> (i32, i32) {
    %c0_i32 = arith.constant 0 : i32
    %c0_i32_0 = arith.constant 0 : i32
    %c0_i32_1 = arith.constant 0 : i32
    return %c0_i32, %c0_i32_0 : i32, i32
  }
  func.func @transform_1(%arg0: i32) -> (i32, i32) {
    %c0_i32 = arith.constant 0 : i32
    %c0_i32_0 = arith.constant 0 : i32
    %c0_i32_1 = arith.constant 0 : i32
    return %c0_i32, %c0_i32_0 : i32, i32
  }
  func.func @transform_2(%arg0: i32) -> (i32, i32) {
    %c0_i32 = arith.constant 0 : i32
    %c0_i32_0 = arith.constant 0 : i32
    %c0_i32_1 = arith.constant 0 : i32
    return %c0_i32, %c0_i32_0 : i32, i32
  }
  func.func @transform_3(%arg0: i32) -> (i32, i32) {
    %c0_i32 = arith.constant 0 : i32
    %c0_i32_0 = arith.constant 0 : i32
    %c0_i32_1 = arith.constant 0 : i32
    return %c0_i32, %c0_i32_0 : i32, i32
  }
  func.func @transform_4(%arg0: i32) -> (i32, i32) {
    %c0_i32 = arith.constant 0 : i32
    %c0_i32_0 = arith.constant 0 : i32
    %c0_i32_1 = arith.constant 0 : i32
    return %c0_i32, %c0_i32_0 : i32, i32
  }
  func.func @transform_5(%arg0: i32) -> (i32, i32) {
    %c0_i32 = arith.constant 0 : i32
    %c0_i32_0 = arith.constant 0 : i32
    %c0_i32_1 = arith.constant 0 : i32
    return %c0_i32, %c0_i32_0 : i32, i32
  }
  func.func @transform_6(%arg0: i32) -> (i32, i32) {
    %c0_i32 = arith.constant 0 : i32
    %c0_i32_0 = arith.constant 0 : i32
    %c0_i32_1 = arith.constant 0 : i32
    return %c0_i32, %c0_i32_0 : i32, i32
  }
  func.func @transform_7(%arg0: i32) -> (i32, i32) {
    %c0_i32 = arith.constant 0 : i32
    %c0_i32_0 = arith.constant 0 : i32
    %c0_i32_1 = arith.constant 0 : i32
    return %c0_i32, %c0_i32_0 : i32, i32
  }
  func.func @transform_8(%arg0: i32) -> (i32, i32) {
    %c0_i32 = arith.constant 0 : i32
    %c0_i32_0 = arith.constant 0 : i32
    %c0_i32_1 = arith.constant 0 : i32
    return %c0_i32, %c0_i32_0 : i32, i32
  }
}

module attributes {stable_mosaic.version = 11 : i64} {
  func.func @_inorm_mod_relu_kernel(%arg0: i32, %arg1: memref<1x256x32xf32, #tpu.memory_space<vmem>>, %arg2: memref<1x1x32xf32, #tpu.memory_space<vmem>>, %arg3: memref<1x1x32xf32, #tpu.memory_space<vmem>>, %arg4: memref<1x256x32xbf16, #tpu.memory_space<vmem>>) attributes {dimension_semantics = [#tpu.dimension_semantics<parallel>], iteration_bounds = array<i64: 2>, scalar_prefetch = 0 : i64, scratch_operands = 0 : i64, tpu.core_type = #tpu.core_type<tc>, window_params = [{transform_indices = @transform_0, window_bounds = array<i64: 1, 256, 32>}, {transform_indices = @transform_1, window_bounds = array<i64: 1, 1, 32>}, {transform_indices = @transform_2, window_bounds = array<i64: 1, 1, 32>}, {transform_indices = @transform_3, window_bounds = array<i64: 1, 256, 32>}]} {
    %c0 = arith.constant 0 : index
    %c0_0 = arith.constant 0 : index
    %c0_1 = arith.constant 0 : index
    %0 = vector.load %arg1[%c0, %c0_0, %c0_1] : memref<1x256x32xf32, #tpu.memory_space<vmem>>, vector<1x256x32xf32>
    %cst = arith.constant dense<0.000000e+00> : vector<1x32xf32>
    %1 = vector.multi_reduction <add>, %0, %cst [1] : vector<1x256x32xf32> to vector<1x32xf32>
    %2 = vector.shape_cast %1 : vector<1x32xf32> to vector<1x1x32xf32>
    %cst_2 = arith.constant 2.560000e+02 : f32
    %3 = vector.broadcast %cst_2 : f32 to vector<1x1x32xf32>
    %4 = arith.divf %2, %3 : vector<1x1x32xf32>
    %5 = vector.broadcast %4 : vector<1x1x32xf32> to vector<1x256x32xf32>
    %6 = arith.subf %0, %5 : vector<1x256x32xf32>
    %7 = arith.mulf %6, %6 : vector<1x256x32xf32>
    %cst_3 = arith.constant dense<0.000000e+00> : vector<1x32xf32>
    %8 = vector.multi_reduction <add>, %7, %cst_3 [1] : vector<1x256x32xf32> to vector<1x32xf32>
    %9 = vector.shape_cast %8 : vector<1x32xf32> to vector<1x1x32xf32>
    %cst_4 = arith.constant 2.560000e+02 : f32
    %10 = vector.broadcast %cst_4 : f32 to vector<1x1x32xf32>
    %11 = arith.divf %9, %10 : vector<1x1x32xf32>
    %12 = vector.broadcast %4 : vector<1x1x32xf32> to vector<1x256x32xf32>
    %13 = arith.subf %0, %12 : vector<1x256x32xf32>
    %cst_5 = arith.constant 9.99999974E-6 : f32
    %14 = vector.broadcast %cst_5 : f32 to vector<1x1x32xf32>
    %15 = arith.addf %11, %14 : vector<1x1x32xf32>
    %16 = math.rsqrt %15 : vector<1x1x32xf32>
    %17 = vector.broadcast %16 : vector<1x1x32xf32> to vector<1x256x32xf32>
    %18 = arith.mulf %13, %17 : vector<1x256x32xf32>
    %c0_6 = arith.constant 0 : index
    %c0_7 = arith.constant 0 : index
    %c0_8 = arith.constant 0 : index
    %19 = vector.load %arg2[%c0_6, %c0_7, %c0_8] : memref<1x1x32xf32, #tpu.memory_space<vmem>>, vector<1x1x32xf32>
    %cst_9 = arith.constant 1.000000e+00 : f32
    %20 = vector.broadcast %cst_9 : f32 to vector<1x1x32xf32>
    %21 = arith.addf %20, %19 : vector<1x1x32xf32>
    %22 = vector.broadcast %21 : vector<1x1x32xf32> to vector<1x256x32xf32>
    %23 = arith.mulf %18, %22 : vector<1x256x32xf32>
    %c0_10 = arith.constant 0 : index
    %c0_11 = arith.constant 0 : index
    %c0_12 = arith.constant 0 : index
    %24 = vector.load %arg3[%c0_10, %c0_11, %c0_12] : memref<1x1x32xf32, #tpu.memory_space<vmem>>, vector<1x1x32xf32>
    %25 = vector.broadcast %24 : vector<1x1x32xf32> to vector<1x256x32xf32>
    %26 = arith.addf %23, %25 : vector<1x256x32xf32>
    %cst_13 = arith.constant 0.000000e+00 : f32
    %27 = vector.broadcast %cst_13 : f32 to vector<1x256x32xf32>
    %28 = arith.maximumf %26, %27 : vector<1x256x32xf32>
    %29 = arith.truncf %28 : vector<1x256x32xf32> to vector<1x256x32xbf16>
    %c0_14 = arith.constant 0 : index
    %c0_15 = arith.constant 0 : index
    %c0_16 = arith.constant 0 : index
    %30 = vector.load %arg4[%c0_14, %c0_15, %c0_16] : memref<1x256x32xbf16, #tpu.memory_space<vmem>>, vector<1x256x32xbf16>
    tpu.vector_store %arg4[%c0_14, %c0_15, %c0_16], %29 {strides = array<i32>} : memref<1x256x32xbf16, #tpu.memory_space<vmem>>, vector<1x256x32xbf16>,
    return
  }
  func.func @transform_0(%arg0: i32) -> (i32, i32, i32) {
    %c0_i32 = arith.constant 0 : i32
    %c0_i32_0 = arith.constant 0 : i32
    %c0_i32_1 = arith.constant 0 : i32
    return %arg0, %c0_i32, %c0_i32_0 : i32, i32, i32
  }
  func.func @transform_1(%arg0: i32) -> (i32, i32, i32) {
    %c0_i32 = arith.constant 0 : i32
    %c0_i32_0 = arith.constant 0 : i32
    %c0_i32_1 = arith.constant 0 : i32
    return %arg0, %c0_i32, %c0_i32_0 : i32, i32, i32
  }
  func.func @transform_2(%arg0: i32) -> (i32, i32, i32) {
    %c0_i32 = arith.constant 0 : i32
    %c0_i32_0 = arith.constant 0 : i32
    %c0_i32_1 = arith.constant 0 : i32
    return %arg0, %c0_i32, %c0_i32_0 : i32, i32, i32
  }
  func.func @transform_3(%arg0: i32) -> (i32, i32, i32) {
    %c0_i32 = arith.constant 0 : i32
    %c0_i32_0 = arith.constant 0 : i32
    %c0_i32_1 = arith.constant 0 : i32
    return %arg0, %c0_i32, %c0_i32_0 : i32, i32, i32
  }
}

module attributes {stable_mosaic.version = 11 : i64} {
  func.func @_gemm_bn_kernel(%arg0: i32, %arg1: i32, %arg2: i32, %arg3: memref<256x384xbf16, #tpu.memory_space<vmem>>, %arg4: memref<384x128xbf16, #tpu.memory_space<vmem>>, %arg5: memref<1x128xf32, #tpu.memory_space<vmem>>, %arg6: memref<1x128xf32, #tpu.memory_space<vmem>>, %arg7: memref<256x128xf32, #tpu.memory_space<vmem>>) attributes {dimension_semantics = [#tpu.dimension_semantics<parallel>, #tpu.dimension_semantics<parallel>, #tpu.dimension_semantics<arbitrary>], iteration_bounds = array<i64: 2, 1, 1>, scalar_prefetch = 0 : i64, scratch_operands = 0 : i64, tpu.core_type = #tpu.core_type<tc>, window_params = [{transform_indices = @transform_0, window_bounds = array<i64: 256, 384>}, {transform_indices = @transform_1, window_bounds = array<i64: 384, 128>}, {transform_indices = @transform_2, window_bounds = array<i64: 1, 128>}, {transform_indices = @transform_3, window_bounds = array<i64: 1, 128>}, {transform_indices = @transform_4, window_bounds = array<i64: 256, 128>}]} {
    %c0_i32 = arith.constant 0 : i32
    %0 = arith.cmpi eq, %arg2, %c0_i32 : i32
    %1 = arith.extui %0 : i1 to i32
    %c0_i32_0 = arith.constant 0 : i32
    %2 = arith.cmpi ne, %1, %c0_i32_0 : i32
    scf.if %2 {
      %cst_10 = arith.constant 0.000000e+00 : f32
      %12 = vector.broadcast %cst_10 : f32 to vector<256x128xf32>
      %c0_11 = arith.constant 0 : index
      %c0_12 = arith.constant 0 : index
      %13 = vector.load %arg7[%c0_11, %c0_12] : memref<256x128xf32, #tpu.memory_space<vmem>>, vector<256x128xf32>
      tpu.vector_store %arg7[%c0_11, %c0_12], %12 {strides = array<i32>} : memref<256x128xf32, #tpu.memory_space<vmem>>, vector<256x128xf32>,
    } else {
    }
    %c0 = arith.constant 0 : index
    %c0_1 = arith.constant 0 : index
    %3 = vector.load %arg7[%c0, %c0_1] : memref<256x128xf32, #tpu.memory_space<vmem>>, vector<256x128xf32>
    %c0_2 = arith.constant 0 : index
    %c0_3 = arith.constant 0 : index
    %4 = vector.load %arg3[%c0_2, %c0_3] : memref<256x384xbf16, #tpu.memory_space<vmem>>, vector<256x384xbf16>
    %c0_4 = arith.constant 0 : index
    %c0_5 = arith.constant 0 : index
    %5 = vector.load %arg4[%c0_4, %c0_5] : memref<384x128xbf16, #tpu.memory_space<vmem>>, vector<384x128xbf16>
    %cst = arith.constant dense<0.000000e+00> : vector<256x128xf32>
    %6 = tpu.matmul %4, %5, %cst {dimension_numbers = #tpu.dot_dimension_numbers<[1], [0], [0], [1], [0, 0, 1, 1], [], []>} : vector<256x384xbf16>, vector<384x128xbf16>, vector<256x128xf32> -> vector<256x128xf32>
    %7 = arith.addf %3, %6 : vector<256x128xf32>
    %c0_6 = arith.constant 0 : index
    %c0_7 = arith.constant 0 : index
    %8 = vector.load %arg7[%c0_6, %c0_7] : memref<256x128xf32, #tpu.memory_space<vmem>>, vector<256x128xf32>
    tpu.vector_store %arg7[%c0_6, %c0_7], %7 {strides = array<i32>} : memref<256x128xf32, #tpu.memory_space<vmem>>, vector<256x128xf32>,
    %c0_i32_8 = arith.constant 0 : i32
    %9 = arith.cmpi eq, %arg2, %c0_i32_8 : i32
    %10 = arith.extui %9 : i1 to i32
    %c0_i32_9 = arith.constant 0 : i32
    %11 = arith.cmpi ne, %10, %c0_i32_9 : i32
    scf.if %11 {
      %c0_10 = arith.constant 0 : index
      %c0_11 = arith.constant 0 : index
      %12 = vector.load %arg7[%c0_10, %c0_11] : memref<256x128xf32, #tpu.memory_space<vmem>>, vector<256x128xf32>
      %c0_12 = arith.constant 0 : index
      %c0_13 = arith.constant 0 : index
      %13 = vector.load %arg5[%c0_12, %c0_13] : memref<1x128xf32, #tpu.memory_space<vmem>>, vector<1x128xf32>
      %14 = vector.broadcast %13 : vector<1x128xf32> to vector<256x128xf32>
      %15 = arith.mulf %12, %14 : vector<256x128xf32>
      %c0_14 = arith.constant 0 : index
      %c0_15 = arith.constant 0 : index
      %16 = vector.load %arg6[%c0_14, %c0_15] : memref<1x128xf32, #tpu.memory_space<vmem>>, vector<1x128xf32>
      %17 = vector.broadcast %16 : vector<1x128xf32> to vector<256x128xf32>
      %18 = arith.addf %15, %17 : vector<256x128xf32>
      %c0_16 = arith.constant 0 : index
      %c0_17 = arith.constant 0 : index
      %19 = vector.load %arg7[%c0_16, %c0_17] : memref<256x128xf32, #tpu.memory_space<vmem>>, vector<256x128xf32>
      tpu.vector_store %arg7[%c0_16, %c0_17], %18 {strides = array<i32>} : memref<256x128xf32, #tpu.memory_space<vmem>>, vector<256x128xf32>,
    } else {
    }
    return
  }
  func.func @transform_0(%arg0: i32, %arg1: i32, %arg2: i32) -> (i32, i32) {
    %c0_i32 = arith.constant 0 : i32
    return %arg0, %arg2 : i32, i32
  }
  func.func @transform_1(%arg0: i32, %arg1: i32, %arg2: i32) -> (i32, i32) {
    %c0_i32 = arith.constant 0 : i32
    return %arg2, %arg1 : i32, i32
  }
  func.func @transform_2(%arg0: i32, %arg1: i32, %arg2: i32) -> (i32, i32) {
    %c0_i32 = arith.constant 0 : i32
    %c0_i32_0 = arith.constant 0 : i32
    return %c0_i32, %arg1 : i32, i32
  }
  func.func @transform_3(%arg0: i32, %arg1: i32, %arg2: i32) -> (i32, i32) {
    %c0_i32 = arith.constant 0 : i32
    %c0_i32_0 = arith.constant 0 : i32
    return %c0_i32, %arg1 : i32, i32
  }
  func.func @transform_4(%arg0: i32, %arg1: i32, %arg2: i32) -> (i32, i32) {
    %c0_i32 = arith.constant 0 : i32
    return %arg0, %arg1 : i32, i32
  }
}

module attributes {stable_mosaic.version = 11 : i64} {
  func.func @_inorm_mod_relu_kernel(%arg0: i32, %arg1: memref<1x256x32xf32, #tpu.memory_space<vmem>>, %arg2: memref<1x1x32xf32, #tpu.memory_space<vmem>>, %arg3: memref<1x1x32xf32, #tpu.memory_space<vmem>>, %arg4: memref<1x256x32xf32, #tpu.memory_space<vmem>>) attributes {dimension_semantics = [#tpu.dimension_semantics<parallel>], iteration_bounds = array<i64: 2>, scalar_prefetch = 0 : i64, scratch_operands = 0 : i64, tpu.core_type = #tpu.core_type<tc>, window_params = [{transform_indices = @transform_0, window_bounds = array<i64: 1, 256, 32>}, {transform_indices = @transform_1, window_bounds = array<i64: 1, 1, 32>}, {transform_indices = @transform_2, window_bounds = array<i64: 1, 1, 32>}, {transform_indices = @transform_3, window_bounds = array<i64: 1, 256, 32>}]} {
    %c0 = arith.constant 0 : index
    %c0_0 = arith.constant 0 : index
    %c0_1 = arith.constant 0 : index
    %0 = vector.load %arg1[%c0, %c0_0, %c0_1] : memref<1x256x32xf32, #tpu.memory_space<vmem>>, vector<1x256x32xf32>
    %cst = arith.constant dense<0.000000e+00> : vector<1x32xf32>
    %1 = vector.multi_reduction <add>, %0, %cst [1] : vector<1x256x32xf32> to vector<1x32xf32>
    %2 = vector.shape_cast %1 : vector<1x32xf32> to vector<1x1x32xf32>
    %cst_2 = arith.constant 2.560000e+02 : f32
    %3 = vector.broadcast %cst_2 : f32 to vector<1x1x32xf32>
    %4 = arith.divf %2, %3 : vector<1x1x32xf32>
    %5 = vector.broadcast %4 : vector<1x1x32xf32> to vector<1x256x32xf32>
    %6 = arith.subf %0, %5 : vector<1x256x32xf32>
    %7 = arith.mulf %6, %6 : vector<1x256x32xf32>
    %cst_3 = arith.constant dense<0.000000e+00> : vector<1x32xf32>
    %8 = vector.multi_reduction <add>, %7, %cst_3 [1] : vector<1x256x32xf32> to vector<1x32xf32>
    %9 = vector.shape_cast %8 : vector<1x32xf32> to vector<1x1x32xf32>
    %cst_4 = arith.constant 2.560000e+02 : f32
    %10 = vector.broadcast %cst_4 : f32 to vector<1x1x32xf32>
    %11 = arith.divf %9, %10 : vector<1x1x32xf32>
    %12 = vector.broadcast %4 : vector<1x1x32xf32> to vector<1x256x32xf32>
    %13 = arith.subf %0, %12 : vector<1x256x32xf32>
    %cst_5 = arith.constant 9.99999974E-6 : f32
    %14 = vector.broadcast %cst_5 : f32 to vector<1x1x32xf32>
    %15 = arith.addf %11, %14 : vector<1x1x32xf32>
    %16 = math.rsqrt %15 : vector<1x1x32xf32>
    %17 = vector.broadcast %16 : vector<1x1x32xf32> to vector<1x256x32xf32>
    %18 = arith.mulf %13, %17 : vector<1x256x32xf32>
    %c0_6 = arith.constant 0 : index
    %c0_7 = arith.constant 0 : index
    %c0_8 = arith.constant 0 : index
    %19 = vector.load %arg2[%c0_6, %c0_7, %c0_8] : memref<1x1x32xf32, #tpu.memory_space<vmem>>, vector<1x1x32xf32>
    %cst_9 = arith.constant 1.000000e+00 : f32
    %20 = vector.broadcast %cst_9 : f32 to vector<1x1x32xf32>
    %21 = arith.addf %20, %19 : vector<1x1x32xf32>
    %22 = vector.broadcast %21 : vector<1x1x32xf32> to vector<1x256x32xf32>
    %23 = arith.mulf %18, %22 : vector<1x256x32xf32>
    %c0_10 = arith.constant 0 : index
    %c0_11 = arith.constant 0 : index
    %c0_12 = arith.constant 0 : index
    %24 = vector.load %arg3[%c0_10, %c0_11, %c0_12] : memref<1x1x32xf32, #tpu.memory_space<vmem>>, vector<1x1x32xf32>
    %25 = vector.broadcast %24 : vector<1x1x32xf32> to vector<1x256x32xf32>
    %26 = arith.addf %23, %25 : vector<1x256x32xf32>
    %cst_13 = arith.constant 0.000000e+00 : f32
    %27 = vector.broadcast %cst_13 : f32 to vector<1x256x32xf32>
    %28 = arith.maximumf %26, %27 : vector<1x256x32xf32>
    %c0_14 = arith.constant 0 : index
    %c0_15 = arith.constant 0 : index
    %c0_16 = arith.constant 0 : index
    %29 = vector.load %arg4[%c0_14, %c0_15, %c0_16] : memref<1x256x32xf32, #tpu.memory_space<vmem>>, vector<1x256x32xf32>
    tpu.vector_store %arg4[%c0_14, %c0_15, %c0_16], %28 {strides = array<i32>} : memref<1x256x32xf32, #tpu.memory_space<vmem>>, vector<1x256x32xf32>,
    return
  }
  func.func @transform_0(%arg0: i32) -> (i32, i32, i32) {
    %c0_i32 = arith.constant 0 : i32
    %c0_i32_0 = arith.constant 0 : i32
    %c0_i32_1 = arith.constant 0 : i32
    return %arg0, %c0_i32, %c0_i32_0 : i32, i32, i32
  }
  func.func @transform_1(%arg0: i32) -> (i32, i32, i32) {
    %c0_i32 = arith.constant 0 : i32
    %c0_i32_0 = arith.constant 0 : i32
    %c0_i32_1 = arith.constant 0 : i32
    return %arg0, %c0_i32, %c0_i32_0 : i32, i32, i32
  }
  func.func @transform_2(%arg0: i32) -> (i32, i32, i32) {
    %c0_i32 = arith.constant 0 : i32
    %c0_i32_0 = arith.constant 0 : i32
    %c0_i32_1 = arith.constant 0 : i32
    return %arg0, %c0_i32, %c0_i32_0 : i32, i32, i32
  }
  func.func @transform_3(%arg0: i32) -> (i32, i32, i32) {
    %c0_i32 = arith.constant 0 : i32
    %c0_i32_0 = arith.constant 0 : i32
    %c0_i32_1 = arith.constant 0 : i32
    return %arg0, %c0_i32, %c0_i32_0 : i32, i32, i32
  }
}

</mosaic_0001>

<bundles_post_ra>
// kernel: forward.7
= control target key start
LH: loop header
LB: loop body
LE: loop exit
PB: predicated region body
PF: predicated region fallthrough
CT: control target
= control target key end

     0   :  { %vm733_vm0 = vmmov 0   ;;  %s1111_s1 = inlined_call_operand.vmem [shape: f32[512,128], index: 1, kind: input, shape index: {}]   ;;  %s1112_s0 = inlined_call_operand.vmem [shape: f32[8,512], index: 0, kind: input, shape index: {}]   ;;  %s1113_s3 = inlined_call_operand.vmem [shape: f32[128,128], index: 3, kind: input, shape index: {}]   ;;  %s1114_s5 = inlined_call_operand.vmem [shape: f32[128,128], index: 5, kind: input, shape index: {}]   ;;  %s1115_s2 = inlined_call_operand.vmem [shape: f32[1,128], index: 2, kind: input, shape index: {}]   ;;  %s1116_s4 = inlined_call_operand.vmem [shape: f32[1,128], index: 4, kind: input, shape index: {}]   ;;  %s1117_s6 = inlined_call_operand.vmem [shape: f32[1,128], index: 6, kind: input, shape index: {}]   ;;  %s1118_s7 = inlined_call_operand.vmem [shape: f32[8,128], index: 7, kind: output, shape index: {0}]   ;;  %s1119_s8 = inlined_call_operand.vmem [shape: f32[8,128], index: 8, kind: output, shape index: {1}]  }
   0x1   :  { %v48_v0 = vld [vmem:[%s1111_s1 + $0x80] sm:$0xff]  ;;  %v49_v1 = vld [vmem:[%s1111_s1 + $0x88] sm:$0xff]  ;;  %v50_v11 = vld [vmem:[%s1111_s1 + $0x90] sm:$0xff] }
   0x2   :  { %v32_v2 = vld [vmem:[%s1111_s1] sm:$0xff]  ;;  %v617_v3 = vpack.c.bf16 %v49_v1, %v48_v0  ;;  %v33_v4 = vld [vmem:[%s1111_s1 + $0x8] sm:$0xff]  ;;  %v51_v13 = vld [vmem:[%s1111_s1 + $0x98] sm:$0xff] }
   0x3   :  { %v80_v5 = vld [vmem:[%s1111_s1 + $0x180] sm:$0xff]  ;;  %v81_v6 = vld [vmem:[%s1111_s1 + $0x188] sm:$0xff]  ;;  %v619_v7 = vpack.c.bf16 %v33_v4, %v32_v2  ;;  %v34_v14 = vld [vmem:[%s1111_s1 + $0x10] sm:$0xff]  ;;  %v621_v16 = vpack.c.bf16 %v51_v13, %v50_v11 }
   0x4   :  { %v649_v8 = vpack.c.bf16 %v81_v6, %v80_v5  ;;  %v64_v9 = vld [vmem:[%s1111_s1 + $0x100] sm:$0xff]  ;;  %v65_v10 = vld [vmem:[%s1111_s1 + $0x108] sm:$0xff]  ;;  %618 = vmatprep.subr.bf16.mxu0 %v617_v3  ;;  %v35_v15 = vld [vmem:[%s1111_s1 + $0x18] sm:$0xff] }
   0x5   :  { %v651_v12 = vpack.c.bf16 %v65_v10, %v64_v9  ;;  %620 = vmatpush3.bf16.msra.mxu0 %v619_v7  ;;  %v623_v17 = vpack.c.bf16 %v35_v15, %v34_v14  ;;  %v82_v18 = vld [vmem:[%s1111_s1 + $0x190] sm:$0xff]  ;;  %v83_v19 = vld [vmem:[%s1111_s1 + $0x198] sm:$0xff]  ;;  %v52_v23 = vld [vmem:[%s1111_s1 + $0xa0] sm:$0xff] }
   0x6   :  { %650 = vmatprep.subr.bf16.mxu1 %v649_v8  ;;  %v66_v20 = vld [vmem:[%s1111_s1 + $0x110] sm:$0xff]  ;;  %v653_v21 = vpack.c.bf16 %v83_v19, %v82_v18  ;;  %v67_v22 = vld [vmem:[%s1111_s1 + $0x118] sm:$0xff]  ;;  %v53_v24 = vld [vmem:[%s1111_s1 + $0xa8] sm:$0xff]  ;;  %622 = vmatprep.subr.bf16.mxu0 %v621_v16 }
   0x7   :  { %652 = vmatpush3.bf16.msra.mxu1 %v651_v12  ;;  %v655_v25 = vpack.c.bf16 %v67_v22, %v66_v20  ;;  %v625_v26 = vpack.c.bf16 %v53_v24, %v52_v23  ;;  %v36_v27 = vld [vmem:[%s1111_s1 + $0x20] sm:$0xff]  ;;  %v37_v28 = vld [vmem:[%s1111_s1 + $0x28] sm:$0xff]  ;;  %v54_v35 = vld [vmem:[%s1111_s1 + $0xb0] sm:$0xff] }
   0x8   :  { %v84_v29 = vld [vmem:[%s1111_s1 + $0x1a0] sm:$0xff]  ;;  %654 = vmatprep.subr.bf16.mxu1 %v653_v21  ;;  %v85_v30 = vld [vmem:[%s1111_s1 + $0x1a8] sm:$0xff]  ;;  %v627_v33 = vpack.c.bf16 %v37_v28, %v36_v27  ;;  %v55_v36 = vld [vmem:[%s1111_s1 + $0xb8] sm:$0xff] }
   0x9   :  { %v68_v31 = vld [vmem:[%s1111_s1 + $0x120] sm:$0xff]  ;;  %v69_v32 = vld [vmem:[%s1111_s1 + $0x128] sm:$0xff]  ;;  %624 = vmatpush3.bf16.msra.mxu0 %v623_v17  ;;  %v657_v34 = vpack.c.bf16 %v85_v30, %v84_v29  ;;  %v38_v37 = vld [vmem:[%s1111_s1 + $0x30] sm:$0xff]  ;;  %v629_v39 = vpack.c.bf16 %v55_v36, %v54_v35 }
   0xa   :  { %626 = vmatprep.subr.bf16.mxu0 %v625_v26  ;;  %v659_v38 = vpack.c.bf16 %v69_v32, %v68_v31  ;;  %v39_v40 = vld [vmem:[%s1111_s1 + $0x38] sm:$0xff]  ;;  %v86_v41 = vld [vmem:[%s1111_s1 + $0x1b0] sm:$0xff]  ;;  %v56_v46 = vld [vmem:[%s1111_s1 + $0xc0] sm:$0xff] }
   0xb   :  { %656 = vmatpush3.bf16.msra.mxu1 %v655_v25  ;;  %v87_v42 = vld [vmem:[%s1111_s1 + $0x1b8] sm:$0xff]  ;;  %v70_v44 = vld [vmem:[%s1111_s1 + $0x130] sm:$0xff]  ;;  %v57_v47 = vld [vmem:[%s1111_s1 + $0xc8] sm:$0xff]  ;;  %v631_v48 = vpack.c.bf16 %v39_v40, %v38_v37 }
   0xc   :  { %658 = vmatprep.subr.bf16.mxu1 %v657_v34  ;;  %v661_v43 = vpack.c.bf16 %v87_v42, %v86_v41  ;;  %v71_v45 = vld [vmem:[%s1111_s1 + $0x138] sm:$0xff]  ;;  %v88_v49 = vld [vmem:[%s1111_s1 + $0x1c0] sm:$0xff]  ;;  %v89_v50 = vld [vmem:[%s1111_s1 + $0x1c8] sm:$0xff]  ;;  %v633_v52 = vpack.c.bf16 %v57_v47, %v56_v46  ;;  %v732_v41 = vmov 0.0|0.0  }
   0xd   :  { %628 = vmatpush3.bf16.msra.mxu0 %v627_v33  ;;  %v663_v51 = vpack.c.bf16 %v71_v45, %v70_v44  ;;  %v40_v53 = vld [vmem:[%s1111_s1 + $0x40] sm:$0xff]  ;;  %v41_v54 = vld [vmem:[%s1111_s1 + $0x48] sm:$0xff]  ;;  %v665_v56 = vpack.c.bf16 %v89_v50, %v88_v49  ;;  %v58_v58 = vld [vmem:[%s1111_s1 + $0xd0] sm:$0xff] }
   0xe   :  { %630 = vmatprep.subr.bf16.mxu0 %v629_v39  ;;  %v72_v55 = vld [vmem:[%s1111_s1 + $0x140] sm:$0xff]  ;;  %v73_v57 = vld [vmem:[%s1111_s1 + $0x148] sm:$0xff]  ;;  %v59_v59 = vld [vmem:[%s1111_s1 + $0xd8] sm:$0xff]  ;;  %v635_v62 = vpack.c.bf16 %v41_v54, %v40_v53 }
   0xf   :  { %660 = vmatpush3.bf16.msra.mxu1 %v659_v38  ;;  %v90_v60 = vld [vmem:[%s1111_s1 + $0x1d0] sm:$0xff]  ;;  %v91_v61 = vld [vmem:[%s1111_s1 + $0x1d8] sm:$0xff]  ;;  %v667_v63 = vpack.c.bf16 %v73_v57, %v72_v55  ;;  %v637_v0 = vpack.c.bf16 %v59_v59, %v58_v58  ;;  %v60_v6 = vld [vmem:[%s1111_s1 + $0xe0] sm:$0xff] }
  0x10   :  { %662 = vmatprep.subr.bf16.mxu1 %v661_v43  ;;  %v42_v1 = vld [vmem:[%s1111_s1 + $0x50] sm:$0xff]  ;;  %v43_v2 = vld [vmem:[%s1111_s1 + $0x58] sm:$0xff]  ;;  %v669_v4 = vpack.c.bf16 %v91_v61, %v90_v60  ;;  %v61_v7 = vld [vmem:[%s1111_s1 + $0xe8] sm:$0xff] }
  0x11   :  { %632 = vmatpush3.bf16.msra.mxu0 %v631_v48  ;;  %v74_v3 = vld [vmem:[%s1111_s1 + $0x150] sm:$0xff]  ;;  %v75_v5 = vld [vmem:[%s1111_s1 + $0x158] sm:$0xff]  ;;  %v92_v8 = vld [vmem:[%s1111_s1 + $0x1e0] sm:$0xff]  ;;  %v639_v10 = vpack.c.bf16 %v43_v2, %v42_v1  ;;  %v641_v14 = vpack.c.bf16 %v61_v7, %v60_v6 }
  0x12   :  { %634 = vmatprep.subr.bf16.mxu0 %v633_v52  ;;  %v93_v9 = vld [vmem:[%s1111_s1 + $0x1e8] sm:$0xff]  ;;  %v44_v11 = vld [vmem:[%s1111_s1 + $0x60] sm:$0xff]  ;;  %v671_v13 = vpack.c.bf16 %v75_v5, %v74_v3  ;;  %v62_v19 = vld [vmem:[%s1111_s1 + $0xf0] sm:$0xff] }
  0x13   :  { %664 = vmatpush3.bf16.msra.mxu1 %v663_v51  ;;  %v45_v12 = vld [vmem:[%s1111_s1 + $0x68] sm:$0xff]  ;;  %v76_v15 = vld [vmem:[%s1111_s1 + $0x160] sm:$0xff]  ;;  %v673_v18 = vpack.c.bf16 %v93_v9, %v92_v8  ;;  %v63_v20 = vld [vmem:[%s1111_s1 + $0xf8] sm:$0xff] }
  0x14   :  { %666 = vmatprep.subr.bf16.mxu1 %v665_v56  ;;  %v77_v16 = vld [vmem:[%s1111_s1 + $0x168] sm:$0xff]  ;;  %v31_v21 = vld [vmem:[%s1112_s0 + $0x18] sm:$0xff]  ;;  %v94_v22 = vld [vmem:[%s1111_s1 + $0x1f0] sm:$0xff]  ;;  %v643_v24 = vpack.c.bf16 %v45_v12, %v44_v11  ;;  %v645_v26 = vpack.c.bf16 %v63_v20, %v62_v19 }
  0x15   :  { %636 = vmatpush3.bf16.msra.mxu0 %v635_v62  ;;  %v29_v17 = vld [vmem:[%s1112_s0 + $0x8] sm:$0xff]  ;;  %v95_v23 = vld [vmem:[%s1111_s1 + $0x1f8] sm:$0xff]  ;;  %237 = vmatprep.mubr.f32.mxu1 %v31_v21  ;;  %v675_v25 = vpack.c.bf16 %v77_v16, %v76_v15  ;;  %v46_v27 = vld [vmem:[%s1111_s1 + $0x70] sm:$0xff]  ;;  %v734_v21 = vmov 0.0  }
  0x16   :  { %638 = vmatprep.subr.bf16.mxu0 %v637_v0  ;;  %167 = vmatprep.mubr.f32.mxu0 %v29_v17  ;;  %v47_v28 = vld [vmem:[%s1111_s1 + $0x78] sm:$0xff]  ;;  %v677_v29 = vpack.c.bf16 %v95_v23, %v94_v22  ;;  %v78_v30 = vld [vmem:[%s1111_s1 + $0x170] sm:$0xff]  ;;  %v244_v34 = vld [vmem:[%s1113_s3] sm:$0xff] }
  0x17   :  { %668 = vmatpush3.bf16.msra.mxu1 %v667_v63  ;;  %v79_v31 = vld [vmem:[%s1111_s1 + $0x178] sm:$0xff]  ;;  %v647_v32 = vpack.c.bf16 %v47_v28, %v46_v27  ;;  %v245_v35 = vld [vmem:[%s1113_s3 + $0x8] sm:$0xff]  ;;  %v338_v36 = vld [vmem:[%s1114_s5] sm:$0xff] }
  0x18   :  { %670 = vmatprep.subr.bf16.mxu1 %v669_v4  ;;  %v679_v33 = vpack.c.bf16 %v79_v31, %v78_v30  ;;  %v339_v37 = vld [vmem:[%s1114_s5 + $0x8] sm:$0xff]  ;;  %v28_v38 = vld [vmem:[%s1112_s0] sm:$0xff]  ;;  %v682_v39 = vpack.c.bf16 %v245_v35, %v244_v34  ;;  %v30_v40 = vld [vmem:[%s1112_s0 + $0x10] sm:$0xff] }
  0x19   :  { %640 = vmatpush3.bf16.msra.mxu0 %v639_v10  ;;  %v706_v42 = vpack.c.bf16 %v339_v37, %v338_v36  ;;  %v246_v43 = vld [vmem:[%s1113_s3 + $0x10] sm:$0xff]  ;;  %v247_v44 = vld [vmem:[%s1113_s3 + $0x18] sm:$0xff]  ;;  %v248_v49 = vld [vmem:[%s1113_s3 + $0x20] sm:$0xff] }
  0x1a   :  { %642 = vmatprep.subr.bf16.mxu0 %v641_v14  ;;  %v340_v45 = vld [vmem:[%s1114_s5 + $0x10] sm:$0xff]  ;;  %v341_v46 = vld [vmem:[%s1114_s5 + $0x18] sm:$0xff]  ;;  %v685_v47 = vpack.c.bf16 %v247_v44, %v246_v43  ;;  %v249_v50 = vld [vmem:[%s1113_s3 + $0x28] sm:$0xff] }
  0x1b   :  { %672 = vmatpush3.bf16.msra.mxu1 %v671_v13  ;;  %v709_v48 = vpack.c.bf16 %v341_v46, %v340_v45  ;;  %v342_v51 = vld [vmem:[%s1114_s5 + $0x20] sm:$0xff]  ;;  %v343_v52 = vld [vmem:[%s1114_s5 + $0x28] sm:$0xff]  ;;  %v688_v53 = vpack.c.bf16 %v249_v50, %v248_v49  ;;  %v250_v55 = vld [vmem:[%s1113_s3 + $0x30] sm:$0xff] }
  0x1c   :  { %674 = vmatprep.subr.bf16.mxu1 %v673_v18  ;;  %v712_v54 = vpack.c.bf16 %v343_v52, %v342_v51  ;;  %v251_v56 = vld [vmem:[%s1113_s3 + $0x38] sm:$0xff]  ;;  %v344_v57 = vld [vmem:[%s1114_s5 + $0x30] sm:$0xff]  ;;  %v252_v61 = vld [vmem:[%s1113_s3 + $0x40] sm:$0xff] }
  0x1d   :  { %644 = vmatpush3.bf16.msra.mxu0 %v643_v24  ;;  %v345_v58 = vld [vmem:[%s1114_s5 + $0x38] sm:$0xff]  ;;  %v691_v59 = vpack.c.bf16 %v251_v56, %v250_v55  ;;  %v253_v62 = vld [vmem:[%s1113_s3 + $0x48] sm:$0xff]  ;;  %v346_v63 = vld [vmem:[%s1114_s5 + $0x40] sm:$0xff] }
  0x1e   :  { %646 = vmatprep.subr.bf16.mxu0 %v645_v26  ;;  %v715_v60 = vpack.c.bf16 %v345_v58, %v344_v57  ;;  %v347_v0 = vld [vmem:[%s1114_s5 + $0x48] sm:$0xff]  ;;  %v694_v1 = vpack.c.bf16 %v253_v62, %v252_v61  ;;  %v254_v3 = vld [vmem:[%s1113_s3 + $0x50] sm:$0xff]  ;;  %v255_v4 = vld [vmem:[%s1113_s3 + $0x58] sm:$0xff] }
  0x1f   :  { %676 = vmatpush3.bf16.msra.mxu1 %v675_v25  ;;  %v718_v2 = vpack.c.bf16 %v347_v0, %v346_v63  ;;  %v348_v5 = vld [vmem:[%s1114_s5 + $0x50] sm:$0xff]  ;;  %v349_v6 = vld [vmem:[%s1114_s5 + $0x58] sm:$0xff]  ;;  %v697_v7 = vpack.c.bf16 %v255_v4, %v254_v3  ;;  %v256_v9 = vld [vmem:[%s1113_s3 + $0x60] sm:$0xff] }
  0x20   :  { %678 = vmatprep.subr.bf16.mxu1 %v677_v29  ;;  %v721_v8 = vpack.c.bf16 %v349_v6, %v348_v5  ;;  %v257_v10 = vld [vmem:[%s1113_s3 + $0x68] sm:$0xff]  ;;  %v350_v11 = vld [vmem:[%s1114_s5 + $0x60] sm:$0xff]  ;;  %v258_v15 = vld [vmem:[%s1113_s3 + $0x70] sm:$0xff] }
  0x21   :  { %648 = vmatpush3.bf16.msra.mxu0 %v647_v32  ;;  %v700_v12 = vpack.c.bf16 %v257_v10, %v256_v9  ;;  %v351_v13 = vld [vmem:[%s1114_s5 + $0x68] sm:$0xff]  ;;  %v259_v16 = vld [vmem:[%s1113_s3 + $0x78] sm:$0xff]  ;;  %v352_v17 = vld [vmem:[%s1114_s5 + $0x70] sm:$0xff] }
  0x22   :  { %681 = vmatprep.subr.bf16.mxu0 %v732_v41  ;;  %v724_v14 = vpack.c.bf16 %v351_v13, %v350_v11  ;;  %v703_v18 = vpack.c.bf16 %v259_v16, %v258_v15  ;;  %v353_v19 = vld [vmem:[%s1114_s5 + $0x78] sm:$0xff]  ;;  %v440_v23 = vld [vmem:[%s1115_s2] ss:$0 sm:$0xff] }
  0x23   :  { %680 = vmatpush3.bf16.msra.mxu1 %v679_v33  ;;  %v727_v20 = vpack.c.bf16 %v353_v19, %v352_v17  ;;  %v441_v32 = vld [vmem:[%s1116_s4] ss:$0 sm:$0xff] }
  0x24   :  { %705 = vmatprep.subr.bf16.mxu1 %v732_v41  ;;  %168 = vmatmul.mubr.f32.vlgmr.msra.gmra.mrb[0].mxu0 %v28_v38  ;;  %v442_v33 = vld [vmem:[%s1117_s6] ss:$0 sm:$0xff] }
  0x25   :  { %683 = vmatpush3.bf16.msra.mxu0 %v682_v39  ;;  %579 = vmatprep.mubr.msk.f32.mxu0 %vm733_vm0, %v734_v21 }
  0x26   :  { %238 = vmatmul.mubr.f32.vlgmr.msra.gmra.mrb[0].mxu1 %v30_v40  ;;  %684 = vmatprep.subr.bf16.mxu0 %v732_v41 }
  0x27   :  { %707 = vmatpush3.bf16.msra.mxu1 %v706_v42  ;;  %614 = vmatprep.mubr.msk.f32.mxu1 %vm733_vm0, %v734_v21 }
  0x28   :  { %708 = vmatprep.subr.bf16.mxu1 %v732_v41 }
  0x29   :  { %686 = vmatpush3.bf16.msra.mxu0 %v685_v47 }
  0x2a   :  { %687 = vmatprep.subr.bf16.mxu0 %v732_v41 }
  0x2b   :  { %710 = vmatpush3.bf16.msra.mxu1 %v709_v48 }
  0x2c   :  { %711 = vmatprep.subr.bf16.mxu1 %v732_v41 }
  0x2d   :  { %689 = vmatpush3.bf16.msra.mxu0 %v688_v53 }
  0x2e   :  { %690 = vmatprep.subr.bf16.mxu0 %v732_v41 }
  0x2f   :  { %713 = vmatpush3.bf16.msra.mxu1 %v712_v54 }
  0x30   :  { %714 = vmatprep.subr.bf16.mxu1 %v732_v41 }
  0x31   :  { %692 = vmatpush3.bf16.msra.mxu0 %v691_v59 }
  0x32   :  { %693 = vmatprep.subr.bf16.mxu0 %v732_v41 }
  0x33   :  { %716 = vmatpush3.bf16.msra.mxu1 %v715_v60 }
  0x34   :  { %717 = vmatprep.subr.bf16.mxu1 %v732_v41 }
  0x35   :  { %695 = vmatpush3.bf16.msra.mxu0 %v694_v1 }
  0x36   :  { %696 = vmatprep.subr.bf16.mxu0 %v732_v41 }
  0x37   :  { %719 = vmatpush3.bf16.msra.mxu1 %v718_v2 }
  0x38   :  { %720 = vmatprep.subr.bf16.mxu1 %v732_v41 }
  0x39   :  { %698 = vmatpush3.bf16.msra.mxu0 %v697_v7 }
  0x3a   :  { %699 = vmatprep.subr.bf16.mxu0 %v732_v41 }
  0x3b   :  { %722 = vmatpush3.bf16.msra.mxu1 %v721_v8 }
  0x3c   :  { %723 = vmatprep.subr.bf16.mxu1 %v732_v41 }
  0x3d   :  { %701 = vmatpush3.bf16.msra.mxu0 %v700_v12 }
  0x3e   :  { %702 = vmatprep.subr.bf16.mxu0 %v732_v41 }
  0x3f   :  { %725 = vmatpush3.bf16.msra.mxu1 %v724_v14 }
  0x40   :  { %726 = vmatprep.subr.bf16.mxu1 %v732_v41 }
  0x41   :  { %704 = vmatpush3.bf16.msra.mxu0 %v703_v18 }
  0x43   :  { %728 = vmatpush3.bf16.msra.mxu1 %v727_v20 }
  0xf7   :  { %v475_v22 = vpop.f32.mrb[0].mxu0 }
  0xf8   :  { %v476_v24 = vpop.f32.mrb[1].mxu0 }
  0xf9   :  { %v510_v25 = vpop.f32.mrb[0].mxu1  ;;  %v477_v26 = vadd.f32 %v476_v24, %v475_v22 }
  0xfa   :  { %v511_v27 = vpop.f32.mrb[1].mxu1 }
  0xfb   :  { %v512_v28 = vadd.f32 %v511_v27, %v510_v25  ;;  %v170_v29 = vadd.f32 %v477_v26, %v440_v23 }
  0xfd   :  { %v240_v30 = vadd.f32 %v512_v28, %v170_v29 }
  0xff   :  { %v243_v31 = vmax.f32 %v240_v30, 0.0 }
 0x101   :  { %580 = vmatmul.mubr.f32.vlgmr.msra.gmra.mrb[2].mxu0 %v243_v31  ;;  %615 = vmatmul.mubr.f32.vlgmr.msra.gmra.mrb[2].mxu1 %v243_v31 }
 0x1d4   :  { %v333_v34 = vpop.f32.mrb[2].mxu0  ;;  %v427_v35 = vpop.f32.mrb[2].mxu1 }
 0x1d5   :  { %v334_v36 = vadd.f32 %v441_v32, %v333_v34  ;;  %v428_v37 = vadd.f32 %v442_v33, %v427_v35  ;;  %v581_v38 = vpop.f32.mrb[3].mxu0  ;;  %v616_v39 = vpop.f32.mrb[3].mxu1 }
 0x1d7   :  { %337 = vst [vmem:[%s1118_s7] sm:$0xff] %v334_v36  ;;  %431 = vst [vmem:[%s1119_s8] sm:$0xff] %v428_v37 }

// kernel: forward.8
= control target key start
LH: loop header
LB: loop body
LE: loop exit
PB: predicated region body
PF: predicated region fallthrough
CT: control target
= control target key end

     0   :  { %s932_s12 = smov 0   ;;  %s1549_s0 = inlined_call_operand.vmem [shape: f32[2,256,32], index: 0, kind: input, shape index: {}]   ;;  %s1550_s1 = inlined_call_operand.vmem [shape: f32[2,1,32], index: 1, kind: input, shape index: {}]   ;;  %s1551_s2 = inlined_call_operand.vmem [shape: f32[2,1,32], index: 2, kind: input, shape index: {}]   ;;  %s1552_s3 = inlined_call_operand.vmem [shape: bf16[2,256,32], index: 3, kind: output, shape index: {}]  }
   0x1 LB: > { %s816_s13 = sadd.s32 4294967295, %s910_s12   ;;  %p820_p0 = scmp.ge.s32.totalorder %s910_s12, 1  ;;  %s910_s12 = sphi %s932_s12, %s13_s12  }
   0x2   : > { %p153_p1 = scmp.lt.s32.totalorder %s910_s12, 3 }
   0x4   : > { %p154_p2 = pnand %p820_p0, %p153_p1 }
   0x5   : > { %p183_p3 = scmp.lt.s32.totalorder (!%p154_p2), %s816_s13, 1  ;;  %vm231_vm0 = vcmask (!%p154_p2), 261120   ;;  %vm710_vm1 = vcmask (!%p154_p2), 257024  }
   0x6   : > { %157 = sbr.rel (%p154_p2) target bundleno = 235 (0xeb), region = 32 }
   0xd   : > { %s1554_s13 = smov (!%p183_p3, %s816_s13), 1 }
   0xe   : > { %s860_s14 = sshll.u32 %s1554_s13, 8  ;;  %s190_s20 = scalar_lea.vmem %s1550_s1, %s1554_s13 }
   0xf   : > { %s946_s17 = scalar_lea.vmem %s1549_s0, %s860_s14  ;;  %s193_s23 = scalar_lea.vmem %s1551_s2, %s1554_s13 }
  0x10   : > { %v949_v0 = vld [vmem:[%s946_s17] sm:$0xff]  ;;  %v952_v1 = vld [vmem:[%s946_s17 + $0x8] sm:$0xff]  ;;  %v955_v2 = vld [vmem:[%s946_s17 + $0x10] sm:$0xff]  ;;  %s861_s24 = sshll.u32 %s1554_s13, 7 }
  0x11   : > { %v958_v3 = vld [vmem:[%s946_s17 + $0x18] sm:$0xff]  ;;  %v232_v4 = vsel %vm231_vm0, %v949_v0, 0.0  ;;  %v233_v5 = vsel %vm231_vm0, %v952_v1, 0.0  ;;  %v235_v6 = vsel %vm231_vm0, %v955_v2, 0.0  ;;  %v967_v7 = vld [vmem:[%s946_s17 + $0x20] sm:$0xff]  ;;  %v972_v10 = vld [vmem:[%s946_s17 + $0x28] sm:$0xff]  ;;  %s1384_s27 = scalar_lea.vmem %s1552_s3, %s861_s24 }
  0x12   : > { %v234_v8 = vadd.f32 %v233_v5, %v232_v4  ;;  %v237_v9 = vsel %vm231_vm0, %v958_v3, 0.0  ;;  %v239_v12 = vsel %vm231_vm0, %v967_v7, 0.0  ;;  %v977_v13 = vld [vmem:[%s946_s17 + $0x30] sm:$0xff]  ;;  %v241_v15 = vsel %vm231_vm0, %v972_v10, 0.0  ;;  %v982_v16 = vld [vmem:[%s946_s17 + $0x38] sm:$0xff]  ;;  %v987_v19 = vld [vmem:[%s946_s17 + $0x40] sm:$0xff] }
  0x13   : > { %v243_v18 = vsel %vm231_vm0, %v977_v13, 0.0  ;;  %v245_v21 = vsel %vm231_vm0, %v982_v16, 0.0  ;;  %v992_v22 = vld [vmem:[%s946_s17 + $0x48] sm:$0xff]  ;;  %v247_v24 = vsel %vm231_vm0, %v987_v19, 0.0  ;;  %v997_v25 = vld [vmem:[%s946_s17 + $0x50] sm:$0xff]  ;;  %v1002_v28 = vld [vmem:[%s946_s17 + $0x58] sm:$0xff] }
  0x14   : > { %v236_v11 = vadd.f32 %v235_v6, %v234_v8  ;;  %v249_v27 = vsel %vm231_vm0, %v992_v22, 0.0  ;;  %v251_v30 = vsel %vm231_vm0, %v997_v25, 0.0  ;;  %v1007_v31 = vld [vmem:[%s946_s17 + $0x60] sm:$0xff]  ;;  %v253_v33 = vsel %vm231_vm0, %v1002_v28, 0.0  ;;  %v1012_v34 = vld [vmem:[%s946_s17 + $0x68] sm:$0xff]  ;;  %v1017_v37 = vld [vmem:[%s946_s17 + $0x70] sm:$0xff] }
  0x15   : > { %v255_v36 = vsel %vm231_vm0, %v1007_v31, 0.0  ;;  %v257_v39 = vsel %vm231_vm0, %v1012_v34, 0.0  ;;  %v1022_v40 = vld [vmem:[%s946_s17 + $0x78] sm:$0xff]  ;;  %v259_v42 = vsel %vm231_vm0, %v1017_v37, 0.0  ;;  %v1027_v43 = vld [vmem:[%s946_s17 + $0x80] sm:$0xff]  ;;  %v1032_v46 = vld [vmem:[%s946_s17 + $0x88] sm:$0xff] }
  0x16   : > { %v238_v14 = vadd.f32 %v237_v9, %v236_v11  ;;  %v261_v45 = vsel %vm231_vm0, %v1022_v40, 0.0  ;;  %v263_v48 = vsel %vm231_vm0, %v1027_v43, 0.0  ;;  %v1037_v49 = vld [vmem:[%s946_s17 + $0x90] sm:$0xff]  ;;  %v265_v51 = vsel %vm231_vm0, %v1032_v46, 0.0  ;;  %v1042_v52 = vld [vmem:[%s946_s17 + $0x98] sm:$0xff]  ;;  %v1047_v55 = vld [vmem:[%s946_s17 + $0xa0] sm:$0xff] }
  0x17   : > { %v267_v54 = vsel %vm231_vm0, %v1037_v49, 0.0  ;;  %v269_v57 = vsel %vm231_vm0, %v1042_v52, 0.0  ;;  %v1052_v58 = vld [vmem:[%s946_s17 + $0xa8] sm:$0xff]  ;;  %v271_v60 = vsel %vm231_vm0, %v1047_v55, 0.0  ;;  %v1057_v61 = vld [vmem:[%s946_s17 + $0xb0] sm:$0xff]  ;;  %v1062_v4 = vld [vmem:[%s946_s17 + $0xb8] sm:$0xff] }
  0x18   : > { %v240_v17 = vadd.f32 %v239_v12, %v238_v14  ;;  %v273_v63 = vsel %vm231_vm0, %v1052_v58, 0.0  ;;  %v275_v6 = vsel %vm231_vm0, %v1057_v61, 0.0  ;;  %v1067_v8 = vld [vmem:[%s946_s17 + $0xc0] sm:$0xff]  ;;  %v277_v11 = vsel %vm231_vm0, %v1062_v4, 0.0  ;;  %v1072_v12 = vld [vmem:[%s946_s17 + $0xc8] sm:$0xff] }
  0x1a   : > { %v242_v20 = vadd.f32 %v241_v15, %v240_v17  ;;  %v279_v15 = vsel %vm231_vm0, %v1067_v8, 0.0  ;;  %v1077_v17 = vld [vmem:[%s946_s17 + $0xd0] sm:$0xff] }
  0x1c   : > { %v244_v23 = vadd.f32 %v243_v18, %v242_v20  ;;  %v281_v20 = vsel %vm231_vm0, %v1072_v12, 0.0 }
  0x1e   : > { %v246_v26 = vadd.f32 %v245_v21, %v244_v23  ;;  %v1082_v21 = vld [vmem:[%s946_s17 + $0xd8] sm:$0xff] }
  0x20   : > { %v248_v29 = vadd.f32 %v247_v24, %v246_v26  ;;  %v283_v24 = vsel %vm231_vm0, %v1077_v17, 0.0  ;;  %v1087_v26 = vld [vmem:[%s946_s17 + $0xe0] sm:$0xff] }
  0x22   : > { %v250_v32 = vadd.f32 %v249_v27, %v248_v29  ;;  %v285_v29 = vsel %vm231_vm0, %v1082_v21, 0.0 }
  0x24   : > { %v252_v35 = vadd.f32 %v251_v30, %v250_v32  ;;  %v1092_v30 = vld [vmem:[%s946_s17 + $0xe8] sm:$0xff] }
  0x26   : > { %v254_v38 = vadd.f32 %v253_v33, %v252_v35  ;;  %v287_v33 = vsel %vm231_vm0, %v1087_v26, 0.0  ;;  %v1097_v35 = vld [vmem:[%s946_s17 + $0xf0] sm:$0xff] }
  0x28   : > { %v256_v41 = vadd.f32 %v255_v36, %v254_v38  ;;  %v289_v38 = vsel %vm231_vm0, %v1092_v30, 0.0 }
  0x2a   : > { %v258_v44 = vadd.f32 %v257_v39, %v256_v41  ;;  %v1102_v39 = vld [vmem:[%s946_s17 + $0xf8] sm:$0xff] }
  0x2c   : > { %v260_v47 = vadd.f32 %v259_v42, %v258_v44  ;;  %v291_v42 = vsel %vm231_vm0, %v1097_v35, 0.0 }
  0x2e   : > { %v262_v50 = vadd.f32 %v261_v45, %v260_v47  ;;  %v293_v45 = vsel %vm231_vm0, %v1102_v39, 0.0 }
  0x30   : > { %v264_v53 = vadd.f32 %v263_v48, %v262_v50 }
  0x32   : > { %v266_v56 = vadd.f32 %v265_v51, %v264_v53 }
  0x34   : > { %v268_v59 = vadd.f32 %v267_v54, %v266_v56 }
  0x36   : > { %v270_v62 = vadd.f32 %v269_v57, %v268_v59 }
  0x38   : > { %v272_v5 = vadd.f32 %v271_v60, %v270_v62 }
  0x3a   : > { %v274_v9 = vadd.f32 %v273_v63, %v272_v5 }
  0x3c   : > { %v276_v14 = vadd.f32 %v275_v6, %v274_v9 }
  0x3e   : > { %v278_v18 = vadd.f32 %v277_v11, %v276_v14 }
  0x40   : > { %v280_v23 = vadd.f32 %v279_v15, %v278_v18 }
  0x42   : > { %v282_v27 = vadd.f32 %v281_v20, %v280_v23 }
  0x44   : > { %v284_v32 = vadd.f32 %v283_v24, %v282_v27 }
  0x46   : > { %v286_v36 = vadd.f32 %v285_v29, %v284_v32 }
  0x48   : > { %v288_v41 = vadd.f32 %v287_v33, %v286_v36 }
  0x4a   : > { %v290_v44 = vadd.f32 %v289_v38, %v288_v41 }
  0x4c   : > { %v292_v47 = vadd.f32 %v291_v42, %v290_v44 }
  0x4e   : > { %v294_v48 = vadd.f32 %v293_v45, %v292_v47 }
  0x50   : > { %v295_v50 = vrot.slane %v294_v48, 4 }
  0x52   : > { %v296_v51 = vadd.f32 %v295_v50, %v294_v48 }
  0x54   : > { %v297_v53 = vrot.slane %v296_v51, 2 }
  0x56   : > { %v298_v54 = vadd.f32 %v297_v53, %v296_v51 }
  0x58   : > { %v299_v56 = vrot.slane %v298_v54, 1 }
  0x5a   : > { %v300_v57 = vadd.f32 %v299_v56, %v298_v54 }
  0x5c   : > { %v1108_v59 = vmul.f32 0.00390625, %v300_v57 }
  0x5e   : > { %v1112_v60 = vsub.f32 %v949_v0, %v1108_v59  ;;  %v1116_v62 = vsub.f32 %v952_v1, %v1108_v59  ;;  %v1120_v63 = vsub.f32 %v955_v2, %v1108_v59  ;;  %v1124_v5 = vsub.f32 %v958_v3, %v1108_v59 }
  0x5f   : > { %v1128_v6 = vsub.f32 %v967_v7, %v1108_v59  ;;  %v1138_v2 = vsub.f32 %v972_v10, %v1108_v59  ;;  %v1144_v7 = vsub.f32 %v977_v13, %v1108_v59  ;;  %v1153_v10 = vsub.f32 %v982_v16, %v1108_v59 }
  0x60   : > { %v335_v0 = vmul.f32 %v1112_v60, %v1112_v60  ;;  %v336_v9 = vmul.f32 %v1116_v62, %v1116_v62  ;;  %v337_v1 = vmul.f32 %v1120_v63, %v1120_v63  ;;  %v338_v3 = vmul.f32 %v1124_v5, %v1124_v5 }
  0x61   : > { %v339_v11 = vmul.f32 %v1128_v6, %v1128_v6  ;;  %v340_v23 = vmul.f32 %v1138_v2, %v1138_v2  ;;  %v1160_v27 = vsub.f32 %v987_v19, %v1108_v59  ;;  %v341_v29 = vmul.f32 %v1144_v7, %v1144_v7 }
  0x62   : > { %v367_v14 = vsel %vm231_vm0, %v335_v0, 0.0  ;;  %v368_v15 = vsel %vm231_vm0, %v336_v9, 0.0  ;;  %v370_v18 = vsel %vm231_vm0, %v337_v1, 0.0  ;;  %v372_v13 = vsel %vm231_vm0, %v338_v3, 0.0 }
  0x63   : > { %v369_v20 = vadd.f32 %v368_v15, %v367_v14  ;;  %v374_v32 = vsel %vm231_vm0, %v339_v11, 0.0  ;;  %v1167_v16 = vsub.f32 %v992_v22, %v1108_v59  ;;  %v342_v36 = vmul.f32 %v1153_v10, %v1153_v10 }
  0x64   : > { %v376_v38 = vsel %vm231_vm0, %v340_v23, 0.0  ;;  %v1174_v19 = vsub.f32 %v997_v25, %v1108_v59  ;;  %v343_v42 = vmul.f32 %v1160_v27, %v1160_v27  ;;  %v378_v44 = vsel %vm231_vm0, %v341_v29, 0.0 }
  0x65   : > { %v371_v24 = vadd.f32 %v370_v18, %v369_v20  ;;  %v1181_v22 = vsub.f32 %v1002_v28, %v1108_v59  ;;  %v344_v47 = vmul.f32 %v1167_v16, %v1167_v16  ;;  %v380_v48 = vsel %vm231_vm0, %v342_v36, 0.0 }
  0x66   : > { %v1188_v25 = vsub.f32 %v1007_v31, %v1108_v59  ;;  %v345_v51 = vmul.f32 %v1174_v19, %v1174_v19  ;;  %v382_v53 = vsel %vm231_vm0, %v343_v42, 0.0  ;;  %v1195_v28 = vsub.f32 %v1012_v34, %v1108_v59 }
  0x67   : > { %v373_v33 = vadd.f32 %v372_v13, %v371_v24  ;;  %v346_v56 = vmul.f32 %v1181_v22, %v1181_v22  ;;  %v384_v57 = vsel %vm231_vm0, %v344_v47, 0.0  ;;  %v1202_v31 = vsub.f32 %v1017_v37, %v1108_v59 }
  0x68   : > { %v347_v9 = vmul.f32 %v1188_v25, %v1188_v25  ;;  %v386_v1 = vsel %vm231_vm0, %v345_v51, 0.0  ;;  %v1209_v34 = vsub.f32 %v1022_v40, %v1108_v59  ;;  %v348_v11 = vmul.f32 %v1195_v28, %v1195_v28 }
  0x69   : > { %v375_v41 = vadd.f32 %v374_v32, %v373_v33  ;;  %v388_v14 = vsel %vm231_vm0, %v346_v56, 0.0  ;;  %v1216_v37 = vsub.f32 %v1027_v43, %v1108_v59  ;;  %v349_v18 = vmul.f32 %v1202_v31, %v1202_v31 }
  0x6a   : > { %v390_v20 = vsel %vm231_vm0, %v347_v9, 0.0  ;;  %v1223_v40 = vsub.f32 %v1032_v46, %v1108_v59  ;;  %v350_v13 = vmul.f32 %v1209_v34, %v1209_v34  ;;  %v392_v24 = vsel %vm231_vm0, %v348_v11, 0.0 }
  0x6b   : > { %v377_v45 = vadd.f32 %v376_v38, %v375_v41  ;;  %v1230_v43 = vsub.f32 %v1037_v49, %v1108_v59  ;;  %v351_v32 = vmul.f32 %v1216_v37, %v1216_v37  ;;  %v394_v33 = vsel %vm231_vm0, %v349_v18, 0.0 }
  0x6c   : > { %v1237_v46 = vsub.f32 %v1042_v52, %v1108_v59  ;;  %v352_v38 = vmul.f32 %v1223_v40, %v1223_v40  ;;  %v396_v41 = vsel %vm231_vm0, %v350_v13, 0.0  ;;  %v1244_v49 = vsub.f32 %v1047_v55, %v1108_v59 }
  0x6d   : > { %v379_v50 = vadd.f32 %v378_v44, %v377_v45  ;;  %v353_v44 = vmul.f32 %v1230_v43, %v1230_v43  ;;  %v398_v45 = vsel %vm231_vm0, %v351_v32, 0.0  ;;  %v1251_v52 = vsub.f32 %v1052_v58, %v1108_v59 }
  0x6e   : > { %v1258_v55 = vsub.f32 %v1057_v61, %v1108_v59  ;;  %v1265_v58 = vsub.f32 %v1062_v4, %v1108_v59  ;;  %v1272_v61 = vsub.f32 %v1067_v8, %v1108_v59  ;;  %v1279_v4 = vsub.f32 %v1072_v12, %v1108_v59 }
  0x6f   : > { %v381_v54 = vadd.f32 %v380_v48, %v379_v50  ;;  %v354_v48 = vmul.f32 %v1237_v46, %v1237_v46  ;;  %v400_v50 = vsel %vm231_vm0, %v352_v38, 0.0  ;;  %v1286_v8 = vsub.f32 %v1077_v17, %v1108_v59 }
  0x70   : > { %v1293_v12 = vsub.f32 %v1082_v21, %v1108_v59  ;;  %v1300_v17 = vsub.f32 %v1087_v26, %v1108_v59  ;;  %v1307_v21 = vsub.f32 %v1092_v30, %v1108_v59  ;;  %v1314_v26 = vsub.f32 %v1097_v35, %v1108_v59 }
  0x71   : > { %v383_v0 = vadd.f32 %v382_v53, %v381_v54  ;;  %v355_v53 = vmul.f32 %v1244_v49, %v1244_v49  ;;  %v402_v54 = vsel %vm231_vm0, %v353_v44, 0.0  ;;  %v1321_v30 = vsub.f32 %v1102_v39, %v1108_v59 }
  0x72   : > { %v365_v35 = vmul.f32 %v1314_v26, %v1314_v26 }
  0x73   : > { %v385_v3 = vadd.f32 %v384_v57, %v383_v0  ;;  %v356_v57 = vmul.f32 %v1251_v52, %v1251_v52  ;;  %v404_v0 = vsel %vm231_vm0, %v354_v48, 0.0 }
  0x74   : > { %v426_v59 = vsel %vm231_vm0, %v365_v35, 0.0 }
  0x75   : > { %v387_v15 = vadd.f32 %v386_v1, %v385_v3  ;;  %v357_v1 = vmul.f32 %v1258_v55, %v1258_v55  ;;  %v406_v3 = vsel %vm231_vm0, %v355_v53, 0.0 }
  0x77   : > { %v389_v23 = vadd.f32 %v388_v14, %v387_v15  ;;  %v358_v14 = vmul.f32 %v1265_v58, %v1265_v58  ;;  %v408_v15 = vsel %vm231_vm0, %v356_v57, 0.0  ;;  %v366_v57 = vmul.f32 %v1321_v30, %v1321_v30 }
  0x79   : > { %v391_v29 = vadd.f32 %v390_v20, %v389_v23  ;;  %v359_v20 = vmul.f32 %v1272_v61, %v1272_v61  ;;  %v410_v23 = vsel %vm231_vm0, %v357_v1, 0.0  ;;  %v428_v1 = vsel %vm231_vm0, %v366_v57, 0.0 }
  0x7b   : > { %v393_v36 = vadd.f32 %v392_v24, %v391_v29  ;;  %v360_v24 = vmul.f32 %v1279_v4, %v1279_v4  ;;  %v412_v29 = vsel %vm231_vm0, %v358_v14, 0.0 }
  0x7d   : > { %v395_v42 = vadd.f32 %v394_v33, %v393_v36  ;;  %v361_v33 = vmul.f32 %v1286_v8, %v1286_v8  ;;  %v414_v36 = vsel %vm231_vm0, %v359_v20, 0.0 }
  0x7f   : > { %v397_v47 = vadd.f32 %v396_v41, %v395_v42  ;;  %v362_v41 = vmul.f32 %v1293_v12, %v1293_v12  ;;  %v416_v42 = vsel %vm231_vm0, %v360_v24, 0.0 }
  0x81   : > { %v399_v51 = vadd.f32 %v398_v45, %v397_v47  ;;  %v363_v45 = vmul.f32 %v1300_v17, %v1300_v17  ;;  %v418_v47 = vsel %vm231_vm0, %v361_v33, 0.0 }
  0x83   : > { %v401_v56 = vadd.f32 %v400_v50, %v399_v51  ;;  %v364_v50 = vmul.f32 %v1307_v21, %v1307_v21  ;;  %v420_v51 = vsel %vm231_vm0, %v362_v41, 0.0 }
  0x85   : > { %v403_v9 = vadd.f32 %v402_v54, %v401_v56  ;;  %v422_v54 = vsel %vm231_vm0, %v363_v45, 0.0 }
  0x87   : > { %v405_v11 = vadd.f32 %v404_v0, %v403_v9  ;;  %v424_v0 = vsel %vm231_vm0, %v364_v50, 0.0 }
  0x89   : > { %v407_v18 = vadd.f32 %v406_v3, %v405_v11 }
  0x8b   : > { %v409_v13 = vadd.f32 %v408_v15, %v407_v18 }
  0x8d   : > { %v411_v32 = vadd.f32 %v410_v23, %v409_v13 }
  0x8f   : > { %v413_v38 = vadd.f32 %v412_v29, %v411_v32  ;;  %v474_v29 = vlaneseq }
  0x91   : > { %v415_v44 = vadd.f32 %v414_v36, %v413_v38  ;;  %v475_v33 = vshrl.u32 %v474_v29, 7  ;;  %v471_v36 = vld [vmem:[%s190_s20] sm:$0x1] }
  0x92   : > { %v472_v38 = vadd.f32 1.0, %v471_v36 }
  0x93   : > { %v417_v48 = vadd.f32 %v416_v42, %v415_v44  ;;  %v476_v41 = vsub.s32 0, %v475_v33 }
  0x95   : > { %v419_v53 = vadd.f32 %v418_v47, %v417_v48  ;;  %v1342_v42 = vrot.slane %v472_v38, %v476_v41 }
  0x97   : > { %v421_v56 = vadd.f32 %v420_v51, %v419_v53  ;;  %v1354_v51 = vld [vmem:[%s193_s23] ss:$0 sm:$0xff] }
  0x99   : > { %v423_v39 = vadd.f32 %v422_v54, %v421_v56 }
  0x9b   : > { %v425_v9 = vadd.f32 %v424_v0, %v423_v39 }
  0x9d   : > { %v427_v3 = vadd.f32 %v426_v59, %v425_v9 }
  0x9f   : > { %v429_v11 = vadd.f32 %v428_v1, %v427_v3 }
  0xa1   : > { %v430_v14 = vrot.slane %v429_v11, 4 }
  0xa3   : > { %v431_v15 = vadd.f32 %v430_v14, %v429_v11 }
  0xa5   : > { %v432_v18 = vrot.slane %v431_v15, 2 }
  0xa7   : > { %v433_v20 = vadd.f32 %v432_v18, %v431_v15 }
  0xa9   : > { %v434_v23 = vrot.slane %v433_v20, 1 }
  0xab   : > { %v435_v13 = vadd.f32 %v434_v23, %v433_v20 }
  0xad   : > { %v436_v24 = vmul.f32 0.00390625, %v435_v13 }
  0xaf   : > { %v437_v32 = vadd.f32 1e-05, %v436_v24 }
  0xb1   : > { %902 = vrsqrt.f32 %v437_v32 }
  0xbb   : > { %v1344_v44 = vpop.eup %902 }
  0xbc   : > { %v439_v45 = vmul.f32 %v1344_v44, %v1112_v60  ;;  %v440_v47 = vmul.f32 %v1344_v44, %v1116_v62  ;;  %v441_v48 = vmul.f32 %v1344_v44, %v1120_v63  ;;  %v442_v50 = vmul.f32 %v1344_v44, %v1124_v5 }
  0xbd   : > { %v443_v53 = vmul.f32 %v1344_v44, %v1128_v6  ;;  %v444_v35 = vmul.f32 %v1344_v44, %v1138_v2  ;;  %v445_v60 = vmul.f32 %v1344_v44, %v1144_v7  ;;  %v446_v62 = vmul.f32 %v1344_v44, %v1153_v10 }
  0xbe   : > { %v479_v54 = vmul.f32 %v1342_v42, %v439_v45  ;;  %v480_v63 = vmul.f32 %v1342_v42, %v440_v47  ;;  %v481_v5 = vmul.f32 %v1342_v42, %v441_v48  ;;  %v482_v56 = vmul.f32 %v1342_v42, %v442_v50 }
  0xbf   : > { %v483_v57 = vmul.f32 %v1342_v42, %v443_v53  ;;  %v484_v6 = vmul.f32 %v1342_v42, %v444_v35  ;;  %v485_v2 = vmul.f32 %v1342_v42, %v445_v60  ;;  %v486_v0 = vmul.f32 %v1342_v42, %v446_v62 }
  0xc0   : > { %v518_v7 = vadd.f32 %v1354_v51, %v479_v54  ;;  %v519_v10 = vadd.f32 %v1354_v51, %v480_v63  ;;  %v520_v39 = vadd.f32 %v1354_v51, %v481_v5  ;;  %v521_v59 = vadd.f32 %v1354_v51, %v482_v56 }
  0xc1   : > { %v522_v9 = vadd.f32 %v1354_v51, %v483_v57  ;;  %v523_v1 = vadd.f32 %v1354_v51, %v484_v6  ;;  %v524_v3 = vadd.f32 %v1354_v51, %v485_v2  ;;  %v525_v11 = vadd.f32 %v1354_v51, %v486_v0 }
  0xc2   : > { %v550_v14 = vmax.f32 %v518_v7, 0.0  ;;  %v551_v15 = vmax.f32 %v519_v10, 0.0  ;;  %v552_v18 = vmax.f32 %v520_v39, 0.0  ;;  %v553_v20 = vmax.f32 %v521_v59, 0.0 }
  0xc3   : > { %v554_v23 = vmax.f32 %v522_v9, 0.0  ;;  %v555_v13 = vmax.f32 %v523_v1, 0.0  ;;  %v556_v24 = vmax.f32 %v524_v3, 0.0  ;;  %v557_v29 = vmax.f32 %v525_v11, 0.0 }
  0xc4   : > { %v862_v32 = vpack.c.bf16 %v550_v14, %v550_v14  ;;  %v863_v33 = vpack.c.bf16 %v551_v15, %v551_v15  ;;  %v864_v36 = vpack.c.bf16 %v552_v18, %v552_v18  ;;  %v865_v38 = vpack.c.bf16 %v553_v20, %v553_v20 }
  0xc5   : > { %v866_v41 = vpack.c.bf16 %v554_v23, %v554_v23  ;;  %v867_v45 = vpack.c.bf16 %v555_v13, %v555_v13  ;;  %v868_v47 = vpack.c.bf16 %v556_v24, %v556_v24  ;;  %v869_v48 = vpack.c.bf16 %v557_v29, %v557_v29 }
  0xc6   : > { %711 = vst.msk [vmem:[%s1384_s27] sm:$0xf] %vm710_vm1, %v862_v32  ;;  %712 = vst.msk [vmem:[%s1384_s27 + $0x4] sm:$0xf] %vm710_vm1, %v863_v33  ;;  %v447_v50 = vmul.f32 %v1344_v44, %v1160_v27  ;;  %v448_v53 = vmul.f32 %v1344_v44, %v1167_v16  ;;  %v449_v35 = vmul.f32 %v1344_v44, %v1174_v19 }
  0xc7   : > { %713 = vst.msk [vmem:[%s1384_s27 + $0x8] sm:$0xf] %vm710_vm1, %v864_v36  ;;  %714 = vst.msk [vmem:[%s1384_s27 + $0xc] sm:$0xf] %vm710_vm1, %v865_v38  ;;  %v450_v60 = vmul.f32 %v1344_v44, %v1181_v22  ;;  %v451_v27 = vmul.f32 %v1344_v44, %v1188_v25  ;;  %v452_v16 = vmul.f32 %v1344_v44, %v1195_v28 }
  0xc8   : > { %715 = vst.msk [vmem:[%s1384_s27 + $0x10] sm:$0xf] %vm710_vm1, %v866_v41  ;;  %716 = vst.msk [vmem:[%s1384_s27 + $0x14] sm:$0xf] %vm710_vm1, %v867_v45  ;;  %v453_v19 = vmul.f32 %v1344_v44, %v1202_v31  ;;  %v454_v22 = vmul.f32 %v1344_v44, %v1209_v34  ;;  %v487_v62 = vmul.f32 %v1342_v42, %v447_v50 }
  0xc9   : > { %717 = vst.msk [vmem:[%s1384_s27 + $0x18] sm:$0xf] %vm710_vm1, %v868_v47  ;;  %718 = vst.msk [vmem:[%s1384_s27 + $0x1c] sm:$0xf] %vm710_vm1, %v869_v48  ;;  %v488_v54 = vmul.f32 %v1342_v42, %v448_v53  ;;  %v489_v63 = vmul.f32 %v1342_v42, %v449_v35  ;;  %v490_v5 = vmul.f32 %v1342_v42, %v450_v60 }
  0xca   : > { %v491_v56 = vmul.f32 %v1342_v42, %v451_v27  ;;  %v492_v25 = vmul.f32 %v1342_v42, %v452_v16  ;;  %v493_v28 = vmul.f32 %v1342_v42, %v453_v19  ;;  %v494_v57 = vmul.f32 %v1342_v42, %v454_v22 }
  0xcb   : > { %v526_v31 = vadd.f32 %v1354_v51, %v487_v62  ;;  %v527_v34 = vadd.f32 %v1354_v51, %v488_v54  ;;  %v528_v6 = vadd.f32 %v1354_v51, %v489_v63  ;;  %v529_v2 = vadd.f32 %v1354_v51, %v490_v5 }
  0xcc   : > { %v530_v0 = vadd.f32 %v1354_v51, %v491_v56  ;;  %v531_v7 = vadd.f32 %v1354_v51, %v492_v25  ;;  %v532_v10 = vadd.f32 %v1354_v51, %v493_v28  ;;  %v533_v39 = vadd.f32 %v1354_v51, %v494_v57 }
  0xcd   : > { %v558_v59 = vmax.f32 %v526_v31, 0.0  ;;  %v559_v9 = vmax.f32 %v527_v34, 0.0  ;;  %v560_v1 = vmax.f32 %v528_v6, 0.0  ;;  %v561_v3 = vmax.f32 %v529_v2, 0.0 }
  0xce   : > { %v562_v11 = vmax.f32 %v530_v0, 0.0  ;;  %v563_v14 = vmax.f32 %v531_v7, 0.0  ;;  %v564_v15 = vmax.f32 %v532_v10, 0.0  ;;  %v565_v18 = vmax.f32 %v533_v39, 0.0 }
  0xcf   : > { %v870_v20 = vpack.c.bf16 %v558_v59, %v558_v59  ;;  %v871_v23 = vpack.c.bf16 %v559_v9, %v559_v9  ;;  %v872_v13 = vpack.c.bf16 %v560_v1, %v560_v1  ;;  %v873_v24 = vpack.c.bf16 %v561_v3, %v561_v3 }
  0xd0   : > { %v874_v29 = vpack.c.bf16 %v562_v11, %v562_v11  ;;  %v875_v32 = vpack.c.bf16 %v563_v14, %v563_v14  ;;  %v876_v33 = vpack.c.bf16 %v564_v15, %v564_v15  ;;  %v877_v36 = vpack.c.bf16 %v565_v18, %v565_v18 }
  0xd1   : > { %719 = vst.msk [vmem:[%s1384_s27 + $0x20] sm:$0xf] %vm710_vm1, %v870_v20  ;;  %720 = vst.msk [vmem:[%s1384_s27 + $0x24] sm:$0xf] %vm710_vm1, %v871_v23  ;;  %v455_v38 = vmul.f32 %v1344_v44, %v1216_v37  ;;  %v456_v41 = vmul.f32 %v1344_v44, %v1223_v40  ;;  %v457_v45 = vmul.f32 %v1344_v44, %v1230_v43 }
  0xd2   : > { %721 = vst.msk [vmem:[%s1384_s27 + $0x28] sm:$0xf] %vm710_vm1, %v872_v13  ;;  %722 = vst.msk [vmem:[%s1384_s27 + $0x2c] sm:$0xf] %vm710_vm1, %v873_v24  ;;  %v458_v47 = vmul.f32 %v1344_v44, %v1237_v46  ;;  %v459_v37 = vmul.f32 %v1344_v44, %v1244_v49  ;;  %v460_v40 = vmul.f32 %v1344_v44, %v1251_v52 }
  0xd3   : > { %723 = vst.msk [vmem:[%s1384_s27 + $0x30] sm:$0xf] %vm710_vm1, %v874_v29  ;;  %724 = vst.msk [vmem:[%s1384_s27 + $0x34] sm:$0xf] %vm710_vm1, %v875_v32  ;;  %v461_v43 = vmul.f32 %v1344_v44, %v1258_v55  ;;  %v462_v46 = vmul.f32 %v1344_v44, %v1265_v58  ;;  %v495_v48 = vmul.f32 %v1342_v42, %v455_v38 }
  0xd4   : > { %725 = vst.msk [vmem:[%s1384_s27 + $0x38] sm:$0xf] %vm710_vm1, %v876_v33  ;;  %726 = vst.msk [vmem:[%s1384_s27 + $0x3c] sm:$0xf] %vm710_vm1, %v877_v36  ;;  %v496_v50 = vmul.f32 %v1342_v42, %v456_v41  ;;  %v497_v53 = vmul.f32 %v1342_v42, %v457_v45  ;;  %v498_v35 = vmul.f32 %v1342_v42, %v458_v47 }
  0xd5   : > { %v499_v60 = vmul.f32 %v1342_v42, %v459_v37  ;;  %v500_v49 = vmul.f32 %v1342_v42, %v460_v40  ;;  %v501_v52 = vmul.f32 %v1342_v42, %v461_v43  ;;  %v502_v27 = vmul.f32 %v1342_v42, %v462_v46 }
  0xd6   : > { %v534_v55 = vadd.f32 %v1354_v51, %v495_v48  ;;  %v535_v58 = vadd.f32 %v1354_v51, %v496_v50  ;;  %v536_v16 = vadd.f32 %v1354_v51, %v497_v53  ;;  %v537_v19 = vadd.f32 %v1354_v51, %v498_v35 }
  0xd7   : > { %v538_v22 = vadd.f32 %v1354_v51, %v499_v60  ;;  %v539_v62 = vadd.f32 %v1354_v51, %v500_v49  ;;  %v540_v54 = vadd.f32 %v1354_v51, %v501_v52  ;;  %v541_v63 = vadd.f32 %v1354_v51, %v502_v27 }
  0xd8   : > { %v566_v5 = vmax.f32 %v534_v55, 0.0  ;;  %v567_v56 = vmax.f32 %v535_v58, 0.0  ;;  %v568_v25 = vmax.f32 %v536_v16, 0.0  ;;  %v569_v28 = vmax.f32 %v537_v19, 0.0 }
  0xd9   : > { %v570_v57 = vmax.f32 %v538_v22, 0.0  ;;  %v571_v31 = vmax.f32 %v539_v62, 0.0  ;;  %v572_v34 = vmax.f32 %v540_v54, 0.0  ;;  %v573_v6 = vmax.f32 %v541_v63, 0.0 }
  0xda   : > { %v878_v2 = vpack.c.bf16 %v566_v5, %v566_v5  ;;  %v879_v0 = vpack.c.bf16 %v567_v56, %v567_v56  ;;  %v880_v7 = vpack.c.bf16 %v568_v25, %v568_v25  ;;  %v881_v10 = vpack.c.bf16 %v569_v28, %v569_v28 }
  0xdb   : > { %v882_v39 = vpack.c.bf16 %v570_v57, %v570_v57  ;;  %v883_v59 = vpack.c.bf16 %v571_v31, %v571_v31  ;;  %v884_v9 = vpack.c.bf16 %v572_v34, %v572_v34  ;;  %v885_v1 = vpack.c.bf16 %v573_v6, %v573_v6 }
  0xdc   : > { %727 = vst.msk [vmem:[%s1384_s27 + $0x40] sm:$0xf] %vm710_vm1, %v878_v2  ;;  %728 = vst.msk [vmem:[%s1384_s27 + $0x44] sm:$0xf] %vm710_vm1, %v879_v0  ;;  %v463_v3 = vmul.f32 %v1344_v44, %v1272_v61  ;;  %v464_v11 = vmul.f32 %v1344_v44, %v1279_v4  ;;  %v465_v14 = vmul.f32 %v1344_v44, %v1286_v8 }
  0xdd   : > { %729 = vst.msk [vmem:[%s1384_s27 + $0x48] sm:$0xf] %vm710_vm1, %v880_v7  ;;  %730 = vst.msk [vmem:[%s1384_s27 + $0x4c] sm:$0xf] %vm710_vm1, %v881_v10  ;;  %v466_v15 = vmul.f32 %v1344_v44, %v1293_v12  ;;  %v467_v61 = vmul.f32 %v1344_v44, %v1300_v17  ;;  %v468_v4 = vmul.f32 %v1344_v44, %v1307_v21 }
  0xde   : > { %731 = vst.msk [vmem:[%s1384_s27 + $0x50] sm:$0xf] %vm710_vm1, %v882_v39  ;;  %732 = vst.msk [vmem:[%s1384_s27 + $0x54] sm:$0xf] %vm710_vm1, %v883_v59  ;;  %v469_v8 = vmul.f32 %v1344_v44, %v1314_v26  ;;  %v470_v12 = vmul.f32 %v1344_v44, %v1321_v30  ;;  %v503_v18 = vmul.f32 %v1342_v42, %v463_v3 }
  0xdf   : > { %733 = vst.msk [vmem:[%s1384_s27 + $0x58] sm:$0xf] %vm710_vm1, %v884_v9  ;;  %734 = vst.msk [vmem:[%s1384_s27 + $0x5c] sm:$0xf] %vm710_vm1, %v885_v1  ;;  %v504_v20 = vmul.f32 %v1342_v42, %v464_v11  ;;  %v505_v23 = vmul.f32 %v1342_v42, %v465_v14  ;;  %v506_v13 = vmul.f32 %v1342_v42, %v466_v15 }
  0xe0   : > { %v507_v24 = vmul.f32 %v1342_v42, %v467_v61  ;;  %v508_v17 = vmul.f32 %v1342_v42, %v468_v4  ;;  %v509_v21 = vmul.f32 %v1342_v42, %v469_v8  ;;  %v510_v29 = vmul.f32 %v1342_v42, %v470_v12 }
  0xe1   : > { %v542_v26 = vadd.f32 %v1354_v51, %v503_v18  ;;  %v543_v30 = vadd.f32 %v1354_v51, %v504_v20  ;;  %v544_v44 = vadd.f32 %v1354_v51, %v505_v23  ;;  %v545_v32 = vadd.f32 %v1354_v51, %v506_v13 }
  0xe2   : > { %v546_v33 = vadd.f32 %v1354_v51, %v507_v24  ;;  %v547_v36 = vadd.f32 %v1354_v51, %v508_v17  ;;  %v548_v38 = vadd.f32 %v1354_v51, %v509_v21  ;;  %v549_v41 = vadd.f32 %v1354_v51, %v510_v29 }
  0xe3   : > { %v574_v45 = vmax.f32 %v542_v26, 0.0  ;;  %v575_v47 = vmax.f32 %v543_v30, 0.0  ;;  %v576_v42 = vmax.f32 %v544_v44, 0.0  ;;  %v577_v37 = vmax.f32 %v545_v32, 0.0 }
  0xe4   : > { %v578_v40 = vmax.f32 %v546_v33, 0.0  ;;  %v579_v43 = vmax.f32 %v547_v36, 0.0  ;;  %v580_v46 = vmax.f32 %v548_v38, 0.0  ;;  %v581_v48 = vmax.f32 %v549_v41, 0.0 }
  0xe5   : > { %v886_v50 = vpack.c.bf16 %v574_v45, %v574_v45  ;;  %v887_v53 = vpack.c.bf16 %v575_v47, %v575_v47  ;;  %v888_v35 = vpack.c.bf16 %v576_v42, %v576_v42  ;;  %v889_v51 = vpack.c.bf16 %v577_v37, %v577_v37 }
  0xe6   : > { %v890_v60 = vpack.c.bf16 %v578_v40, %v578_v40  ;;  %v891_v49 = vpack.c.bf16 %v579_v43, %v579_v43  ;;  %v892_v52 = vpack.c.bf16 %v580_v46, %v580_v46  ;;  %v893_v27 = vpack.c.bf16 %v581_v48, %v581_v48 }
  0xe7   : > { %735 = vst.msk [vmem:[%s1384_s27 + $0x60] sm:$0xf] %vm710_vm1, %v886_v50  ;;  %736 = vst.msk [vmem:[%s1384_s27 + $0x64] sm:$0xf] %vm710_vm1, %v887_v53 }
  0xe8   : > { %737 = vst.msk [vmem:[%s1384_s27 + $0x68] sm:$0xf] %vm710_vm1, %v888_v35  ;;  %738 = vst.msk [vmem:[%s1384_s27 + $0x6c] sm:$0xf] %vm710_vm1, %v889_v51 }
  0xe9   : > { %739 = vst.msk [vmem:[%s1384_s27 + $0x70] sm:$0xf] %vm710_vm1, %v890_v60  ;;  %740 = vst.msk [vmem:[%s1384_s27 + $0x74] sm:$0xf] %vm710_vm1, %v891_v49 }
  0xea   : > { %741 = vst.msk [vmem:[%s1384_s27 + $0x78] sm:$0xf] %vm710_vm1, %v892_v52  ;;  %742 = vst.msk [vmem:[%s1384_s27 + $0x7c] sm:$0xf] %vm710_vm1, %v893_v27 }
  0xeb PF: > { %s13_s12 = sadd.s32 1, %s910_s12  }
  0xec   : > { %p10_p4 = scmp.ge.s32.totalorder %s13_s12, 4  }
  0xee   :  { %12 = sbr.rel (!%p10_p4) target bundleno = 1 (0x1), region = 68 }

// kernel: forward.6
= control target key start
LH: loop header
LB: loop body
LE: loop exit
PB: predicated region body
PF: predicated region fallthrough
CT: control target
= control target key end

     0   :  { %s1280_s15 = smov 0   ;;  %s1282_s16 = smov 0   ;;  %s1467_s0 = inlined_call_operand.vmem [shape: bf16[512,128], index: 0, kind: input, shape index: {}]   ;;  %s1468_s1 = inlined_call_operand.vmem [shape: bf16[128,128], index: 1, kind: input, shape index: {}]   ;;  %s1469_s2 = inlined_call_operand.vmem [shape: f32[1,128], index: 2, kind: input, shape index: {}]   ;;  %s1470_s3 = inlined_call_operand.vmem [shape: f32[1,128], index: 3, kind: input, shape index: {}]   ;;  %s1471_s4 = inlined_call_operand.vmem [shape: f32[512,128], index: 4, kind: output, shape index: {}]  }
   0x1   :  { %s1284_s17 = smov 0  }
   0x2 LB: > { %s33_s18 = sadd.s32 1, %s1249_s16  ;;  %p1061_p0 = scmp.ge.s32.totalorder %s1253_s17, 1  ;;  %s1253_s17 = sphi %s1284_s17, %s14_s17   ;;  %s1249_s16 = sphi %s1282_s16, %s1473_s16   ;;  %s1245_s15 = sphi %s1280_s15, %s1472_s15  }
   0x3   : > { %p35_p1 = scmp.ge.s32.totalorder %s33_s18, 2  ;;  %p221_p2 = scmp.lt.s32.totalorder %s1253_s17, 3 }
   0x5   : > { %s1475_s18 = smov (%p35_p1, %s33_s18), 0  ;;  %p222_p3 = pnand %p1061_p0, %p221_p2 }
   0x6   : > { %v1207_v0 = vld [vmem:[%s1468_s1] sm:$0xff] (!%p222_p3)   ;;  %s1062_s21 = sshll.u32 (!%p222_p3), %s1245_s15, 5  ;;  %v1208_v1 = vld [vmem:[%s1468_s1 + $0x8] sm:$0xff] (!%p222_p3)   ;;  %v1209_v2 = vld [vmem:[%s1468_s1 + $0x10] sm:$0xff] (!%p222_p3)  }
   0x7   : > { %225 = sbr.rel (%p222_p3) target bundleno = 283 (0x11b), region = 36  ;;  %p268_p4 = scmp.lt.s32.totalorder (!%p222_p3), %s1062_s21, 63  ;;  %1118 = vmatprep.subr.bf16.mxu0 (!%p222_p3), %v1207_v0  ;;  %1166 = vmatprep.subr.bf16.mxu1 (!%p222_p3), %v1207_v0  ;;  %v1210_v3 = vld [vmem:[%s1468_s1 + $0x18] sm:$0xff] (!%p222_p3)   ;;  %v1211_v6 = vld [vmem:[%s1468_s1 + $0x20] sm:$0xff] (!%p222_p3)   ;;  %v1212_v7 = vld [vmem:[%s1468_s1 + $0x28] sm:$0xff] (!%p222_p3)  }
   0x8   : > { %1119 = vmatpush3.bf16.msra.mxu0 (!%p222_p3), %v1207_v0  ;;  %1174 = vmatpush3.bf16.msra.mxu1 (!%p222_p3), %v1207_v0  ;;  %v1213_v8 = vld [vmem:[%s1468_s1 + $0x30] sm:$0xff] (!%p222_p3)   ;;  %v1214_v9 = vld [vmem:[%s1468_s1 + $0x38] sm:$0xff] (!%p222_p3)   ;;  %v1349_v25 = vld [vmem:[%s1469_s2] ss:$0 sm:$0xff] (!%p222_p3) }
   0x9   : > { %1120 = vmatprep.subr.bf16.mxu0 (!%p222_p3), %v1208_v1  ;;  %1167 = vmatprep.subr.bf16.mxu1 (!%p222_p3), %v1208_v1  ;;  %v1355_v29 = vld [vmem:[%s1470_s3] ss:$0 sm:$0xff] (!%p222_p3) }
   0xc   : > { %1121 = vmatpush3.bf16.msra.mxu0 (!%p222_p3), %v1208_v1  ;;  %1175 = vmatpush3.bf16.msra.mxu1 (!%p222_p3), %v1208_v1 }
   0xd   : > { %1122 = vmatprep.subr.bf16.mxu0 (!%p222_p3), %v1209_v2  ;;  %1168 = vmatprep.subr.bf16.mxu1 (!%p222_p3), %v1209_v2 }
   0xe   : > { %s1477_s21 = smov (!%p268_p4, %s1062_s21), 63 }
   0xf   : > { %s1063_s26 = sshll.u32 %s1477_s21, 2  ;;  %s1065_s19 = sshll.u32 %s1477_s21, 3 }
  0x10   : > { %s1313_s29 = scalar_lea.vmem %s1467_s0, %s1063_s26  ;;  %1123 = vmatpush3.bf16.msra.mxu0 %v1209_v2  ;;  %1176 = vmatpush3.bf16.msra.mxu1 %v1209_v2  ;;  %s1362_s25 = scalar_lea.vmem %s1471_s4, %s1065_s19 }
  0x11   : > { %v1215_v4 = vld [vmem:[%s1313_s29] sm:$0xff]   ;;  %1124 = vmatprep.subr.bf16.mxu0 %v1210_v3  ;;  %1169 = vmatprep.subr.bf16.mxu1 %v1210_v3  ;;  %v1217_v10 = vld [vmem:[%s1313_s29 + $0x8] sm:$0xff]   ;;  %v1219_v12 = vld [vmem:[%s1313_s29 + $0x10] sm:$0xff]  }
  0x12   : > { %v1216_v5 = vld [vmem:[%s1313_s29 + $0x40] sm:$0xff]   ;;  %1134 = vmatprep.mubr.bf16.mxu0 %v1215_v4  ;;  %v1218_v11 = vld [vmem:[%s1313_s29 + $0x48] sm:$0xff]   ;;  %v1220_v13 = vld [vmem:[%s1313_s29 + $0x50] sm:$0xff]  }
  0x13   : > { %1150 = vmatprep.mubr.bf16.mxu1 %v1216_v5  ;;  %v1221_v14 = vld [vmem:[%s1313_s29 + $0x18] sm:$0xff]   ;;  %v1223_v16 = vld [vmem:[%s1313_s29 + $0x20] sm:$0xff]   ;;  %v1225_v18 = vld [vmem:[%s1313_s29 + $0x28] sm:$0xff]  }
  0x14   : > { %1125 = vmatpush3.bf16.msra.mxu0 %v1210_v3  ;;  %1177 = vmatpush3.bf16.msra.mxu1 %v1210_v3  ;;  %v1222_v15 = vld [vmem:[%s1313_s29 + $0x58] sm:$0xff]   ;;  %v1224_v17 = vld [vmem:[%s1313_s29 + $0x60] sm:$0xff]   ;;  %v1226_v19 = vld [vmem:[%s1313_s29 + $0x68] sm:$0xff]  }
  0x15   : > { %1126 = vmatprep.subr.bf16.mxu0 %v1211_v6  ;;  %1170 = vmatprep.subr.bf16.mxu1 %v1211_v6  ;;  %v1227_v20 = vld [vmem:[%s1313_s29 + $0x30] sm:$0xff]   ;;  %v1229_v22 = vld [vmem:[%s1313_s29 + $0x38] sm:$0xff]  }
  0x16   : > { %v1228_v21 = vld [vmem:[%s1313_s29 + $0x70] sm:$0xff]   ;;  %v1230_v23 = vld [vmem:[%s1313_s29 + $0x78] sm:$0xff]  }
  0x18   : > { %1127 = vmatpush3.bf16.msra.mxu0 %v1211_v6  ;;  %1178 = vmatpush3.bf16.msra.mxu1 %v1211_v6 }
  0x19   : > { %1128 = vmatprep.subr.bf16.mxu0 %v1212_v7  ;;  %1171 = vmatprep.subr.bf16.mxu1 %v1212_v7 }
  0x1c   : > { %1129 = vmatpush3.bf16.msra.mxu0 %v1212_v7  ;;  %1179 = vmatpush3.bf16.msra.mxu1 %v1212_v7 }
  0x1d   : > { %1130 = vmatprep.subr.bf16.mxu0 %v1213_v8  ;;  %1172 = vmatprep.subr.bf16.mxu1 %v1213_v8 }
  0x20   : > { %1131 = vmatpush3.bf16.msra.mxu0 %v1213_v8  ;;  %1180 = vmatpush3.bf16.msra.mxu1 %v1213_v8 }
  0x21   : > { %1132 = vmatprep.subr.bf16.mxu0 %v1214_v9  ;;  %1173 = vmatprep.subr.bf16.mxu1 %v1214_v9 }
  0x24   : > { %1133 = vmatpush3.bf16.msra.mxu0 %v1214_v9  ;;  %1181 = vmatpush3.bf16.msra.mxu1 %v1214_v9 }
  0x27   : > { %1135 = vmatmul.mubr.bf16.vlgmr.msra.gmra.mrb[0].mxu0 %v1217_v10  ;;  %1151 = vmatmul.mubr.bf16.vlgmr.msra.gmra.mrb[0].mxu1 %v1218_v11 }
  0x28   : > { %1138 = vmatprep.mubr.bf16.mxu0 %v1219_v12  ;;  %1154 = vmatprep.mubr.bf16.mxu1 %v1220_v13 }
  0x2f   : > { %1139 = vmatmul.mubr.bf16.gmra.mrb[4].mxu0 %v1221_v14  ;;  %1155 = vmatmul.mubr.bf16.gmra.mrb[4].mxu1 %v1222_v15 }
  0x30   : > { %1142 = vmatprep.mubr.bf16.mxu0 %v1223_v16  ;;  %1158 = vmatprep.mubr.bf16.mxu1 %v1224_v17 }
  0x37   : > { %1143 = vmatmul.mubr.bf16.gmra.mrb[8].mxu0 %v1225_v18  ;;  %1159 = vmatmul.mubr.bf16.gmra.mrb[8].mxu1 %v1226_v19 }
  0x38   : > { %1146 = vmatprep.mubr.bf16.mxu0 %v1227_v20  ;;  %1162 = vmatprep.mubr.bf16.mxu1 %v1228_v21 }
  0x3f   : > { %1147 = vmatmul.mubr.bf16.gmra.mrb[12].mxu0 %v1229_v22  ;;  %1163 = vmatmul.mubr.bf16.gmra.mrb[12].mxu1 %v1230_v23 }
  0xfa   : > { %v1136_v24 = vpop.f32.mrb[0].mxu0  ;;  %v1152_v26 = vpop.f32.mrb[0].mxu1 }
  0xfb   : > { %v595_v27 = vpop.f32.mrb[1].mxu0  ;;  %v659_v28 = vpop.f32.mrb[1].mxu1  ;;  %v830_v32 = vmul.f32 %v1136_v24, %v1349_v25  ;;  %v846_v33 = vmul.f32 %v1152_v26, %v1349_v25 }
  0xfc   : > { %v1137_v30 = vpop.f32.mrb[2].mxu0  ;;  %v1153_v31 = vpop.f32.mrb[2].mxu1  ;;  %v828_v36 = vmul.f32 %v1349_v25, %v595_v27  ;;  %v844_v37 = vmul.f32 %v1349_v25, %v659_v28 }
  0xfd   : > { %v598_v34 = vpop.f32.mrb[3].mxu0  ;;  %v662_v35 = vpop.f32.mrb[3].mxu1  ;;  %v869_v38 = vadd.f32 %v1355_v29, %v830_v32  ;;  %v885_v39 = vadd.f32 %v1355_v29, %v846_v33  ;;  %v831_v40 = vmul.f32 %v1137_v30, %v1349_v25  ;;  %v847_v41 = vmul.f32 %v1153_v31, %v1349_v25 }
  0xfe   : > { %v867_v42 = vadd.f32 %v1355_v29, %v828_v36  ;;  %v883_v43 = vadd.f32 %v1355_v29, %v844_v37  ;;  %v829_v44 = vmul.f32 %v1349_v25, %v598_v34  ;;  %v845_v45 = vmul.f32 %v1349_v25, %v662_v35 }
  0xff   : > { %901 = vst [vmem:[%s1362_s25 + $0x10] sm:$0xff] %v869_v38  ;;  %917 = vst [vmem:[%s1362_s25 + $0x90] sm:$0xff] %v885_v39  ;;  %v870_v46 = vadd.f32 %v1355_v29, %v831_v40  ;;  %v886_v47 = vadd.f32 %v1355_v29, %v847_v41 }
 0x100   : > { %899 = vst [vmem:[%s1362_s25] sm:$0xff] %v867_v42  ;;  %915 = vst [vmem:[%s1362_s25 + $0x80] sm:$0xff] %v883_v43  ;;  %v868_v48 = vadd.f32 %v1355_v29, %v829_v44  ;;  %v884_v49 = vadd.f32 %v1355_v29, %v845_v45 }
 0x101   : > { %902 = vst [vmem:[%s1362_s25 + $0x18] sm:$0xff] %v870_v46  ;;  %918 = vst [vmem:[%s1362_s25 + $0x98] sm:$0xff] %v886_v47 }
 0x102   : > { %v1140_v50 = vpop.f32.mrb[4].mxu0  ;;  %v1156_v51 = vpop.f32.mrb[4].mxu1  ;;  %900 = vst [vmem:[%s1362_s25 + $0x8] sm:$0xff] %v868_v48  ;;  %916 = vst [vmem:[%s1362_s25 + $0x88] sm:$0xff] %v884_v49 }
 0x103   : > { %v611_v52 = vpop.f32.mrb[5].mxu0  ;;  %v675_v53 = vpop.f32.mrb[5].mxu1  ;;  %v834_v56 = vmul.f32 %v1140_v50, %v1349_v25  ;;  %v850_v57 = vmul.f32 %v1156_v51, %v1349_v25 }
 0x104   : > { %v1141_v54 = vpop.f32.mrb[6].mxu0  ;;  %v1157_v55 = vpop.f32.mrb[6].mxu1  ;;  %v832_v60 = vmul.f32 %v1349_v25, %v611_v52  ;;  %v848_v61 = vmul.f32 %v1349_v25, %v675_v53 }
 0x105   : > { %v614_v58 = vpop.f32.mrb[7].mxu0  ;;  %v678_v59 = vpop.f32.mrb[7].mxu1  ;;  %v873_v62 = vadd.f32 %v1355_v29, %v834_v56  ;;  %v889_v63 = vadd.f32 %v1355_v29, %v850_v57  ;;  %v835_v0 = vmul.f32 %v1141_v54, %v1349_v25  ;;  %v851_v1 = vmul.f32 %v1157_v55, %v1349_v25 }
 0x106   : > { %v871_v2 = vadd.f32 %v1355_v29, %v832_v60  ;;  %v887_v3 = vadd.f32 %v1355_v29, %v848_v61  ;;  %v833_v4 = vmul.f32 %v1349_v25, %v614_v58  ;;  %v849_v5 = vmul.f32 %v1349_v25, %v678_v59 }
 0x107   : > { %905 = vst [vmem:[%s1362_s25 + $0x30] sm:$0xff] %v873_v62  ;;  %921 = vst [vmem:[%s1362_s25 + $0xb0] sm:$0xff] %v889_v63  ;;  %v874_v6 = vadd.f32 %v1355_v29, %v835_v0  ;;  %v890_v7 = vadd.f32 %v1355_v29, %v851_v1 }
 0x108   : > { %903 = vst [vmem:[%s1362_s25 + $0x20] sm:$0xff] %v871_v2  ;;  %919 = vst [vmem:[%s1362_s25 + $0xa0] sm:$0xff] %v887_v3  ;;  %v872_v8 = vadd.f32 %v1355_v29, %v833_v4  ;;  %v888_v9 = vadd.f32 %v1355_v29, %v849_v5 }
 0x109   : > { %906 = vst [vmem:[%s1362_s25 + $0x38] sm:$0xff] %v874_v6  ;;  %922 = vst [vmem:[%s1362_s25 + $0xb8] sm:$0xff] %v890_v7 }
 0x10a   : > { %v1144_v10 = vpop.f32.mrb[8].mxu0  ;;  %v1160_v11 = vpop.f32.mrb[8].mxu1  ;;  %904 = vst [vmem:[%s1362_s25 + $0x28] sm:$0xff] %v872_v8  ;;  %920 = vst [vmem:[%s1362_s25 + $0xa8] sm:$0xff] %v888_v9 }
 0x10b   : > { %v627_v12 = vpop.f32.mrb[9].mxu0  ;;  %v691_v13 = vpop.f32.mrb[9].mxu1  ;;  %v838_v16 = vmul.f32 %v1144_v10, %v1349_v25  ;;  %v854_v17 = vmul.f32 %v1160_v11, %v1349_v25 }
 0x10c   : > { %v1145_v14 = vpop.f32.mrb[10].mxu0  ;;  %v1161_v15 = vpop.f32.mrb[10].mxu1  ;;  %v836_v20 = vmul.f32 %v1349_v25, %v627_v12  ;;  %v852_v21 = vmul.f32 %v1349_v25, %v691_v13 }
 0x10d   : > { %v630_v18 = vpop.f32.mrb[11].mxu0  ;;  %v694_v19 = vpop.f32.mrb[11].mxu1  ;;  %v877_v22 = vadd.f32 %v1355_v29, %v838_v16  ;;  %v893_v23 = vadd.f32 %v1355_v29, %v854_v17  ;;  %v839_v24 = vmul.f32 %v1145_v14, %v1349_v25  ;;  %v855_v26 = vmul.f32 %v1161_v15, %v1349_v25 }
 0x10e   : > { %v875_v27 = vadd.f32 %v1355_v29, %v836_v20  ;;  %v891_v28 = vadd.f32 %v1355_v29, %v852_v21  ;;  %v837_v30 = vmul.f32 %v1349_v25, %v630_v18  ;;  %v853_v31 = vmul.f32 %v1349_v25, %v694_v19 }
 0x10f   : > { %909 = vst [vmem:[%s1362_s25 + $0x50] sm:$0xff] %v877_v22  ;;  %925 = vst [vmem:[%s1362_s25 + $0xd0] sm:$0xff] %v893_v23  ;;  %v878_v32 = vadd.f32 %v1355_v29, %v839_v24  ;;  %v894_v33 = vadd.f32 %v1355_v29, %v855_v26 }
 0x110   : > { %907 = vst [vmem:[%s1362_s25 + $0x40] sm:$0xff] %v875_v27  ;;  %923 = vst [vmem:[%s1362_s25 + $0xc0] sm:$0xff] %v891_v28  ;;  %v876_v34 = vadd.f32 %v1355_v29, %v837_v30  ;;  %v892_v35 = vadd.f32 %v1355_v29, %v853_v31 }
 0x111   : > { %910 = vst [vmem:[%s1362_s25 + $0x58] sm:$0xff] %v878_v32  ;;  %926 = vst [vmem:[%s1362_s25 + $0xd8] sm:$0xff] %v894_v33 }
 0x112   : > { %v1148_v36 = vpop.f32.mrb[12].mxu0  ;;  %v1164_v37 = vpop.f32.mrb[12].mxu1  ;;  %908 = vst [vmem:[%s1362_s25 + $0x48] sm:$0xff] %v876_v34  ;;  %924 = vst [vmem:[%s1362_s25 + $0xc8] sm:$0xff] %v892_v35 }
 0x113   : > { %v643_v38 = vpop.f32.mrb[13].mxu0  ;;  %v707_v39 = vpop.f32.mrb[13].mxu1  ;;  %v842_v42 = vmul.f32 %v1148_v36, %v1349_v25  ;;  %v858_v43 = vmul.f32 %v1164_v37, %v1349_v25 }
 0x114   : > { %v1149_v40 = vpop.f32.mrb[14].mxu0  ;;  %v1165_v41 = vpop.f32.mrb[14].mxu1  ;;  %v840_v46 = vmul.f32 %v1349_v25, %v643_v38  ;;  %v856_v47 = vmul.f32 %v1349_v25, %v707_v39 }
 0x115   : > { %v646_v44 = vpop.f32.mrb[15].mxu0  ;;  %v710_v45 = vpop.f32.mrb[15].mxu1  ;;  %v881_v48 = vadd.f32 %v1355_v29, %v842_v42  ;;  %v897_v49 = vadd.f32 %v1355_v29, %v858_v43  ;;  %v843_v50 = vmul.f32 %v1149_v40, %v1349_v25  ;;  %v859_v51 = vmul.f32 %v1165_v41, %v1349_v25 }
 0x116   : > { %v879_v52 = vadd.f32 %v1355_v29, %v840_v46  ;;  %v895_v53 = vadd.f32 %v1355_v29, %v856_v47  ;;  %v841_v54 = vmul.f32 %v1349_v25, %v646_v44  ;;  %v857_v55 = vmul.f32 %v1349_v25, %v710_v45 }
 0x117   : > { %913 = vst [vmem:[%s1362_s25 + $0x70] sm:$0xff] %v881_v48  ;;  %929 = vst [vmem:[%s1362_s25 + $0xf0] sm:$0xff] %v897_v49  ;;  %v882_v56 = vadd.f32 %v1355_v29, %v843_v50  ;;  %v898_v57 = vadd.f32 %v1355_v29, %v859_v51 }
 0x118   : > { %911 = vst [vmem:[%s1362_s25 + $0x60] sm:$0xff] %v879_v52  ;;  %927 = vst [vmem:[%s1362_s25 + $0xe0] sm:$0xff] %v895_v53  ;;  %v880_v58 = vadd.f32 %v1355_v29, %v841_v54  ;;  %v896_v59 = vadd.f32 %v1355_v29, %v857_v55 }
 0x119   : > { %914 = vst [vmem:[%s1362_s25 + $0x78] sm:$0xff] %v882_v56  ;;  %930 = vst [vmem:[%s1362_s25 + $0xf8] sm:$0xff] %v898_v57 }
 0x11a   : > { %912 = vst [vmem:[%s1362_s25 + $0x68] sm:$0xff] %v880_v58  ;;  %928 = vst [vmem:[%s1362_s25 + $0xe8] sm:$0xff] %v896_v59 }
 0x11b PF: > { %s14_s17 = sadd.s32 1, %s1253_s17   ;;  %s1472_s15 = smov %s1249_s16 }
 0x11c   : > { %p11_p5 = scmp.ge.s32.totalorder %s14_s17, 4   ;;  %s1473_s16 = smov %s1475_s18 }
 0x11e   :  { %13 = sbr.rel (!%p11_p5) target bundleno = 2 (0x2), region = 83 }

// kernel: forward.11
= control target key start
LH: loop header
LB: loop body
LE: loop exit
PB: predicated region body
PF: predicated region fallthrough
CT: control target
= control target key end

     0   :  { %8 = vsyncpa [#allocation3], 0  ;;  %s1558_s0 = inlined_call_operand.vmem [shape: f32[2,256,32], index: 0, kind: input, shape index: {}]   ;;  %s1559_s1 = inlined_call_operand.vmem [shape: f32[2,1,32], index: 1, kind: input, shape index: {}]   ;;  %s1560_s2 = inlined_call_operand.vmem [shape: f32[2,1,32], index: 2, kind: input, shape index: {}]   ;;  %s1561_s3 = inlined_call_operand.hbm [shape: f32[2,256,32], index: 3, kind: output, shape index: {}]  }
   0x1   :  { %10 = vsyncpa [#allocation3 + $0x1], 0  ;;  %s851_s12 = smov 0   ;;  %s853_s13 = smov 0  }
   0x2   :  { %s855_s14 = smov 0   ;;  %s857_s15 = smov 0  }
   0x3 LB: > { %s872_s16 = sadd.s32 4294967295, %s826_s15   ;;  %s706_s17 = sadd.s32 4294967294, %s826_s15   ;;  %s826_s15 = sphi %s857_s15, %s1567_s15   ;;  %s822_s14 = sphi %s855_s14, %s1566_s14   ;;  %s818_s13 = sphi %s853_s13, %s1565_s13   ;;  %s814_s12 = sphi %s851_s12, %s1564_s12  }
   0x4   : > { %s876_s18 = sadd.s32 1, %s826_s15   ;;  %s101_s19 = sadd.s32 1, %s822_s14 }
   0x5   : > { %s98_s20 = ssub.s32 %s826_s15, %s876_s18  ;;  %p111_p0 = scmp.ne.s32.totalorder %s822_s14, %s818_s13 }
   0x6   : > { %p99_p1 = scmp.eq.s32.totalorder %s98_s20, 0  ;;  %p112_p2 = scmp.eq.s32.totalorder %s872_s16, 1 }
   0x7   : > { %p117_p3 = scmp.ne.s32.totalorder %s818_s13, %s814_s12  ;;  %p118_p4 = scmp.eq.s32.totalorder %s706_s17, 1 }
   0x8   : > { %s887_s21 = scalar_select %p99_p1, %s822_s14, %s101_s19  }
   0x9   : > { %p889_p5 = por %p112_p2, %p111_p0  ;;  %p893_p6 = por %p118_p4, %p117_p3 }
   0xa   : > { %p709_p7 = scmp.ge.s32.totalorder %s826_s15, 1  ;;  %p156_p8 = scmp.lt.s32.totalorder %s826_s15, 3 }
   0xc   : > { %p157_p9 = pnand %p709_p7, %p156_p8 }
   0xd   : > { %p186_p10 = scmp.lt.s32.totalorder (!%p157_p9), %s872_s16, 1  ;;  %vm229_vm0 = vcmask (!%p157_p9), 261120   ;;  %s183_s8 = sand.u32 (!%p157_p9), 1, %s818_s13  }
   0xe   : > { %160 = sbr.rel (%p157_p9) target bundleno = 250 (0xfa), region = 32  ;;  %s710_s9 = sshll.u32 (!%p157_p9), %s183_s8, 8 }
   0xf   : > { %s1344_s10 = scalar_lea.vmem (!%p157_p9), [#allocation2], %s710_s9  ;;  %s720_s11 = sshll.u32 (!%p157_p9), %s872_s16, 12 }
  0x10   : > { %s626_s17 = sshll.u32 (!%p157_p9), %s1344_s10, 4  ;;  %s1495_s20 = scalar_lea.hbm (!%p157_p9), %s1561_s3, %s720_s11  ;;  %s1497_s17 = int_to_ptr.vmem [resolvable:$true] %s626_s17 }
  0x11   : > { %s828_s26 = smov (!%p157_p9), [#allocation2]  }
  0x12   : > { %s768_s27 = sshll.u32 (!%p157_p9), %s828_s26, 4  ;;  %s769_s27 = int_to_ptr.vmem [resolvable:$false] %s768_s27 }
  0x13   : > { %p771_p0 = scmp.lt.s32.totalorder (!%p157_p9), %s1497_s17, %s769_s27 }
  0x15   : > { %s901_s24 = scalar_select %p186_p10, %s872_s16, 1 }
  0x17   : > { %s719_s25 = sshll.u32 %s901_s24, 8  ;;  %s193_s4 = scalar_lea.vmem %s1559_s1, %s901_s24 }
  0x18   : > { %s907_s28 = scalar_lea.vmem %s1558_s0, %s719_s25  ;;  %s196_s7 = scalar_lea.vmem %s1560_s2, %s901_s24 }
  0x19   : > { %v910_v0 = vld [vmem:[%s907_s28] sm:$0xff]  ;;  %v913_v1 = vld [vmem:[%s907_s28 + $0x8] sm:$0xff]  ;;  %v916_v2 = vld [vmem:[%s907_s28 + $0x10] sm:$0xff]  ;;  %s1517_s24 = scalar_lea.sflag [#allocation3], %s183_s8  ;;  %s764_s25 = scalar_lea.vmem %s1497_s17, 4096 }
  0x1a   : > { %v919_v3 = vld [vmem:[%s907_s28 + $0x18] sm:$0xff]  ;;  %v230_v4 = vsel %vm229_vm0, %v910_v0, 0.0  ;;  %v231_v5 = vsel %vm229_vm0, %v913_v1, 0.0  ;;  %v233_v6 = vsel %vm229_vm0, %v916_v2, 0.0  ;;  %v928_v7 = vld [vmem:[%s907_s28 + $0x20] sm:$0xff]  ;;  %v933_v10 = vld [vmem:[%s907_s28 + $0x28] sm:$0xff]  ;;  %p765_p11 = scmp.ne.s32.totalorder %s1497_s17, %s764_s25 }
  0x1b   : > { %v232_v8 = vadd.f32 %v231_v5, %v230_v4  ;;  %v235_v9 = vsel %vm229_vm0, %v919_v3, 0.0  ;;  %v237_v12 = vsel %vm229_vm0, %v928_v7, 0.0  ;;  %v938_v13 = vld [vmem:[%s907_s28 + $0x30] sm:$0xff]  ;;  %v239_v15 = vsel %vm229_vm0, %v933_v10, 0.0  ;;  %v943_v16 = vld [vmem:[%s907_s28 + $0x38] sm:$0xff]  ;;  %v948_v19 = vld [vmem:[%s907_s28 + $0x40] sm:$0xff] }
  0x1c   : > { %v241_v18 = vsel %vm229_vm0, %v938_v13, 0.0  ;;  %v243_v21 = vsel %vm229_vm0, %v943_v16, 0.0  ;;  %v953_v22 = vld [vmem:[%s907_s28 + $0x48] sm:$0xff]  ;;  %v245_v24 = vsel %vm229_vm0, %v948_v19, 0.0  ;;  %v958_v25 = vld [vmem:[%s907_s28 + $0x50] sm:$0xff]  ;;  %v963_v28 = vld [vmem:[%s907_s28 + $0x58] sm:$0xff]  ;;  %p766_p12 = pnand %p765_p11, %p889_p5 }
  0x1d   : > { %v234_v11 = vadd.f32 %v233_v6, %v232_v8  ;;  %v247_v27 = vsel %vm229_vm0, %v953_v22, 0.0  ;;  %v249_v30 = vsel %vm229_vm0, %v958_v25, 0.0  ;;  %v968_v31 = vld [vmem:[%s907_s28 + $0x60] sm:$0xff]  ;;  %v251_v33 = vsel %vm229_vm0, %v963_v28, 0.0  ;;  %v973_v34 = vld [vmem:[%s907_s28 + $0x68] sm:$0xff]  ;;  %v978_v37 = vld [vmem:[%s907_s28 + $0x70] sm:$0xff] }
  0x1e   : > { %v253_v36 = vsel %vm229_vm0, %v968_v31, 0.0  ;;  %v255_v39 = vsel %vm229_vm0, %v973_v34, 0.0  ;;  %v983_v40 = vld [vmem:[%s907_s28 + $0x78] sm:$0xff]  ;;  %v257_v42 = vsel %vm229_vm0, %v978_v37, 0.0  ;;  %v988_v43 = vld [vmem:[%s907_s28 + $0x80] sm:$0xff]  ;;  %v993_v46 = vld [vmem:[%s907_s28 + $0x88] sm:$0xff]  ;;  %p767_p13 = pneg %p766_p12 }
  0x1f   : > { %v236_v14 = vadd.f32 %v235_v9, %v234_v11  ;;  %v259_v45 = vsel %vm229_vm0, %v983_v40, 0.0  ;;  %v261_v48 = vsel %vm229_vm0, %v988_v43, 0.0  ;;  %v998_v49 = vld [vmem:[%s907_s28 + $0x90] sm:$0xff]  ;;  %v263_v51 = vsel %vm229_vm0, %v993_v46, 0.0  ;;  %v1003_v52 = vld [vmem:[%s907_s28 + $0x98] sm:$0xff]  ;;  %v1008_v55 = vld [vmem:[%s907_s28 + $0xa0] sm:$0xff] }
  0x20   : > { %v265_v54 = vsel %vm229_vm0, %v998_v49, 0.0  ;;  %v267_v57 = vsel %vm229_vm0, %v1003_v52, 0.0  ;;  %v1013_v58 = vld [vmem:[%s907_s28 + $0xa8] sm:$0xff]  ;;  %v269_v60 = vsel %vm229_vm0, %v1008_v55, 0.0  ;;  %v1018_v61 = vld [vmem:[%s907_s28 + $0xb0] sm:$0xff]  ;;  %v1023_v4 = vld [vmem:[%s907_s28 + $0xb8] sm:$0xff] }
  0x21   : > { %v238_v17 = vadd.f32 %v237_v12, %v236_v14  ;;  %v271_v63 = vsel %vm229_vm0, %v1013_v58, 0.0  ;;  %v273_v6 = vsel %vm229_vm0, %v1018_v61, 0.0  ;;  %v1028_v8 = vld [vmem:[%s907_s28 + $0xc0] sm:$0xff]  ;;  %v275_v11 = vsel %vm229_vm0, %v1023_v4, 0.0  ;;  %v1033_v12 = vld [vmem:[%s907_s28 + $0xc8] sm:$0xff] }
  0x23   : > { %v240_v20 = vadd.f32 %v239_v15, %v238_v17  ;;  %v277_v15 = vsel %vm229_vm0, %v1028_v8, 0.0  ;;  %v1038_v17 = vld [vmem:[%s907_s28 + $0xd0] sm:$0xff] }
  0x25   : > { %v242_v23 = vadd.f32 %v241_v18, %v240_v20  ;;  %v279_v20 = vsel %vm229_vm0, %v1033_v12, 0.0 }
  0x27   : > { %v244_v26 = vadd.f32 %v243_v21, %v242_v23  ;;  %v1043_v21 = vld [vmem:[%s907_s28 + $0xd8] sm:$0xff] }
  0x29   : > { %v246_v29 = vadd.f32 %v245_v24, %v244_v26  ;;  %v281_v24 = vsel %vm229_vm0, %v1038_v17, 0.0  ;;  %v1048_v26 = vld [vmem:[%s907_s28 + $0xe0] sm:$0xff] }
  0x2b   : > { %v248_v32 = vadd.f32 %v247_v27, %v246_v29  ;;  %v283_v29 = vsel %vm229_vm0, %v1043_v21, 0.0 }
  0x2d   : > { %v250_v35 = vadd.f32 %v249_v30, %v248_v32  ;;  %v1053_v30 = vld [vmem:[%s907_s28 + $0xe8] sm:$0xff] }
  0x2f   : > { %v252_v38 = vadd.f32 %v251_v33, %v250_v35  ;;  %v285_v33 = vsel %vm229_vm0, %v1048_v26, 0.0  ;;  %v1058_v35 = vld [vmem:[%s907_s28 + $0xf0] sm:$0xff] }
  0x31   : > { %v254_v41 = vadd.f32 %v253_v36, %v252_v38  ;;  %v287_v38 = vsel %vm229_vm0, %v1053_v30, 0.0 }
  0x33   : > { %v256_v44 = vadd.f32 %v255_v39, %v254_v41  ;;  %v1063_v39 = vld [vmem:[%s907_s28 + $0xf8] sm:$0xff]  ;;  %s770_s28 = scalar_lea.vmem %s769_s27, 8192 }
  0x34   : > { %p772_p1 = scmp.lt.s32.totalorder %s770_s28, %s764_s25 }
  0x35   : > { %v258_v47 = vadd.f32 %v257_v42, %v256_v44  ;;  %v289_v42 = vsel %vm229_vm0, %v1058_v35, 0.0 }
  0x36   : > { %p773_p2 = por %p772_p1, %p771_p0 }
  0x37   : > { %v260_v50 = vadd.f32 %v259_v45, %v258_v47  ;;  %v291_v45 = vsel %vm229_vm0, %v1063_v39, 0.0 }
  0x38   : > { %p774_p3 = pnand %p773_p2, %p767_p13 }
  0x39   : > { %v262_v53 = vadd.f32 %v261_v48, %v260_v50 }
  0x3b   : > { %v264_v56 = vadd.f32 %v263_v51, %v262_v53 }
  0x3d   : > { %v266_v59 = vadd.f32 %v265_v54, %v264_v56 }
  0x3f   : > { %v268_v62 = vadd.f32 %v267_v57, %v266_v59 }
  0x41   : > { %v270_v5 = vadd.f32 %v269_v60, %v268_v62 }
  0x43   : > { %v272_v9 = vadd.f32 %v271_v63, %v270_v5 }
  0x45   : > { %v274_v14 = vadd.f32 %v273_v6, %v272_v9 }
  0x47   : > { %v276_v18 = vadd.f32 %v275_v11, %v274_v14 }
  0x49   : > { %v278_v23 = vadd.f32 %v277_v15, %v276_v18 }
  0x4b   : > { %v280_v27 = vadd.f32 %v279_v20, %v278_v23 }
  0x4d   : > { %v282_v32 = vadd.f32 %v281_v24, %v280_v27 }
  0x4f   : > { %v284_v36 = vadd.f32 %v283_v29, %v282_v32 }
  0x51   : > { %v286_v41 = vadd.f32 %v285_v33, %v284_v36 }
  0x53   : > { %v288_v44 = vadd.f32 %v287_v38, %v286_v41 }
  0x55   : > { %v290_v47 = vadd.f32 %v289_v42, %v288_v44 }
  0x57   : > { %v292_v48 = vadd.f32 %v291_v45, %v290_v47 }
  0x59   : > { %v293_v50 = vrot.slane %v292_v48, 4 }
  0x5b   : > { %v294_v51 = vadd.f32 %v293_v50, %v292_v48 }
  0x5d   : > { %v295_v53 = vrot.slane %v294_v51, 2 }
  0x5f   : > { %v296_v54 = vadd.f32 %v295_v53, %v294_v51 }
  0x61   : > { %v297_v56 = vrot.slane %v296_v54, 1 }
  0x63   : > { %v298_v57 = vadd.f32 %v297_v56, %v296_v54 }
  0x65   : > { %v1069_v59 = vmul.f32 0.00390625, %v298_v57 }
  0x67   : > { %v1073_v60 = vsub.f32 %v910_v0, %v1069_v59  ;;  %v1077_v62 = vsub.f32 %v913_v1, %v1069_v59  ;;  %v1081_v63 = vsub.f32 %v916_v2, %v1069_v59  ;;  %v1085_v5 = vsub.f32 %v919_v3, %v1069_v59 }
  0x68   : > { %v1089_v6 = vsub.f32 %v928_v7, %v1069_v59  ;;  %v1099_v2 = vsub.f32 %v933_v10, %v1069_v59  ;;  %v1105_v7 = vsub.f32 %v938_v13, %v1069_v59  ;;  %v1114_v10 = vsub.f32 %v943_v16, %v1069_v59 }
  0x69   : > { %v333_v0 = vmul.f32 %v1073_v60, %v1073_v60  ;;  %v334_v9 = vmul.f32 %v1077_v62, %v1077_v62  ;;  %v335_v1 = vmul.f32 %v1081_v63, %v1081_v63  ;;  %v336_v3 = vmul.f32 %v1085_v5, %v1085_v5 }
  0x6a   : > { %v337_v11 = vmul.f32 %v1089_v6, %v1089_v6  ;;  %v338_v23 = vmul.f32 %v1099_v2, %v1099_v2  ;;  %v1121_v27 = vsub.f32 %v948_v19, %v1069_v59  ;;  %v339_v29 = vmul.f32 %v1105_v7, %v1105_v7 }
  0x6b   : > { %v365_v14 = vsel %vm229_vm0, %v333_v0, 0.0  ;;  %v366_v15 = vsel %vm229_vm0, %v334_v9, 0.0  ;;  %v368_v18 = vsel %vm229_vm0, %v335_v1, 0.0  ;;  %v370_v13 = vsel %vm229_vm0, %v336_v3, 0.0 }
  0x6c   : > { %v367_v20 = vadd.f32 %v366_v15, %v365_v14  ;;  %v372_v32 = vsel %vm229_vm0, %v337_v11, 0.0  ;;  %v1128_v16 = vsub.f32 %v953_v22, %v1069_v59  ;;  %v340_v36 = vmul.f32 %v1114_v10, %v1114_v10 }
  0x6d   : > { %v374_v38 = vsel %vm229_vm0, %v338_v23, 0.0  ;;  %v1135_v19 = vsub.f32 %v958_v25, %v1069_v59  ;;  %v341_v42 = vmul.f32 %v1121_v27, %v1121_v27  ;;  %v376_v44 = vsel %vm229_vm0, %v339_v29, 0.0 }
  0x6e   : > { %v369_v24 = vadd.f32 %v368_v18, %v367_v20  ;;  %v1142_v22 = vsub.f32 %v963_v28, %v1069_v59  ;;  %v342_v47 = vmul.f32 %v1128_v16, %v1128_v16  ;;  %v378_v48 = vsel %vm229_vm0, %v340_v36, 0.0 }
  0x6f   : > { %v1149_v25 = vsub.f32 %v968_v31, %v1069_v59  ;;  %v343_v51 = vmul.f32 %v1135_v19, %v1135_v19  ;;  %v380_v53 = vsel %vm229_vm0, %v341_v42, 0.0  ;;  %v1156_v28 = vsub.f32 %v973_v34, %v1069_v59 }
  0x70   : > { %v371_v33 = vadd.f32 %v370_v13, %v369_v24  ;;  %v344_v56 = vmul.f32 %v1142_v22, %v1142_v22  ;;  %v382_v57 = vsel %vm229_vm0, %v342_v47, 0.0  ;;  %v1163_v31 = vsub.f32 %v978_v37, %v1069_v59 }
  0x71   : > { %v345_v9 = vmul.f32 %v1149_v25, %v1149_v25  ;;  %v384_v1 = vsel %vm229_vm0, %v343_v51, 0.0  ;;  %v1170_v34 = vsub.f32 %v983_v40, %v1069_v59  ;;  %v346_v11 = vmul.f32 %v1156_v28, %v1156_v28 }
  0x72   : > { %v373_v41 = vadd.f32 %v372_v32, %v371_v33  ;;  %v386_v14 = vsel %vm229_vm0, %v344_v56, 0.0  ;;  %v1177_v37 = vsub.f32 %v988_v43, %v1069_v59  ;;  %v347_v18 = vmul.f32 %v1163_v31, %v1163_v31 }
  0x73   : > { %v388_v20 = vsel %vm229_vm0, %v345_v9, 0.0  ;;  %v1184_v40 = vsub.f32 %v993_v46, %v1069_v59  ;;  %v348_v13 = vmul.f32 %v1170_v34, %v1170_v34  ;;  %v390_v24 = vsel %vm229_vm0, %v346_v11, 0.0 }
  0x74   : > { %v375_v45 = vadd.f32 %v374_v38, %v373_v41  ;;  %v1191_v43 = vsub.f32 %v998_v49, %v1069_v59  ;;  %v349_v32 = vmul.f32 %v1177_v37, %v1177_v37  ;;  %v392_v33 = vsel %vm229_vm0, %v347_v18, 0.0 }
  0x75   : > { %v1198_v46 = vsub.f32 %v1003_v52, %v1069_v59  ;;  %v350_v38 = vmul.f32 %v1184_v40, %v1184_v40  ;;  %v394_v41 = vsel %vm229_vm0, %v348_v13, 0.0  ;;  %v1205_v49 = vsub.f32 %v1008_v55, %v1069_v59 }
  0x76   : > { %v377_v50 = vadd.f32 %v376_v44, %v375_v45  ;;  %v351_v44 = vmul.f32 %v1191_v43, %v1191_v43  ;;  %v396_v45 = vsel %vm229_vm0, %v349_v32, 0.0  ;;  %v1212_v52 = vsub.f32 %v1013_v58, %v1069_v59 }
  0x77   : > { %v1219_v55 = vsub.f32 %v1018_v61, %v1069_v59  ;;  %v1226_v58 = vsub.f32 %v1023_v4, %v1069_v59  ;;  %v1233_v61 = vsub.f32 %v1028_v8, %v1069_v59  ;;  %v1240_v4 = vsub.f32 %v1033_v12, %v1069_v59 }
  0x78   : > { %v379_v54 = vadd.f32 %v378_v48, %v377_v50  ;;  %v352_v48 = vmul.f32 %v1198_v46, %v1198_v46  ;;  %v398_v50 = vsel %vm229_vm0, %v350_v38, 0.0  ;;  %v1247_v8 = vsub.f32 %v1038_v17, %v1069_v59 }
  0x79   : > { %v1254_v12 = vsub.f32 %v1043_v21, %v1069_v59  ;;  %v1261_v17 = vsub.f32 %v1048_v26, %v1069_v59  ;;  %v1268_v21 = vsub.f32 %v1053_v30, %v1069_v59  ;;  %v1275_v26 = vsub.f32 %v1058_v35, %v1069_v59 }
  0x7a   : > { %v381_v0 = vadd.f32 %v380_v53, %v379_v54  ;;  %v353_v53 = vmul.f32 %v1205_v49, %v1205_v49  ;;  %v400_v54 = vsel %vm229_vm0, %v351_v44, 0.0  ;;  %v1282_v30 = vsub.f32 %v1063_v39, %v1069_v59 }
  0x7b   : > { %v363_v35 = vmul.f32 %v1275_v26, %v1275_v26 }
  0x7c   : > { %v383_v3 = vadd.f32 %v382_v57, %v381_v0  ;;  %v354_v57 = vmul.f32 %v1212_v52, %v1212_v52  ;;  %v402_v0 = vsel %vm229_vm0, %v352_v48, 0.0 }
  0x7d   : > { %v424_v59 = vsel %vm229_vm0, %v363_v35, 0.0 }
  0x7e   : > { %v385_v15 = vadd.f32 %v384_v1, %v383_v3  ;;  %v355_v1 = vmul.f32 %v1219_v55, %v1219_v55  ;;  %v404_v3 = vsel %vm229_vm0, %v353_v53, 0.0 }
  0x80   : > { %v387_v23 = vadd.f32 %v386_v14, %v385_v15  ;;  %v356_v14 = vmul.f32 %v1226_v58, %v1226_v58  ;;  %v406_v15 = vsel %vm229_vm0, %v354_v57, 0.0  ;;  %v364_v57 = vmul.f32 %v1282_v30, %v1282_v30 }
  0x82   : > { %v389_v29 = vadd.f32 %v388_v20, %v387_v23  ;;  %v357_v20 = vmul.f32 %v1233_v61, %v1233_v61  ;;  %v408_v23 = vsel %vm229_vm0, %v355_v1, 0.0  ;;  %v426_v1 = vsel %vm229_vm0, %v364_v57, 0.0 }
  0x84   : > { %v391_v36 = vadd.f32 %v390_v24, %v389_v29  ;;  %v358_v24 = vmul.f32 %v1240_v4, %v1240_v4  ;;  %v410_v29 = vsel %vm229_vm0, %v356_v14, 0.0 }
  0x86   : > { %v393_v42 = vadd.f32 %v392_v33, %v391_v36  ;;  %v359_v33 = vmul.f32 %v1247_v8, %v1247_v8  ;;  %v412_v36 = vsel %vm229_vm0, %v357_v20, 0.0 }
  0x88   : > { %v395_v47 = vadd.f32 %v394_v41, %v393_v42  ;;  %v360_v41 = vmul.f32 %v1254_v12, %v1254_v12  ;;  %v414_v42 = vsel %vm229_vm0, %v358_v24, 0.0 }
  0x8a   : > { %v397_v51 = vadd.f32 %v396_v45, %v395_v47  ;;  %v361_v45 = vmul.f32 %v1261_v17, %v1261_v17  ;;  %v416_v47 = vsel %vm229_vm0, %v359_v33, 0.0 }
  0x8c   : > { %v399_v56 = vadd.f32 %v398_v50, %v397_v51  ;;  %v362_v50 = vmul.f32 %v1268_v21, %v1268_v21  ;;  %v418_v51 = vsel %vm229_vm0, %v360_v41, 0.0 }
  0x8e   : > { %v401_v9 = vadd.f32 %v400_v54, %v399_v56  ;;  %v420_v54 = vsel %vm229_vm0, %v361_v45, 0.0 }
  0x90   : > { %v403_v11 = vadd.f32 %v402_v0, %v401_v9  ;;  %v422_v0 = vsel %vm229_vm0, %v362_v50, 0.0 }
  0x92   : > { %v405_v18 = vadd.f32 %v404_v3, %v403_v11 }
  0x94   : > { %v407_v13 = vadd.f32 %v406_v15, %v405_v18 }
  0x96   : > { %v409_v32 = vadd.f32 %v408_v23, %v407_v13 }
  0x98   : > { %v411_v38 = vadd.f32 %v410_v29, %v409_v32  ;;  %v472_v29 = vlaneseq }
  0x9a   : > { %v413_v44 = vadd.f32 %v412_v36, %v411_v38  ;;  %v473_v33 = vshrl.u32 %v472_v29, 7  ;;  %v469_v36 = vld [vmem:[%s193_s4] sm:$0x1] }
  0x9b   : > { %v470_v38 = vadd.f32 1.0, %v469_v36 }
  0x9c   : > { %v415_v48 = vadd.f32 %v414_v42, %v413_v44  ;;  %v474_v41 = vsub.s32 0, %v473_v33 }
  0x9e   : > { %v417_v53 = vadd.f32 %v416_v47, %v415_v48  ;;  %v1303_v42 = vrot.slane %v470_v38, %v474_v41 }
  0xa0   : > { %v419_v56 = vadd.f32 %v418_v51, %v417_v53  ;;  %v1316_v51 = vld [vmem:[%s196_s7] ss:$0 sm:$0xff] }
  0xa2   : > { %v421_v39 = vadd.f32 %v420_v54, %v419_v56 }
  0xa4   : > { %v423_v9 = vadd.f32 %v422_v0, %v421_v39 }
  0xa6   : > { %v425_v3 = vadd.f32 %v424_v59, %v423_v9 }
  0xa8   : > { %v427_v11 = vadd.f32 %v426_v1, %v425_v3 }
  0xaa   : > { %v428_v14 = vrot.slane %v427_v11, 4 }
  0xac   : > { %v429_v15 = vadd.f32 %v428_v14, %v427_v11 }
  0xae   : > { %v430_v18 = vrot.slane %v429_v15, 2 }
  0xb0   : > { %v431_v20 = vadd.f32 %v430_v18, %v429_v15 }
  0xb2   : > { %v432_v23 = vrot.slane %v431_v20, 1 }
  0xb4   : > { %v433_v13 = vadd.f32 %v432_v23, %v431_v20 }
  0xb6   : > { %v434_v24 = vmul.f32 0.00390625, %v433_v13 }
  0xb8   : > { %v435_v32 = vadd.f32 1e-05, %v434_v24 }
  0xba   : > { %762 = vrsqrt.f32 %v435_v32 }
  0xc4   : > { %v1305_v44 = vpop.eup %762 }
  0xc5   : > { %v437_v45 = vmul.f32 %v1305_v44, %v1073_v60  ;;  %v438_v47 = vmul.f32 %v1305_v44, %v1077_v62  ;;  %v439_v48 = vmul.f32 %v1305_v44, %v1081_v63  ;;  %v440_v50 = vmul.f32 %v1305_v44, %v1085_v5 }
  0xc6   : > { %v441_v53 = vmul.f32 %v1305_v44, %v1089_v6  ;;  %v442_v35 = vmul.f32 %v1305_v44, %v1099_v2  ;;  %v443_v60 = vmul.f32 %v1305_v44, %v1105_v7  ;;  %v444_v62 = vmul.f32 %v1305_v44, %v1114_v10 }
  0xc7   : > { %v477_v63 = vmul.f32 %v1303_v42, %v437_v45  ;;  %v478_v5 = vmul.f32 %v1303_v42, %v438_v47  ;;  %v479_v54 = vmul.f32 %v1303_v42, %v439_v48  ;;  %v480_v56 = vmul.f32 %v1303_v42, %v440_v50 }
  0xc8   : > { %v481_v6 = vmul.f32 %v1303_v42, %v441_v53  ;;  %v482_v2 = vmul.f32 %v1303_v42, %v442_v35  ;;  %v483_v57 = vmul.f32 %v1303_v42, %v443_v60  ;;  %v484_v7 = vmul.f32 %v1303_v42, %v444_v62 }
  0xc9   : > { %v516_v10 = vadd.f32 %v1316_v51, %v477_v63  ;;  %v517_v0 = vadd.f32 %v1316_v51, %v478_v5  ;;  %v518_v39 = vadd.f32 %v1316_v51, %v479_v54  ;;  %v519_v59 = vadd.f32 %v1316_v51, %v480_v56 }
  0xca   : > { %v520_v9 = vadd.f32 %v1316_v51, %v481_v6  ;;  %v521_v1 = vadd.f32 %v1316_v51, %v482_v2  ;;  %v522_v3 = vadd.f32 %v1316_v51, %v483_v57  ;;  %v523_v11 = vadd.f32 %v1316_v51, %v484_v7 }
  0xcb   : > { %v548_v14 = vmax.f32 %v516_v10, 0.0  ;;  %v549_v15 = vmax.f32 %v517_v0, 0.0  ;;  %v550_v18 = vmax.f32 %v518_v39, 0.0  ;;  %v551_v20 = vmax.f32 %v519_v59, 0.0 }
  0xcc   : > { %v552_v23 = vmax.f32 %v520_v9, 0.0  ;;  %v553_v13 = vmax.f32 %v521_v1, 0.0  ;;  %v554_v24 = vmax.f32 %v522_v3, 0.0  ;;  %v555_v29 = vmax.f32 %v523_v11, 0.0 }
  0xcd   : > { %580 = vst.msk [vmem:[%s1344_s10] sm:$0xff] %vm229_vm0, %v548_v14  ;;  %581 = vst.msk [vmem:[%s1344_s10 + $0x8] sm:$0xff] %vm229_vm0, %v549_v15  ;;  %v445_v32 = vmul.f32 %v1305_v44, %v1121_v27  ;;  %v446_v33 = vmul.f32 %v1305_v44, %v1128_v16  ;;  %v447_v36 = vmul.f32 %v1305_v44, %v1135_v19 }
  0xce   : > { %582 = vst.msk [vmem:[%s1344_s10 + $0x10] sm:$0xff] %vm229_vm0, %v550_v18  ;;  %583 = vst.msk [vmem:[%s1344_s10 + $0x18] sm:$0xff] %vm229_vm0, %v551_v20  ;;  %v448_v38 = vmul.f32 %v1305_v44, %v1142_v22  ;;  %v449_v27 = vmul.f32 %v1305_v44, %v1149_v25  ;;  %v450_v16 = vmul.f32 %v1305_v44, %v1156_v28 }
  0xcf   : > { %584 = vst.msk [vmem:[%s1344_s10 + $0x20] sm:$0xff] %vm229_vm0, %v552_v23  ;;  %585 = vst.msk [vmem:[%s1344_s10 + $0x28] sm:$0xff] %vm229_vm0, %v553_v13  ;;  %v451_v19 = vmul.f32 %v1305_v44, %v1163_v31  ;;  %v452_v22 = vmul.f32 %v1305_v44, %v1170_v34  ;;  %v485_v41 = vmul.f32 %v1303_v42, %v445_v32 }
  0xd0   : > { %586 = vst.msk [vmem:[%s1344_s10 + $0x30] sm:$0xff] %vm229_vm0, %v554_v24  ;;  %587 = vst.msk [vmem:[%s1344_s10 + $0x38] sm:$0xff] %vm229_vm0, %v555_v29  ;;  %v486_v45 = vmul.f32 %v1303_v42, %v446_v33  ;;  %v487_v47 = vmul.f32 %v1303_v42, %v447_v36  ;;  %v488_v48 = vmul.f32 %v1303_v42, %v448_v38 }
  0xd1   : > { %v489_v50 = vmul.f32 %v1303_v42, %v449_v27  ;;  %v490_v25 = vmul.f32 %v1303_v42, %v450_v16  ;;  %v491_v28 = vmul.f32 %v1303_v42, %v451_v19  ;;  %v492_v53 = vmul.f32 %v1303_v42, %v452_v22 }
  0xd2   : > { %v524_v31 = vadd.f32 %v1316_v51, %v485_v41  ;;  %v525_v34 = vadd.f32 %v1316_v51, %v486_v45  ;;  %v526_v35 = vadd.f32 %v1316_v51, %v487_v47  ;;  %v527_v60 = vadd.f32 %v1316_v51, %v488_v48 }
  0xd3   : > { %v528_v62 = vadd.f32 %v1316_v51, %v489_v50  ;;  %v529_v63 = vadd.f32 %v1316_v51, %v490_v25  ;;  %v530_v5 = vadd.f32 %v1316_v51, %v491_v28  ;;  %v531_v54 = vadd.f32 %v1316_v51, %v492_v53 }
  0xd4   : > { %v556_v56 = vmax.f32 %v524_v31, 0.0  ;;  %v557_v6 = vmax.f32 %v525_v34, 0.0  ;;  %v558_v2 = vmax.f32 %v526_v35, 0.0  ;;  %v559_v57 = vmax.f32 %v527_v60, 0.0 }
  0xd5   : > { %v560_v7 = vmax.f32 %v528_v62, 0.0  ;;  %v561_v10 = vmax.f32 %v529_v63, 0.0  ;;  %v562_v0 = vmax.f32 %v530_v5, 0.0  ;;  %v563_v39 = vmax.f32 %v531_v54, 0.0 }
  0xd6   : > { %588 = vst.msk [vmem:[%s1344_s10 + $0x40] sm:$0xff] %vm229_vm0, %v556_v56  ;;  %589 = vst.msk [vmem:[%s1344_s10 + $0x48] sm:$0xff] %vm229_vm0, %v557_v6  ;;  %v453_v59 = vmul.f32 %v1305_v44, %v1177_v37  ;;  %v454_v9 = vmul.f32 %v1305_v44, %v1184_v40  ;;  %v455_v1 = vmul.f32 %v1305_v44, %v1191_v43 }
  0xd7   : > { %590 = vst.msk [vmem:[%s1344_s10 + $0x50] sm:$0xff] %vm229_vm0, %v558_v2  ;;  %591 = vst.msk [vmem:[%s1344_s10 + $0x58] sm:$0xff] %vm229_vm0, %v559_v57  ;;  %v456_v3 = vmul.f32 %v1305_v44, %v1198_v46  ;;  %v457_v37 = vmul.f32 %v1305_v44, %v1205_v49  ;;  %v458_v40 = vmul.f32 %v1305_v44, %v1212_v52 }
  0xd8   : > { %592 = vst.msk [vmem:[%s1344_s10 + $0x60] sm:$0xff] %vm229_vm0, %v560_v7  ;;  %593 = vst.msk [vmem:[%s1344_s10 + $0x68] sm:$0xff] %vm229_vm0, %v561_v10  ;;  %v459_v43 = vmul.f32 %v1305_v44, %v1219_v55  ;;  %v460_v46 = vmul.f32 %v1305_v44, %v1226_v58  ;;  %v493_v11 = vmul.f32 %v1303_v42, %v453_v59 }
  0xd9   : > { %594 = vst.msk [vmem:[%s1344_s10 + $0x70] sm:$0xff] %vm229_vm0, %v562_v0  ;;  %595 = vst.msk [vmem:[%s1344_s10 + $0x78] sm:$0xff] %vm229_vm0, %v563_v39  ;;  %v494_v14 = vmul.f32 %v1303_v42, %v454_v9  ;;  %v495_v15 = vmul.f32 %v1303_v42, %v455_v1  ;;  %v496_v18 = vmul.f32 %v1303_v42, %v456_v3 }
  0xda   : > { %v497_v20 = vmul.f32 %v1303_v42, %v457_v37  ;;  %v498_v49 = vmul.f32 %v1303_v42, %v458_v40  ;;  %v499_v52 = vmul.f32 %v1303_v42, %v459_v43  ;;  %v500_v23 = vmul.f32 %v1303_v42, %v460_v46 }
  0xdb   : > { %v532_v55 = vadd.f32 %v1316_v51, %v493_v11  ;;  %v533_v58 = vadd.f32 %v1316_v51, %v494_v14  ;;  %v534_v13 = vadd.f32 %v1316_v51, %v495_v15  ;;  %v535_v24 = vadd.f32 %v1316_v51, %v496_v18 }
  0xdc   : > { %v536_v29 = vadd.f32 %v1316_v51, %v497_v20  ;;  %v537_v32 = vadd.f32 %v1316_v51, %v498_v49  ;;  %v538_v33 = vadd.f32 %v1316_v51, %v499_v52  ;;  %v539_v36 = vadd.f32 %v1316_v51, %v500_v23 }
  0xdd   : > { %v564_v38 = vmax.f32 %v532_v55, 0.0  ;;  %v565_v27 = vmax.f32 %v533_v58, 0.0  ;;  %v566_v16 = vmax.f32 %v534_v13, 0.0  ;;  %v567_v19 = vmax.f32 %v535_v24, 0.0 }
  0xde   : > { %v568_v22 = vmax.f32 %v536_v29, 0.0  ;;  %v569_v41 = vmax.f32 %v537_v32, 0.0  ;;  %v570_v45 = vmax.f32 %v538_v33, 0.0  ;;  %v571_v47 = vmax.f32 %v539_v36, 0.0 }
  0xdf   : > { %596 = vst.msk [vmem:[%s1344_s10 + $0x80] sm:$0xff] %vm229_vm0, %v564_v38  ;;  %597 = vst.msk [vmem:[%s1344_s10 + $0x88] sm:$0xff] %vm229_vm0, %v565_v27  ;;  %v461_v48 = vmul.f32 %v1305_v44, %v1233_v61  ;;  %v462_v50 = vmul.f32 %v1305_v44, %v1240_v4  ;;  %v463_v25 = vmul.f32 %v1305_v44, %v1247_v8 }
  0xe0   : > { %598 = vst.msk [vmem:[%s1344_s10 + $0x90] sm:$0xff] %vm229_vm0, %v566_v16  ;;  %599 = vst.msk [vmem:[%s1344_s10 + $0x98] sm:$0xff] %vm229_vm0, %v567_v19  ;;  %v464_v28 = vmul.f32 %v1305_v44, %v1254_v12  ;;  %v465_v61 = vmul.f32 %v1305_v44, %v1261_v17  ;;  %v466_v4 = vmul.f32 %v1305_v44, %v1268_v21 }
  0xe1   : > { %600 = vst.msk [vmem:[%s1344_s10 + $0xa0] sm:$0xff] %vm229_vm0, %v568_v22  ;;  %601 = vst.msk [vmem:[%s1344_s10 + $0xa8] sm:$0xff] %vm229_vm0, %v569_v41  ;;  %v467_v8 = vmul.f32 %v1305_v44, %v1275_v26  ;;  %v468_v12 = vmul.f32 %v1305_v44, %v1282_v30  ;;  %v501_v53 = vmul.f32 %v1303_v42, %v461_v48 }
  0xe2   : > { %602 = vst.msk [vmem:[%s1344_s10 + $0xb0] sm:$0xff] %vm229_vm0, %v570_v45  ;;  %603 = vst.msk [vmem:[%s1344_s10 + $0xb8] sm:$0xff] %vm229_vm0, %v571_v47  ;;  %v502_v31 = vmul.f32 %v1303_v42, %v462_v50  ;;  %v503_v34 = vmul.f32 %v1303_v42, %v463_v25  ;;  %v504_v35 = vmul.f32 %v1303_v42, %v464_v28 }
  0xe3   : > { %v505_v60 = vmul.f32 %v1303_v42, %v465_v61  ;;  %v506_v17 = vmul.f32 %v1303_v42, %v466_v4  ;;  %v507_v21 = vmul.f32 %v1303_v42, %v467_v8  ;;  %v508_v62 = vmul.f32 %v1303_v42, %v468_v12 }
  0xe4   : > { %v540_v26 = vadd.f32 %v1316_v51, %v501_v53  ;;  %v541_v30 = vadd.f32 %v1316_v51, %v502_v31  ;;  %v542_v44 = vadd.f32 %v1316_v51, %v503_v34  ;;  %v543_v63 = vadd.f32 %v1316_v51, %v504_v35 }
  0xe5   : > { %v544_v5 = vadd.f32 %v1316_v51, %v505_v60  ;;  %v545_v54 = vadd.f32 %v1316_v51, %v506_v17  ;;  %v546_v42 = vadd.f32 %v1316_v51, %v507_v21  ;;  %v547_v56 = vadd.f32 %v1316_v51, %v508_v62 }
  0xe6   : > { %v572_v6 = vmax.f32 %v540_v26, 0.0  ;;  %v573_v2 = vmax.f32 %v541_v30, 0.0  ;;  %v574_v57 = vmax.f32 %v542_v44, 0.0  ;;  %v575_v7 = vmax.f32 %v543_v63, 0.0 }
  0xe7   : > { %v576_v10 = vmax.f32 %v544_v5, 0.0  ;;  %v577_v51 = vmax.f32 %v545_v54, 0.0  ;;  %v578_v0 = vmax.f32 %v546_v42, 0.0  ;;  %v579_v39 = vmax.f32 %v547_v56, 0.0 }
  0xe8   : > { %604 = vst.msk [vmem:[%s1344_s10 + $0xc0] sm:$0xff] %vm229_vm0, %v572_v6  ;;  %605 = vst.msk [vmem:[%s1344_s10 + $0xc8] sm:$0xff] %vm229_vm0, %v573_v2 }
  0xe9   : > { %606 = vst.msk [vmem:[%s1344_s10 + $0xd0] sm:$0xff] %vm229_vm0, %v574_v57  ;;  %607 = vst.msk [vmem:[%s1344_s10 + $0xd8] sm:$0xff] %vm229_vm0, %v575_v7 }
  0xea   : > { %608 = vst.msk [vmem:[%s1344_s10 + $0xe0] sm:$0xff] %vm229_vm0, %v576_v10  ;;  %609 = vst.msk [vmem:[%s1344_s10 + $0xe8] sm:$0xff] %vm229_vm0, %v577_v51 }
  0xeb   : > { %610 = vst.msk [vmem:[%s1344_s10 + $0xf0] sm:$0xff] %vm229_vm0, %v578_v0  ;;  %611 = vst.msk [vmem:[%s1344_s10 + $0xf8] sm:$0xff] %vm229_vm0, %v579_v39 }
  0xec   : > { %777 = shalt.err (!%p774_p3)
}
  0xed   : > { %s778_s29 = scalar_lea.hbm %s1495_s20, 4096  ;;  %s782_s5 = scalar_lea.hbm %s1561_s3, 8192 }
  0xee   : > { %p779_p4 = scmp.ne.s32.totalorder %s1495_s20, %s778_s29  ;;  %p783_p9 = scmp.lt.u32.totalorder %s1495_s20, %s1561_s3 }
  0xef   : > { %p784_p10 = scmp.lt.u32.totalorder %s782_s5, %s778_s29  ;;  %p786_p12 = scmp.lt.u32.totalorder %s778_s29, %s1495_s20 }
  0xf0   : > { %p780_p7 = pnand %p779_p4, %p889_p5 }
  0xf1   : > { %p785_p11 = por %p784_p10, %p783_p9 }
  0xf2   : > { %p781_p8 = pneg %p780_p7 }
  0xf3   : > { %p787_p13 = por %p786_p12, %p785_p11 }
  0xf5   : > { %p788_p0 = pnand %p787_p13, %p781_p8 }
  0xf7   : > { %791 = shalt.err (!%p788_p0)
}
  0xf8   : > { %s829_s8 = smov 128   ;;  %s830_s9 = smov 8  }
  0xf9   : > { %721 = dma.vmem_to_hbm [thread:$0]  (%p889_p5), %s1497_s17, 4096, %s1495_s20, %s1517_s24, %s829_s8, %s829_s8, %s830_s9  }
  0xfa PF: > { %p727_p1 = scmp.ge.s32.totalorder %s826_s15, 2  ;;  %s641_s10 = sand.u32 1, %s814_s12  }
  0xfb   : > { %s642_s11 = scalar_lea.sflag [#allocation3], %s641_s10 }
  0xfc   : > { %p724_p2 = pnand %p727_p1, %p893_p6 }
  0xfe   : > { %809 = dma.done.wait (!%p724_p2), %s642_s11, 4096  }
  0xff   : > { %811 = vsyncadd (!%p724_p2), %s642_s11, 4294963200  ;;  %p13_p3 = scmp.ge.s32.totalorder %s876_s18, 4   ;;  %s1564_s12 = smov %s818_s13 }
 0x100   : > { %s1565_s13 = smov %s822_s14  ;;  %s1566_s14 = smov %s887_s21 }
 0x101   : > { %s1567_s15 = smov %s876_s18  ;;  %15 = sbr.rel (!%p13_p3) target bundleno = 3 (0x3), region = 73 }
 0x108   :  { %647 = vsyncpa [#allocation3], 1 }
 0x109   :  { %649 = vsyncpa [#allocation3 + $0x1], 1 }

// kernel: forward.9
= control target key start
LH: loop header
LB: loop body
LE: loop exit
PB: predicated region body
PF: predicated region fallthrough
CT: control target
= control target key end

     0   :  { %s1997_s15 = smov 0   ;;  %s1999_s16 = smov 0   ;;  %s2294_s0 = inlined_call_operand.vmem [shape: bf16[512,384], index: 0, kind: input, shape index: {}]   ;;  %s2295_s1 = inlined_call_operand.vmem [shape: bf16[384,128], index: 1, kind: input, shape index: {}]   ;;  %s2296_s2 = inlined_call_operand.vmem [shape: f32[1,128], index: 2, kind: input, shape index: {}]   ;;  %s2297_s3 = inlined_call_operand.vmem [shape: f32[1,128], index: 3, kind: input, shape index: {}]   ;;  %s2298_s4 = inlined_call_operand.vmem [shape: f32[512,128], index: 4, kind: output, shape index: {}]  }
   0x1   :  { %s2001_s17 = smov 0  }
   0x2 LB: > { %s33_s18 = sadd.s32 1, %s1966_s16  ;;  %p1553_p0 = scmp.ge.s32.totalorder %s1970_s17, 1  ;;  %s1970_s17 = sphi %s2001_s17, %s14_s17   ;;  %s1966_s16 = sphi %s1999_s16, %s2300_s16   ;;  %s1962_s15 = sphi %s1997_s15, %s2299_s15  }
   0x3   : > { %p35_p1 = scmp.ge.s32.totalorder %s33_s18, 2  ;;  %p224_p2 = scmp.lt.s32.totalorder %s1970_s17, 3 }
   0x5   : > { %s2302_s18 = smov (%p35_p1, %s33_s18), 0  ;;  %p225_p3 = pnand %p1553_p0, %p224_p2 }
   0x6   : > { %v1860_v0 = vld [vmem:[%s2295_s1 + $0x40] sm:$0xff] (!%p225_p3)   ;;  %s1554_s21 = sshll.u32 (!%p225_p3), %s1962_s15, 5  ;;  %v1862_v2 = vld [vmem:[%s2295_s1 + $0x48] sm:$0xff] (!%p225_p3)   ;;  %v1864_v4 = vld [vmem:[%s2295_s1 + $0x50] sm:$0xff] (!%p225_p3)  }
   0x7   : > { %228 = sbr.rel (%p225_p3) target bundleno = 351 (0x15f), region = 36  ;;  %v1861_v1 = vld [vmem:[%s2295_s1] sm:$0xff] (!%p225_p3)   ;;  %1634 = vmatprep.subr.bf16.mxu0 (!%p225_p3), %v1860_v0  ;;  %1818 = vmatprep.subr.bf16.mxu1 (!%p225_p3), %v1860_v0  ;;  %p274_p4 = scmp.lt.s32.totalorder (!%p225_p3), %s1554_s21, 63  ;;  %v1863_v3 = vld [vmem:[%s2295_s1 + $0x8] sm:$0xff] (!%p225_p3)   ;;  %v1865_v5 = vld [vmem:[%s2295_s1 + $0x10] sm:$0xff] (!%p225_p3)  }
   0x8   : > { %1635 = vmatpush3.bf16.msra.mxu0 (!%p225_p3), %v1861_v1  ;;  %1826 = vmatpush3.bf16.msra.mxu1 (!%p225_p3), %v1861_v1  ;;  %v1866_v6 = vld [vmem:[%s2295_s1 + $0x58] sm:$0xff] (!%p225_p3)   ;;  %v1868_v8 = vld [vmem:[%s2295_s1 + $0x60] sm:$0xff] (!%p225_p3)   ;;  %v1870_v10 = vld [vmem:[%s2295_s1 + $0x68] sm:$0xff] (!%p225_p3)  }
   0x9   : > { %1636 = vmatprep.subr.bf16.mxu0 (!%p225_p3), %v1862_v2  ;;  %1819 = vmatprep.subr.bf16.mxu1 (!%p225_p3), %v1862_v2  ;;  %v1867_v7 = vld [vmem:[%s2295_s1 + $0x18] sm:$0xff] (!%p225_p3)   ;;  %v1869_v9 = vld [vmem:[%s2295_s1 + $0x20] sm:$0xff] (!%p225_p3)   ;;  %v1871_v13 = vld [vmem:[%s2295_s1 + $0x28] sm:$0xff] (!%p225_p3)  }
   0xa   : > { %v1872_v14 = vld [vmem:[%s2295_s1 + $0x70] sm:$0xff] (!%p225_p3)   ;;  %v1874_v16 = vld [vmem:[%s2295_s1 + $0x78] sm:$0xff] (!%p225_p3)   ;;  %v1882_v18 = vld [vmem:[%s2295_s1 + $0x80] sm:$0xff] (!%p225_p3)  }
   0xb   : > { %v1873_v15 = vld [vmem:[%s2295_s1 + $0x30] sm:$0xff] (!%p225_p3)   ;;  %v1875_v17 = vld [vmem:[%s2295_s1 + $0x38] sm:$0xff] (!%p225_p3)   ;;  %v1883_v22 = vld [vmem:[%s2295_s1 + $0x88] sm:$0xff] (!%p225_p3)  }
   0xc   : > { %1637 = vmatpush3.bf16.msra.mxu0 (!%p225_p3), %v1863_v3  ;;  %1827 = vmatpush3.bf16.msra.mxu1 (!%p225_p3), %v1863_v3  ;;  %v1890_v25 = vld [vmem:[%s2295_s1 + $0x90] sm:$0xff] (!%p225_p3)   ;;  %v1891_v27 = vld [vmem:[%s2295_s1 + $0x98] sm:$0xff] (!%p225_p3)   ;;  %v1898_v30 = vld [vmem:[%s2295_s1 + $0xa0] sm:$0xff] (!%p225_p3)  }
   0xd   : > { %1638 = vmatprep.subr.bf16.mxu0 (!%p225_p3), %v1864_v4  ;;  %1820 = vmatprep.subr.bf16.mxu1 (!%p225_p3), %v1864_v4  ;;  %v1899_v33 = vld [vmem:[%s2295_s1 + $0xa8] sm:$0xff] (!%p225_p3)   ;;  %v1906_v36 = vld [vmem:[%s2295_s1 + $0xb0] sm:$0xff] (!%p225_p3)   ;;  %v1907_v40 = vld [vmem:[%s2295_s1 + $0xb8] sm:$0xff] (!%p225_p3)  }
   0xe   : > { %s2304_s21 = smov (!%p274_p4, %s1554_s21), 63 }
   0xf   : > { %s1834_s8 = smul.u32 12, %s2304_s21  ;;  %s1557_s30 = sshll.u32 %s2304_s21, 3 }
  0x10   : > { %1639 = vmatpush3.bf16.msra.mxu0 %v1865_v5  ;;  %1828 = vmatpush3.bf16.msra.mxu1 %v1865_v5  ;;  %s2174_s9 = scalar_lea.vmem %s2298_s4, %s1557_s30 }
  0x11   : > { %1640 = vmatprep.subr.bf16.mxu0 %v1866_v6  ;;  %1821 = vmatprep.subr.bf16.mxu1 %v1866_v6  ;;  %s2048_s15 = scalar_lea.vmem %s2294_s0, %s1834_s8 }
  0x12   : > { %v1878_v11 = vld [vmem:[%s2048_s15 + $0x4] ss:$12 sps:$4 sm:$0xff]   ;;  %v1876_v19 = vld [vmem:[%s2048_s15] ss:$12 sps:$4 sm:$0xff]   ;;  %v1884_v21 = vld [vmem:[%s2048_s15 + $0x1c] ss:$12 sps:$4 sm:$0xff]  }
  0x13   : > { %v1881_v12 = vld [vmem:[%s2048_s15 + $0x124] ss:$12 sps:$4 sm:$0xff]   ;;  %921 = vmatprep.mubr.bf16.mxu0 %v1878_v11  ;;  %v1879_v20 = vld [vmem:[%s2048_s15 + $0x120] ss:$12 sps:$4 sm:$0xff]   ;;  %v1886_v23 = vld [vmem:[%s2048_s15 + $0x13c] ss:$12 sps:$4 sm:$0xff]  }
  0x14   : > { %1641 = vmatpush3.bf16.msra.mxu0 %v1867_v7  ;;  %1829 = vmatpush3.bf16.msra.mxu1 %v1867_v7  ;;  %v1888_v24 = vld [vmem:[%s2048_s15 + $0x18] ss:$12 sps:$4 sm:$0xff]   ;;  %v1892_v28 = vld [vmem:[%s2048_s15 + $0x34] ss:$12 sps:$4 sm:$0xff]   ;;  %v1896_v31 = vld [vmem:[%s2048_s15 + $0x30] ss:$12 sps:$4 sm:$0xff]  }
  0x15   : > { %1642 = vmatprep.subr.bf16.mxu0 %v1868_v8  ;;  %1822 = vmatprep.subr.bf16.mxu1 %v1868_v8  ;;  %v1889_v26 = vld [vmem:[%s2048_s15 + $0x138] ss:$12 sps:$4 sm:$0xff]   ;;  %v1894_v29 = vld [vmem:[%s2048_s15 + $0x154] ss:$12 sps:$4 sm:$0xff]   ;;  %v1897_v32 = vld [vmem:[%s2048_s15 + $0x150] ss:$12 sps:$4 sm:$0xff]  }
  0x16   : > { %1017 = vmatprep.mubr.bf16.mxu1 %v1881_v12  ;;  %v1900_v34 = vld [vmem:[%s2048_s15 + $0x4c] ss:$12 sps:$4 sm:$0xff]   ;;  %v1904_v37 = vld [vmem:[%s2048_s15 + $0x48] ss:$12 sps:$4 sm:$0xff]   ;;  %v1908_v39 = vld [vmem:[%s2048_s15 + $0x64] ss:$12 sps:$4 sm:$0xff]  }
  0x17   : > { %v1902_v35 = vld [vmem:[%s2048_s15 + $0x16c] ss:$12 sps:$4 sm:$0xff]   ;;  %v1905_v38 = vld [vmem:[%s2048_s15 + $0x168] ss:$12 sps:$4 sm:$0xff]   ;;  %v1917_v47 = vld [vmem:[%s2048_s15 + $0x50] ss:$12 sps:$4 sm:$0xff]  }
  0x18   : > { %1643 = vmatpush3.bf16.msra.mxu0 %v1869_v9  ;;  %1830 = vmatpush3.bf16.msra.mxu1 %v1869_v9  ;;  %v1910_v41 = vld [vmem:[%s2048_s15 + $0x8] ss:$12 sps:$4 sm:$0xff]   ;;  %v1911_v42 = vld [vmem:[%s2048_s15 + $0x60] ss:$12 sps:$4 sm:$0xff]   ;;  %v1915_v45 = vld [vmem:[%s2048_s15 + $0x38] ss:$12 sps:$4 sm:$0xff]  }
  0x19   : > { %1644 = vmatprep.subr.bf16.mxu0 %v1870_v10  ;;  %1823 = vmatprep.subr.bf16.mxu1 %v1870_v10  ;;  %v1912_v43 = vld [vmem:[%s2048_s15 + $0x20] ss:$12 sps:$4 sm:$0xff]   ;;  %v1913_v44 = vld [vmem:[%s2048_s15 + $0x7c] ss:$12 sps:$4 sm:$0xff]   ;;  %v1916_v46 = vld [vmem:[%s2048_s15 + $0x78] ss:$12 sps:$4 sm:$0xff]  }
  0x1a   : > { %v1918_v48 = vld [vmem:[%s2048_s15 + $0x94] ss:$12 sps:$4 sm:$0xff]   ;;  %v1921_v50 = vld [vmem:[%s2048_s15 + $0x90] ss:$12 sps:$4 sm:$0xff]   ;;  %v1923_v52 = vld [vmem:[%s2048_s15 + $0xac] ss:$12 sps:$4 sm:$0xff]  }
  0x1b   : > { %v1920_v49 = vld [vmem:[%s2048_s15 + $0x68] ss:$12 sps:$4 sm:$0xff]   ;;  %v1922_v51 = vld [vmem:[%s2048_s15 + $0x80] ss:$12 sps:$4 sm:$0xff]   ;;  %v1925_v53 = vld [vmem:[%s2048_s15 + $0x98] ss:$12 sps:$4 sm:$0xff]  }
  0x1c   : > { %1645 = vmatpush3.bf16.msra.mxu0 %v1871_v13  ;;  %1831 = vmatpush3.bf16.msra.mxu1 %v1871_v13  ;;  %v1926_v54 = vld [vmem:[%s2048_s15 + $0xa8] ss:$12 sps:$4 sm:$0xff]   ;;  %v1927_v55 = vld [vmem:[%s2048_s15 + $0xb0] ss:$12 sps:$4 sm:$0xff]   ;;  %v1931_v58 = vld [vmem:[%s2048_s15 + $0xc0] ss:$12 sps:$4 sm:$0xff]  }
  0x1d   : > { %1646 = vmatprep.subr.bf16.mxu0 %v1872_v14  ;;  %1824 = vmatprep.subr.bf16.mxu1 %v1872_v14  ;;  %v1928_v56 = vld [vmem:[%s2048_s15 + $0xc4] ss:$12 sps:$4 sm:$0xff]   ;;  %v1930_v57 = vld [vmem:[%s2048_s15 + $0xc8] ss:$12 sps:$4 sm:$0xff]   ;;  %v1932_v59 = vld [vmem:[%s2048_s15 + $0xe0] ss:$12 sps:$4 sm:$0xff]  }
  0x1e   : > { %v1933_v60 = vld [vmem:[%s2048_s15 + $0xdc] ss:$12 sps:$4 sm:$0xff]   ;;  %v1935_v61 = vld [vmem:[%s2048_s15 + $0xf8] ss:$12 sps:$4 sm:$0xff]   ;;  %v1938_v0 = vld [vmem:[%s2048_s15 + $0xf4] ss:$12 sps:$4 sm:$0xff]  }
  0x1f   : > { %v1936_v62 = vld [vmem:[%s2048_s15 + $0xd8] ss:$12 sps:$4 sm:$0xff]   ;;  %v1937_v63 = vld [vmem:[%s2048_s15 + $0x110] ss:$12 sps:$4 sm:$0xff]   ;;  %v1940_v1 = vld [vmem:[%s2048_s15 + $0x128] ss:$12 sps:$4 sm:$0xff]  }
  0x20   : > { %1647 = vmatpush3.bf16.msra.mxu0 %v1873_v15  ;;  %1832 = vmatpush3.bf16.msra.mxu1 %v1873_v15  ;;  %v1941_v2 = vld [vmem:[%s2048_s15 + $0xf0] ss:$12 sps:$4 sm:$0xff]   ;;  %v1942_v3 = vld [vmem:[%s2048_s15 + $0x140] ss:$12 sps:$4 sm:$0xff]   ;;  %v1945_v5 = vld [vmem:[%s2048_s15 + $0x158] ss:$12 sps:$4 sm:$0xff]  }
  0x21   : > { %1648 = vmatprep.subr.bf16.mxu0 %v1874_v16  ;;  %1825 = vmatprep.subr.bf16.mxu1 %v1874_v16  ;;  %v1943_v4 = vld [vmem:[%s2048_s15 + $0x10c] ss:$12 sps:$4 sm:$0xff]   ;;  %v1946_v6 = vld [vmem:[%s2048_s15 + $0x108] ss:$12 sps:$4 sm:$0xff]   ;;  %v1947_v7 = vld [vmem:[%s2048_s15 + $0x170] ss:$12 sps:$4 sm:$0xff]  }
  0x24   : > { %1649 = vmatpush3.bf16.msra.mxu0 %v1875_v17  ;;  %1833 = vmatpush3.bf16.msra.mxu1 %v1875_v17 }
  0x25   : > { %1770 = vmatprep.subr.bf16.mxu1 %v1882_v18 }
  0x27   : > { %922 = vmatmul.mubr.bf16.vlgmr.msra.gmra.mrb[0].mxu0 %v1876_v19  ;;  %1018 = vmatmul.mubr.bf16.vlgmr.msra.gmra.mrb[0].mxu1 %v1879_v20 }
  0x28   : > { %1771 = vmatpush3.bf16.msra.mxu1 %v1882_v18  ;;  %929 = vmatprep.mubr.bf16.mxu0 %v1884_v21 }
  0x29   : > { %1772 = vmatprep.subr.bf16.mxu1 %v1883_v22  ;;  %1025 = vmatprep.mubr.bf16.mxu1 %v1886_v23 }
  0x2c   : > { %1773 = vmatpush3.bf16.msra.mxu1 %v1883_v22 }
  0x2d   : > { %1774 = vmatprep.subr.bf16.mxu1 %v1890_v25 }
  0x2f   : > { %930 = vmatmul.mubr.bf16.gmra.mrb[4].mxu0 %v1888_v24  ;;  %1026 = vmatmul.mubr.bf16.gmra.mrb[4].mxu1 %v1889_v26 }
  0x30   : > { %1775 = vmatpush3.bf16.msra.mxu1 %v1890_v25  ;;  %937 = vmatprep.mubr.bf16.mxu0 %v1892_v28 }
  0x31   : > { %1776 = vmatprep.subr.bf16.mxu1 %v1891_v27  ;;  %1033 = vmatprep.mubr.bf16.mxu1 %v1894_v29 }
  0x34   : > { %1777 = vmatpush3.bf16.msra.mxu1 %v1891_v27 }
  0x35   : > { %1778 = vmatprep.subr.bf16.mxu1 %v1898_v30 }
  0x37   : > { %938 = vmatmul.mubr.bf16.gmra.mrb[8].mxu0 %v1896_v31  ;;  %1034 = vmatmul.mubr.bf16.gmra.mrb[8].mxu1 %v1897_v32 }
  0x38   : > { %1779 = vmatpush3.bf16.msra.mxu1 %v1898_v30  ;;  %945 = vmatprep.mubr.bf16.mxu0 %v1900_v34 }
  0x39   : > { %1780 = vmatprep.subr.bf16.mxu1 %v1899_v33  ;;  %1041 = vmatprep.mubr.bf16.mxu1 %v1902_v35 }
  0x3c   : > { %1781 = vmatpush3.bf16.msra.mxu1 %v1899_v33 }
  0x3d   : > { %1782 = vmatprep.subr.bf16.mxu1 %v1906_v36 }
  0x3f   : > { %946 = vmatmul.mubr.bf16.gmra.mrb[12].mxu0 %v1904_v37  ;;  %1042 = vmatmul.mubr.bf16.gmra.mrb[12].mxu1 %v1905_v38 }
  0x40   : > { %1783 = vmatpush3.bf16.msra.mxu1 %v1906_v36  ;;  %953 = vmatprep.mubr.bf16.mxu0 %v1908_v39 }
  0x41   : > { %1784 = vmatprep.subr.bf16.mxu1 %v1907_v40  ;;  %1786 = vmatprep.mubr.bf16.mxu1 %v1910_v41 }
  0x44   : > { %1785 = vmatpush3.bf16.msra.mxu1 %v1907_v40 }
  0x47   : > { %954 = vmatmul.mubr.bf16.gmra.mrb[16].mxu0 %v1911_v42  ;;  %1787 = vmatmul.mubr.bf16.vlgmr.msra.gmra.mrb[16].mxu1 %v1912_v43 }
  0x48   : > { %961 = vmatprep.mubr.bf16.mxu0 %v1913_v44  ;;  %1790 = vmatprep.mubr.bf16.mxu1 %v1915_v45 }
  0x4f   : > { %962 = vmatmul.mubr.bf16.gmra.mrb[20].mxu0 %v1916_v46  ;;  %1791 = vmatmul.mubr.bf16.gmra.mrb[20].mxu1 %v1917_v47 }
  0x50   : > { %969 = vmatprep.mubr.bf16.mxu0 %v1918_v48  ;;  %1794 = vmatprep.mubr.bf16.mxu1 %v1920_v49 }
  0x57   : > { %970 = vmatmul.mubr.bf16.gmra.mrb[24].mxu0 %v1921_v50  ;;  %1795 = vmatmul.mubr.bf16.gmra.mrb[24].mxu1 %v1922_v51 }
  0x58   : > { %977 = vmatprep.mubr.bf16.mxu0 %v1923_v52  ;;  %1798 = vmatprep.mubr.bf16.mxu1 %v1925_v53 }
  0x5f   : > { %978 = vmatmul.mubr.bf16.gmra.mrb[28].mxu0 %v1926_v54  ;;  %1799 = vmatmul.mubr.bf16.gmra.mrb[28].mxu1 %v1927_v55 }
  0x60   : > { %985 = vmatprep.mubr.bf16.mxu0 %v1928_v56  ;;  %1802 = vmatprep.mubr.bf16.mxu1 %v1930_v57 }
  0x67   : > { %986 = vmatmul.mubr.bf16.gmra.mrb[32].mxu0 %v1931_v58  ;;  %1803 = vmatmul.mubr.bf16.gmra.mrb[32].mxu1 %v1932_v59 }
  0x68   : > { %993 = vmatprep.mubr.bf16.mxu0 %v1933_v60  ;;  %1806 = vmatprep.mubr.bf16.mxu1 %v1935_v61  ;;  %v2162_v61 = vld [vmem:[%s2296_s2] ss:$0 sm:$0xff] }
  0x6f   : > { %994 = vmatmul.mubr.bf16.gmra.mrb[36].mxu0 %v1936_v62  ;;  %1807 = vmatmul.mubr.bf16.gmra.mrb[36].mxu1 %v1937_v63 }
  0x70   : > { %1001 = vmatprep.mubr.bf16.mxu0 %v1938_v0  ;;  %1810 = vmatprep.mubr.bf16.mxu1 %v1940_v1 }
  0x77   : > { %1002 = vmatmul.mubr.bf16.gmra.mrb[40].mxu0 %v1941_v2  ;;  %1811 = vmatmul.mubr.bf16.gmra.mrb[40].mxu1 %v1942_v3 }
  0x78   : > { %1009 = vmatprep.mubr.bf16.mxu0 %v1943_v4  ;;  %1814 = vmatprep.mubr.bf16.mxu1 %v1945_v5  ;;  %v2168_v5 = vld [vmem:[%s2297_s3] ss:$0 sm:$0xff] }
  0x7f   : > { %1010 = vmatmul.mubr.bf16.gmra.mrb[44].mxu0 %v1946_v6  ;;  %1815 = vmatmul.mubr.bf16.gmra.mrb[44].mxu1 %v1947_v7 }
  0xfa   : > { %v1650_v8 = vpop.f32.mrb[0].mxu0  ;;  %v1722_v9 = vpop.f32.mrb[0].mxu1 }
  0xfb   : > { %v1651_v10 = vpop.f32.mrb[1].mxu0  ;;  %v1723_v11 = vpop.f32.mrb[1].mxu1 }
  0xfc   : > { %v1652_v12 = vadd.f32 %v1651_v10, %v1650_v8  ;;  %v2143_v13 = vadd.f32 %v1723_v11, %v1722_v9  ;;  %v1653_v14 = vpop.f32.mrb[2].mxu0  ;;  %v1725_v15 = vpop.f32.mrb[2].mxu1 }
  0xfd   : > { %v1654_v16 = vpop.f32.mrb[3].mxu0  ;;  %v1726_v17 = vpop.f32.mrb[3].mxu1 }
  0xfe   : > { %v1655_v18 = vadd.f32 %v1654_v16, %v1653_v14  ;;  %v2145_v19 = vadd.f32 %v1726_v17, %v1725_v15 }
 0x102   : > { %v1656_v20 = vpop.f32.mrb[4].mxu0  ;;  %v1728_v21 = vpop.f32.mrb[4].mxu1 }
 0x103   : > { %v1657_v22 = vpop.f32.mrb[5].mxu0  ;;  %v1729_v23 = vpop.f32.mrb[5].mxu1 }
 0x104   : > { %v1658_v24 = vadd.f32 %v1657_v22, %v1656_v20  ;;  %v2147_v25 = vadd.f32 %v1729_v23, %v1728_v21  ;;  %v1659_v26 = vpop.f32.mrb[6].mxu0  ;;  %v1731_v27 = vpop.f32.mrb[6].mxu1 }
 0x105   : > { %v1660_v28 = vpop.f32.mrb[7].mxu0  ;;  %v1732_v29 = vpop.f32.mrb[7].mxu1 }
 0x106   : > { %v1661_v30 = vadd.f32 %v1660_v28, %v1659_v26  ;;  %v2149_v31 = vadd.f32 %v1732_v29, %v1731_v27 }
 0x10a   : > { %v1662_v32 = vpop.f32.mrb[8].mxu0  ;;  %v1734_v33 = vpop.f32.mrb[8].mxu1 }
 0x10b   : > { %v1663_v34 = vpop.f32.mrb[9].mxu0  ;;  %v1735_v35 = vpop.f32.mrb[9].mxu1 }
 0x10c   : > { %v1664_v36 = vadd.f32 %v1663_v34, %v1662_v32  ;;  %v2151_v37 = vadd.f32 %v1735_v35, %v1734_v33  ;;  %v1665_v38 = vpop.f32.mrb[10].mxu0  ;;  %v1737_v39 = vpop.f32.mrb[10].mxu1 }
 0x10d   : > { %v1666_v40 = vpop.f32.mrb[11].mxu0  ;;  %v1738_v41 = vpop.f32.mrb[11].mxu1 }
 0x10e   : > { %v1667_v42 = vadd.f32 %v1666_v40, %v1665_v38  ;;  %v2153_v43 = vadd.f32 %v1738_v41, %v1737_v39 }
 0x112   : > { %v1668_v44 = vpop.f32.mrb[12].mxu0  ;;  %v1740_v45 = vpop.f32.mrb[12].mxu1 }
 0x113   : > { %v1669_v46 = vpop.f32.mrb[13].mxu0  ;;  %v1741_v47 = vpop.f32.mrb[13].mxu1 }
 0x114   : > { %v1670_v48 = vadd.f32 %v1669_v46, %v1668_v44  ;;  %v2155_v49 = vadd.f32 %v1741_v47, %v1740_v45  ;;  %v1671_v50 = vpop.f32.mrb[14].mxu0  ;;  %v1743_v51 = vpop.f32.mrb[14].mxu1 }
 0x115   : > { %v1672_v52 = vpop.f32.mrb[15].mxu0  ;;  %v1744_v53 = vpop.f32.mrb[15].mxu1 }
 0x116   : > { %v1673_v54 = vadd.f32 %v1672_v52, %v1671_v50  ;;  %v2157_v55 = vadd.f32 %v1744_v53, %v1743_v51 }
 0x11a   : > { %v1674_v56 = vpop.f32.mrb[16].mxu0  ;;  %v1788_v57 = vpop.f32.mrb[16].mxu1 }
 0x11b   : > { %v1093_v58 = vadd.f32 %v1788_v57, %v1658_v24  ;;  %v1675_v59 = vpop.f32.mrb[17].mxu0  ;;  %v1084_v60 = vpop.f32.mrb[17].mxu1 }
 0x11c   : > { %v1676_v62 = vadd.f32 %v1675_v59, %v1674_v56  ;;  %v1085_v63 = vadd.f32 %v1652_v12, %v1084_v60  ;;  %v1677_v0 = vpop.f32.mrb[18].mxu0  ;;  %v1789_v1 = vpop.f32.mrb[18].mxu1 }
 0x11d   : > { %v1096_v2 = vadd.f32 %v1789_v1, %v1661_v30  ;;  %v1678_v3 = vpop.f32.mrb[19].mxu0  ;;  %v1087_v4 = vpop.f32.mrb[19].mxu1  ;;  %v1319_v8 = vmul.f32 %v2162_v61, %v1093_v58 }
 0x11e   : > { %v1679_v6 = vadd.f32 %v1678_v3, %v1677_v0  ;;  %v1088_v7 = vadd.f32 %v1655_v18, %v1087_v4  ;;  %v1317_v9 = vmul.f32 %v2162_v61, %v1085_v63 }
 0x11f   : > { %v1358_v10 = vadd.f32 %v2168_v5, %v1319_v8  ;;  %v1320_v11 = vmul.f32 %v2162_v61, %v1096_v2 }
 0x120   : > { %v1356_v12 = vadd.f32 %v2168_v5, %v1317_v9  ;;  %v1318_v14 = vmul.f32 %v2162_v61, %v1088_v7 }
 0x121   : > { %1390 = vst [vmem:[%s2174_s9 + $0x10] sm:$0xff] %v1358_v10  ;;  %v1359_v17 = vadd.f32 %v2168_v5, %v1320_v11 }
 0x122   : > { %v1680_v15 = vpop.f32.mrb[20].mxu0  ;;  %v1792_v16 = vpop.f32.mrb[20].mxu1  ;;  %1388 = vst [vmem:[%s2174_s9] sm:$0xff] %v1356_v12  ;;  %v1357_v22 = vadd.f32 %v2168_v5, %v1318_v14 }
 0x123   : > { %v1109_v18 = vadd.f32 %v1792_v16, %v1670_v48  ;;  %v1681_v20 = vpop.f32.mrb[21].mxu0  ;;  %v1100_v21 = vpop.f32.mrb[21].mxu1  ;;  %1391 = vst [vmem:[%s2174_s9 + $0x18] sm:$0xff] %v1359_v17 }
 0x124   : > { %v1682_v23 = vadd.f32 %v1681_v20, %v1680_v15  ;;  %v1101_v24 = vadd.f32 %v1664_v36, %v1100_v21  ;;  %v1683_v26 = vpop.f32.mrb[22].mxu0  ;;  %v1793_v27 = vpop.f32.mrb[22].mxu1  ;;  %1389 = vst [vmem:[%s2174_s9 + $0x8] sm:$0xff] %v1357_v22 }
 0x125   : > { %v1112_v28 = vadd.f32 %v1793_v27, %v1673_v54  ;;  %v1684_v29 = vpop.f32.mrb[23].mxu0  ;;  %v1103_v30 = vpop.f32.mrb[23].mxu1  ;;  %v1323_v34 = vmul.f32 %v2162_v61, %v1109_v18 }
 0x126   : > { %v1685_v32 = vadd.f32 %v1684_v29, %v1683_v26  ;;  %v1104_v33 = vadd.f32 %v1667_v42, %v1103_v30  ;;  %v1321_v35 = vmul.f32 %v2162_v61, %v1101_v24 }
 0x127   : > { %v1362_v38 = vadd.f32 %v2168_v5, %v1323_v34  ;;  %v1324_v39 = vmul.f32 %v2162_v61, %v1112_v28 }
 0x128   : > { %v1360_v36 = vadd.f32 %v2168_v5, %v1321_v35  ;;  %v1322_v40 = vmul.f32 %v2162_v61, %v1104_v33 }
 0x129   : > { %1394 = vst [vmem:[%s2174_s9 + $0x30] sm:$0xff] %v1362_v38  ;;  %v1363_v45 = vadd.f32 %v2168_v5, %v1324_v39 }
 0x12a   : > { %v1686_v41 = vpop.f32.mrb[24].mxu0  ;;  %v1796_v44 = vpop.f32.mrb[24].mxu1  ;;  %1392 = vst [vmem:[%s2174_s9 + $0x20] sm:$0xff] %v1360_v36  ;;  %v1361_v48 = vadd.f32 %v2168_v5, %v1322_v40 }
 0x12b   : > { %v1125_v42 = vadd.f32 %v1796_v44, %v1682_v23  ;;  %v1687_v46 = vpop.f32.mrb[25].mxu0  ;;  %v1116_v47 = vpop.f32.mrb[25].mxu1  ;;  %1395 = vst [vmem:[%s2174_s9 + $0x38] sm:$0xff] %v1363_v45 }
 0x12c   : > { %v1688_v50 = vadd.f32 %v1687_v46, %v1686_v41  ;;  %v1117_v51 = vadd.f32 %v1676_v62, %v1116_v47  ;;  %v1689_v52 = vpop.f32.mrb[26].mxu0  ;;  %v1797_v53 = vpop.f32.mrb[26].mxu1  ;;  %1393 = vst [vmem:[%s2174_s9 + $0x28] sm:$0xff] %v1361_v48 }
 0x12d   : > { %v1128_v54 = vadd.f32 %v1797_v53, %v1685_v32  ;;  %v1690_v56 = vpop.f32.mrb[27].mxu0  ;;  %v1119_v57 = vpop.f32.mrb[27].mxu1  ;;  %v1327_v60 = vmul.f32 %v2162_v61, %v1125_v42 }
 0x12e   : > { %v1691_v58 = vadd.f32 %v1690_v56, %v1689_v52  ;;  %v1120_v59 = vadd.f32 %v1679_v6, %v1119_v57  ;;  %v1325_v63 = vmul.f32 %v2162_v61, %v1117_v51 }
 0x12f   : > { %v1366_v0 = vadd.f32 %v2168_v5, %v1327_v60  ;;  %v1328_v62 = vmul.f32 %v2162_v61, %v1128_v54 }
 0x130   : > { %v1364_v1 = vadd.f32 %v2168_v5, %v1325_v63  ;;  %v1326_v2 = vmul.f32 %v2162_v61, %v1120_v59 }
 0x131   : > { %1398 = vst [vmem:[%s2174_s9 + $0x50] sm:$0xff] %v1366_v0  ;;  %v1367_v7 = vadd.f32 %v2168_v5, %v1328_v62 }
 0x132   : > { %v1692_v3 = vpop.f32.mrb[28].mxu0  ;;  %v1800_v4 = vpop.f32.mrb[28].mxu1  ;;  %1396 = vst [vmem:[%s2174_s9 + $0x40] sm:$0xff] %v1364_v1  ;;  %v1365_v9 = vadd.f32 %v2168_v5, %v1326_v2 }
 0x133   : > { %v1693_v6 = vpop.f32.mrb[29].mxu0  ;;  %v1132_v8 = vpop.f32.mrb[29].mxu1  ;;  %1399 = vst [vmem:[%s2174_s9 + $0x58] sm:$0xff] %v1367_v7 }
 0x134   : > { %v1694_v10 = vadd.f32 %v1693_v6, %v1692_v3  ;;  %v1133_v11 = vadd.f32 %v1688_v50, %v1132_v8  ;;  %v1695_v12 = vpop.f32.mrb[30].mxu0  ;;  %v1801_v14 = vpop.f32.mrb[30].mxu1  ;;  %1397 = vst [vmem:[%s2174_s9 + $0x48] sm:$0xff] %v1365_v9 }
 0x135   : > { %v1696_v15 = vpop.f32.mrb[31].mxu0  ;;  %v1135_v16 = vpop.f32.mrb[31].mxu1 }
 0x136   : > { %v1141_v17 = vadd.f32 %v1800_v4, %v1694_v10  ;;  %v1697_v18 = vadd.f32 %v1696_v15, %v1695_v12  ;;  %v1136_v20 = vadd.f32 %v1691_v58, %v1135_v16  ;;  %v1329_v21 = vmul.f32 %v2162_v61, %v1133_v11 }
 0x138   : > { %v1144_v22 = vadd.f32 %v1801_v14, %v1697_v18  ;;  %v1331_v23 = vmul.f32 %v2162_v61, %v1141_v17  ;;  %v1368_v24 = vadd.f32 %v2168_v5, %v1329_v21  ;;  %v1330_v26 = vmul.f32 %v2162_v61, %v1136_v20 }
 0x13a   : > { %v1698_v27 = vpop.f32.mrb[32].mxu0  ;;  %v1804_v28 = vpop.f32.mrb[32].mxu1  ;;  %v1370_v32 = vadd.f32 %v2168_v5, %v1331_v23  ;;  %1400 = vst [vmem:[%s2174_s9 + $0x60] sm:$0xff] %v1368_v24  ;;  %v1332_v33 = vmul.f32 %v2162_v61, %v1144_v22  ;;  %v1369_v34 = vadd.f32 %v2168_v5, %v1330_v26 }
 0x13b   : > { %v1699_v29 = vpop.f32.mrb[33].mxu0  ;;  %v1148_v30 = vpop.f32.mrb[33].mxu1 }
 0x13c   : > { %v1700_v35 = vadd.f32 %v1699_v29, %v1698_v27  ;;  %v1701_v38 = vpop.f32.mrb[34].mxu0  ;;  %v1805_v39 = vpop.f32.mrb[34].mxu1  ;;  %1402 = vst [vmem:[%s2174_s9 + $0x70] sm:$0xff] %v1370_v32  ;;  %v1371_v41 = vadd.f32 %v2168_v5, %v1332_v33  ;;  %1401 = vst [vmem:[%s2174_s9 + $0x68] sm:$0xff] %v1369_v34 }
 0x13d   : > { %v1702_v36 = vpop.f32.mrb[35].mxu0  ;;  %v1151_v40 = vpop.f32.mrb[35].mxu1 }
 0x13e   : > { %v1149_v44 = vadd.f32 %v1700_v35, %v1148_v30  ;;  %v1703_v45 = vadd.f32 %v1702_v36, %v1701_v38  ;;  %1403 = vst [vmem:[%s2174_s9 + $0x78] sm:$0xff] %v1371_v41 }
 0x140   : > { %v1152_v42 = vadd.f32 %v1703_v45, %v1151_v40  ;;  %v1333_v46 = vmul.f32 %v2162_v61, %v1149_v44 }
 0x142   : > { %v1704_v47 = vpop.f32.mrb[36].mxu0  ;;  %v2224_v48 = vpop.f32.mrb[36].mxu1  ;;  %v1372_v52 = vadd.f32 %v2168_v5, %v1333_v46  ;;  %v1334_v53 = vmul.f32 %v2162_v61, %v1152_v42 }
 0x143   : > { %v1705_v50 = vpop.f32.mrb[37].mxu0  ;;  %v1164_v51 = vpop.f32.mrb[37].mxu1 }
 0x144   : > { %v1706_v54 = vadd.f32 %v1705_v50, %v1704_v47  ;;  %v1707_v56 = vpop.f32.mrb[38].mxu0  ;;  %v2228_v57 = vpop.f32.mrb[38].mxu1  ;;  %1404 = vst [vmem:[%s2174_s9 + $0x80] sm:$0xff] %v1372_v52  ;;  %v1373_v60 = vadd.f32 %v2168_v5, %v1334_v53 }
 0x145   : > { %v1708_v58 = vpop.f32.mrb[39].mxu0  ;;  %v1167_v59 = vpop.f32.mrb[39].mxu1 }
 0x146   : > { %v1157_v63 = vadd.f32 %v1804_v28, %v1706_v54  ;;  %v1709_v0 = vadd.f32 %v1708_v58, %v1707_v56  ;;  %1405 = vst [vmem:[%s2174_s9 + $0x88] sm:$0xff] %v1373_v60 }
 0x148   : > { %v1160_v62 = vadd.f32 %v1805_v39, %v1709_v0  ;;  %v1335_v1 = vmul.f32 %v2162_v61, %v1157_v63 }
 0x14a   : > { %v1710_v2 = vpop.f32.mrb[40].mxu0  ;;  %v1812_v3 = vpop.f32.mrb[40].mxu1  ;;  %v1374_v8 = vadd.f32 %v2168_v5, %v1335_v1  ;;  %v1336_v9 = vmul.f32 %v2162_v61, %v1160_v62 }
 0x14b   : > { %v1189_v4 = vadd.f32 %v1812_v3, %v2147_v25  ;;  %v1711_v7 = vpop.f32.mrb[41].mxu0  ;;  %v1180_v6 = vpop.f32.mrb[41].mxu1 }
 0x14c   : > { %v1712_v10 = vadd.f32 %v1711_v7, %v1710_v2  ;;  %v1181_v11 = vadd.f32 %v2143_v13, %v1180_v6  ;;  %v1713_v12 = vpop.f32.mrb[42].mxu0  ;;  %v1813_v14 = vpop.f32.mrb[42].mxu1  ;;  %1406 = vst [vmem:[%s2174_s9 + $0x90] sm:$0xff] %v1374_v8  ;;  %v1375_v25 = vadd.f32 %v2168_v5, %v1336_v9 }
 0x14d   : > { %v1192_v15 = vadd.f32 %v1813_v14, %v2149_v31  ;;  %v1714_v16 = vpop.f32.mrb[43].mxu0  ;;  %v1183_v17 = vpop.f32.mrb[43].mxu1  ;;  %v1343_v21 = vmul.f32 %v2162_v61, %v1189_v4 }
 0x14e   : > { %v1165_v18 = vadd.f32 %v1712_v10, %v1164_v51  ;;  %v1715_v20 = vadd.f32 %v1714_v16, %v1713_v12  ;;  %v1184_v22 = vadd.f32 %v2145_v19, %v1183_v17  ;;  %1407 = vst [vmem:[%s2174_s9 + $0x98] sm:$0xff] %v1375_v25  ;;  %v1341_v13 = vmul.f32 %v2162_v61, %v1181_v11 }
 0x14f   : > { %v1382_v24 = vadd.f32 %v2168_v5, %v1343_v21  ;;  %v1344_v31 = vmul.f32 %v2162_v61, %v1192_v15 }
 0x150   : > { %v1168_v23 = vadd.f32 %v1715_v20, %v1167_v59  ;;  %v1337_v26 = vmul.f32 %v2162_v61, %v1165_v18  ;;  %v1380_v27 = vadd.f32 %v2168_v5, %v1341_v13  ;;  %v1342_v19 = vmul.f32 %v2162_v61, %v1184_v22 }
 0x151   : > { %1414 = vst [vmem:[%s2174_s9 + $0xd0] sm:$0xff] %v1382_v24  ;;  %v1383_v30 = vadd.f32 %v2168_v5, %v1344_v31 }
 0x152   : > { %v1716_v28 = vpop.f32.mrb[44].mxu0  ;;  %v1816_v29 = vpop.f32.mrb[44].mxu1  ;;  %v1376_v35 = vadd.f32 %v2168_v5, %v1337_v26  ;;  %1412 = vst [vmem:[%s2174_s9 + $0xc0] sm:$0xff] %v1380_v27  ;;  %v1338_v38 = vmul.f32 %v2162_v61, %v1168_v23  ;;  %v1381_v44 = vadd.f32 %v2168_v5, %v1342_v19 }
 0x153   : > { %v1205_v32 = vadd.f32 %v1816_v29, %v2155_v49  ;;  %v1717_v33 = vpop.f32.mrb[45].mxu0  ;;  %v1196_v34 = vpop.f32.mrb[45].mxu1  ;;  %1415 = vst [vmem:[%s2174_s9 + $0xd8] sm:$0xff] %v1383_v30 }
 0x154   : > { %v1718_v39 = vadd.f32 %v1717_v33, %v1716_v28  ;;  %v1197_v36 = vadd.f32 %v2151_v37, %v1196_v34  ;;  %v1719_v40 = vpop.f32.mrb[46].mxu0  ;;  %v1817_v41 = vpop.f32.mrb[46].mxu1  ;;  %1408 = vst [vmem:[%s2174_s9 + $0xa0] sm:$0xff] %v1376_v35  ;;  %v1377_v46 = vadd.f32 %v2168_v5, %v1338_v38  ;;  %1413 = vst [vmem:[%s2174_s9 + $0xc8] sm:$0xff] %v1381_v44 }
 0x155   : > { %v1208_v45 = vadd.f32 %v1817_v41, %v2157_v55  ;;  %v1720_v49 = vpop.f32.mrb[47].mxu0  ;;  %v1199_v42 = vpop.f32.mrb[47].mxu1  ;;  %v1347_v37 = vmul.f32 %v2162_v61, %v1205_v32 }
 0x156   : > { %v1173_v47 = vadd.f32 %v2224_v48, %v1718_v39  ;;  %v1721_v50 = vadd.f32 %v1720_v49, %v1719_v40  ;;  %v1200_v51 = vadd.f32 %v2153_v43, %v1199_v42  ;;  %1409 = vst [vmem:[%s2174_s9 + $0xa8] sm:$0xff] %v1377_v46  ;;  %v1345_v55 = vmul.f32 %v2162_v61, %v1197_v36 }
 0x157   : > { %v1386_v53 = vadd.f32 %v2168_v5, %v1347_v37  ;;  %v1348_v48 = vmul.f32 %v2162_v61, %v1208_v45 }
 0x158   : > { %v1176_v52 = vadd.f32 %v2228_v57, %v1721_v50  ;;  %v1339_v54 = vmul.f32 %v2162_v61, %v1173_v47  ;;  %v1384_v56 = vadd.f32 %v2168_v5, %v1345_v55  ;;  %v1346_v43 = vmul.f32 %v2162_v61, %v1200_v51 }
 0x159   : > { %1418 = vst [vmem:[%s2174_s9 + $0xf0] sm:$0xff] %v1386_v53  ;;  %v1387_v58 = vadd.f32 %v2168_v5, %v1348_v48 }
 0x15a   : > { %v1378_v59 = vadd.f32 %v2168_v5, %v1339_v54  ;;  %1416 = vst [vmem:[%s2174_s9 + $0xe0] sm:$0xff] %v1384_v56  ;;  %v1340_v60 = vmul.f32 %v2162_v61, %v1176_v52  ;;  %v1385_v57 = vadd.f32 %v2168_v5, %v1346_v43 }
 0x15b   : > { %1419 = vst [vmem:[%s2174_s9 + $0xf8] sm:$0xff] %v1387_v58 }
 0x15c   : > { %1410 = vst [vmem:[%s2174_s9 + $0xb0] sm:$0xff] %v1378_v59  ;;  %v1379_v63 = vadd.f32 %v2168_v5, %v1340_v60  ;;  %1417 = vst [vmem:[%s2174_s9 + $0xe8] sm:$0xff] %v1385_v57 }
 0x15e   : > { %1411 = vst [vmem:[%s2174_s9 + $0xb8] sm:$0xff] %v1379_v63 }
 0x15f PF: > { %s14_s17 = sadd.s32 1, %s1970_s17   ;;  %s2299_s15 = smov %s1966_s16 }
 0x160   : > { %p11_p5 = scmp.ge.s32.totalorder %s14_s17, 4   ;;  %s2300_s16 = smov %s2302_s18 }
 0x162   :  { %13 = sbr.rel (!%p11_p5) target bundleno = 2 (0x2), region = 83 }

</bundles_post_ra>
